<compile_context>
chip_gen: v7x
topology: tpu7x:2x2x1
jax: 0.10.0
libtpu: 0.0.40
codegen_flags: <defaults>
</compile_context>

<pallas_src>
import jax
import jax.numpy as jnp
from jax.experimental import pallas as pl
from jax.experimental.pallas import tpu as pltpu

INPUT_SIZE = 3
HIDDEN = 100          # logical hidden size (PyTorch module)
HP = 128              # lane-padded hidden size
NUM_LAYERS = 2
SEQ_LEN = 7
MLP_HIDDEN = 256
LEAKY_SLOPE = 0.01    # torch.nn.LeakyReLU default


# --------------------------------------------------------------------------- #
# Pallas kernel
# --------------------------------------------------------------------------- #
def gru_model_kernel(x_ref,                        # (TB, T*I)          f32 raw inputs
                     w0blk_ref, b0c_ref,           # (T*I, T*3*HP) bf16, (1, 3*HP) f32
                     wh0_ref, bh0n_ref,            # (HP, 3*HP) bf16,   (1, HP)   f32
                     wi1_ref, bi1c_ref, bh1n_ref,  # (HP, 3*HP) bf16,   (1, 3*HP) f32, (1, HP) f32
                     wh1_ref,                      # (HP, 3*HP) bf16
                     w1p_ref, bfc1_ref,            # (T, HP, 256) bf16, (1, 256) f32
                     w2_ref, b2_ref,               # (1, 256) f32,      (1, 1)   f32
                     y_ref,                        # (TB, 1) f32
                     gi0_ref, out0_ref, gi1_ref, acc_ref):   # VMEM scratch
    TB = x_ref.shape[0]
    T, Hp = SEQ_LEN, HP
    G = 3 * Hp

    b0c = b0c_ref[...]
    wh0 = wh0_ref[...]
    bh0n = bh0n_ref[...]
    wh1 = wh1_ref[...]
    bh1n = bh1n_ref[...]

    def cell(gi_t, h, wh, bhn):
        """One GRU step.  gi_t already contains bi_r+bh_r, bi_z+bh_z, bi_n.
        MXU operands bf16, gate math f32."""
        if h is None:  # t == 0, h_prev == 0 -> gh == 0, skip the recurrent matmul
            r = jax.nn.sigmoid(gi_t[:, 0:Hp])
            z = jax.nn.sigmoid(gi_t[:, Hp:2 * Hp])
            n = jnp.tanh(gi_t[:, 2 * Hp:] + r * bhn)
            return (1.0 - z) * n
        gh = jnp.dot(h.astype(jnp.bfloat16), wh,
                     preferred_element_type=jnp.float32)              # (TB, 3*Hp) f32
        r = jax.nn.sigmoid(gi_t[:, 0:Hp] + gh[:, 0:Hp])
        z = jax.nn.sigmoid(gi_t[:, Hp:2 * Hp] + gh[:, Hp:2 * Hp])
        n = jnp.tanh(gi_t[:, 2 * Hp:] + r * (gh[:, 2 * Hp:] + bhn))
        return (1.0 - z) * n + z * h

    # ---- layer-0 input projection for ALL timesteps: one hoisted bf16 matmul
    #      against a block-diagonal weight (K = T*I = 21), result into scratch --
    gi0_ref[...] = jnp.dot(x_ref[...].astype(jnp.bfloat16), w0blk_ref[...],
                           preferred_element_type=jnp.float32)        # (TB, T*3*Hp)

    # ---- layer 0 recurrence (hidden states written to VMEM scratch) ----------
    h0 = None
    for t in range(T):
        gi_t = gi0_ref[:, t * G:(t + 1) * G] + b0c                    # lane-aligned slice
        h0 = cell(gi_t, h0, wh0, bh0n)
        out0_ref[t * TB:(t + 1) * TB, :] = h0

    # ---- layer-1 input projection hoisted over time: one big bf16 MXU matmul --
    gi1_ref[...] = (jnp.dot(out0_ref[...].astype(jnp.bfloat16), wi1_ref[...],
                            preferred_element_type=jnp.float32) + bi1c_ref[...])

    # ---- layer 1 with FC1 folded into the recurrence --------------------------
    h1 = None
    for t in range(T):
        gi_t = gi1_ref[t * TB:(t + 1) * TB, :]
        h1 = cell(gi_t, h1, wh1, bh1n)
        contrib = jnp.dot(h1.astype(jnp.bfloat16), w1p_ref[t],
                          preferred_element_type=jnp.float32)          # (TB, 256)
        if t == 0:
            acc_ref[...] = contrib
        else:
            acc_ref[...] += contrib

    hfc = acc_ref[...] + bfc1_ref[...]
    hfc = jnp.where(hfc > 0, hfc, LEAKY_SLOPE * hfc)                   # LeakyReLU

    # 256 -> 1 head: VPU multiply + lane reduction (no degenerate N=1 MXU op)
    y = jnp.sum(hfc * w2_ref[...], axis=-1, keepdims=True) + b2_ref[...]
    y_ref[...] = y.astype(y_ref.dtype)


# --------------------------------------------------------------------------- #
# Wrapper
# --------------------------------------------------------------------------- #
def _round_up(v, m):
    return (v + m - 1) // m * m


def gru_model_forward(x, kernel_params, batch_tile=256):
    """x: (B, T, I) float32 -> (B, 1) float32.  batch_tile: 256 for v6e/v7x, 128 for v5e."""
    B, T, I = x.shape
    x2d = x.reshape(B, T * I).astype(jnp.float32)       # only ~21 floats/row streamed

    # Batch tile: multiple of 8 (f32 sublane).  Once the batch is big enough,
    # keep >= 2 tiles so the "parallel" grid axis feeds both v7x TensorCores.
    tb = min(batch_tile, _round_up(B, 8))
    if B >= 2 * 128:
        tb = min(tb, _round_up(-(-B // 2), 8))
    TB = max(8, _round_up(tb, 8))
    Bp = _round_up(B, TB)
    if Bp != B:
        x2d = jnp.pad(x2d, ((0, Bp - B), (0, 0)))

    def const_spec(shape):
        return pl.BlockSpec(shape, lambda *_: (0,) * len(shape))

    in_specs = [pl.BlockSpec((TB, T * I), lambda b: (b, 0))]
    in_specs += [const_spec(p.shape) for p in kernel_params]

    Hp = HP
    out = pl.pallas_call(
        gru_model_kernel,
        out_shape=jax.ShapeDtypeStruct((Bp, 1), jnp.float32),
        grid=(Bp // TB,),
        in_specs=in_specs,
        out_specs=pl.BlockSpec((TB, 1), lambda b: (b, 0)),
        scratch_shapes=[
            pltpu.VMEM((TB, T * 3 * Hp), jnp.float32),    # gi0 (all timesteps)
            pltpu.VMEM((T * TB, Hp), jnp.float32),        # layer-0 hidden states
            pltpu.VMEM((T * TB, 3 * Hp), jnp.float32),    # gi1 (all timesteps)
            pltpu.VMEM((TB, MLP_HIDDEN), jnp.float32),    # FC1 accumulator
        ],
        compiler_params=pltpu.CompilerParams(
            dimension_semantics=("parallel",),            # shard batch tiles across TCs (v7x)
            vmem_limit_bytes=32 * 1024 * 1024,            # ~9 MB used at TB=256; headroom for TB=512
        ),
    )(x2d, *kernel_params)
    return out[:B]


# --------------------------------------------------------------------------- #
# Parameters (PyTorch layout) + repacking for the kernel
# --------------------------------------------------------------------------- #
def init_params(key):
    """PyTorch-layout params, uniform(-1/sqrt(fan), 1/sqrt(fan))."""
    ks = iter(jax.random.split(key, 16))

    def u(k, shape, bound):
        return jax.random.uniform(k, shape, jnp.float32, -bound, bound)

    H = HIDDEN
    gb = H ** -0.5
    wih0 = u(next(ks), (3 * H, INPUT_SIZE), gb)
    whh0 = u(next(ks), (3 * H, H), gb)
    bih0 = u(next(ks), (3 * H,), gb)
    bhh0 = u(next(ks), (3 * H,), gb)
    wih1 = u(next(ks), (3 * H, H), gb)
    whh1 = u(next(ks), (3 * H, H), gb)
    bih1 = u(next(ks), (3 * H,), gb)
    bhh1 = u(next(ks), (3 * H,), gb)

    K = SEQ_LEN * H
    lb1 = K ** -0.5
    fc1w = u(next(ks), (MLP_HIDDEN, K), lb1)
    fc1b = u(next(ks), (MLP_HIDDEN,), lb1)
    lb2 = MLP_HIDDEN ** -0.5
    fc2w = u(next(ks), (1, MLP_HIDDEN), lb2)
    fc2b = u(next(ks), (1,), lb2)
    return (wih0, whh0, bih0, bhh0, wih1, whh1, bih1, bhh1,
            fc1w, fc1b, fc2w, fc2b)


def prepare_kernel_params(params):
    """Repack PyTorch-layout params into lane-padded, gate-major kernel params.
    MXU weights are stored in bf16 (f32 accumulation in-kernel); biases stay f32."""
    (wih0, whh0, bih0, bhh0, wih1, whh1, bih1, bhh1,
     fc1w, fc1b, fc2w, fc2b) = params
    H, Hp, T, I = HIDDEN, HP, SEQ_LEN, INPUT_SIZE
    bf16 = jnp.bfloat16

    def pad_cols(a):                     # (in, H) -> (in, Hp), zero padded
        return jnp.pad(a, ((0, 0), (0, Hp - H)))

    def pad_rows(a):                     # (H, n) -> (Hp, n), zero padded
        return jnp.pad(a, ((0, Hp - H), (0, 0)))

    def pack_gate_cols(w_t):             # (in, 3H) -> (in, 3*Hp), gate-major
        r, z, n = w_t[:, :H], w_t[:, H:2 * H], w_t[:, 2 * H:]
        return jnp.concatenate([pad_cols(r), pad_cols(z), pad_cols(n)], axis=1)

    def pack_bias(b):                    # (3H,) -> (1, 3*Hp), zero-padded lanes
        padv = lambda v: jnp.pad(v, (0, Hp - H))
        return jnp.concatenate([padv(b[:H]), padv(b[H:2 * H]), padv(b[2 * H:])])[None, :]

    # layer 0 — block-diagonal input-projection weight (one block per timestep):
    # gi0 for all T steps comes from ONE hoisted (TB, T*I) x (T*I, T*3*Hp) matmul.
    wi0p = pack_gate_cols(wih0.T)                                        # (I, 3*Hp)
    w0blk = jnp.zeros((T * I, T * 3 * Hp), jnp.float32)
    for t in range(T):
        w0blk = w0blk.at[t * I:(t + 1) * I, t * 3 * Hp:(t + 1) * 3 * Hp].set(wi0p)
    w0blk = w0blk.astype(bf16)
    b0c = pack_bias(jnp.concatenate([bih0[:2 * H] + bhh0[:2 * H], bih0[2 * H:]]))
    bh0n = jnp.pad(bhh0[2 * H:], (0, Hp - H))[None, :]                   # (1, Hp)

    # recurrent / layer-1 weights (bf16), biases pre-combined for r/z (f32)
    wh0p = pad_rows(pack_gate_cols(whh0.T)).astype(bf16)                 # (Hp, 3*Hp)
    wi1p = pad_rows(pack_gate_cols(wih1.T)).astype(bf16)
    bi1c = pack_bias(jnp.concatenate([bih1[:2 * H] + bhh1[:2 * H], bih1[2 * H:]]))
    bh1n = jnp.pad(bhh1[2 * H:], (0, Hp - H))[None, :]
    wh1p = pad_rows(pack_gate_cols(whh1.T)).astype(bf16)

    # FC1: (256, T*H) -> (T, Hp, 256) bf16 with zero-padded rows (folds into layer-1 loop)
    w1t = fc1w.T                                                         # (T*H, 256)
    w1p = jnp.stack([pad_rows(w1t[t * H:(t + 1) * H, :]) for t in range(T)],
                    axis=0).astype(bf16)
    bfc1 = fc1b[None, :]                                                 # (1, 256)
    w2row = fc2w.reshape(1, MLP_HIDDEN)                                  # (1, 256)
    b2 = fc2b.reshape(1, 1)                                              # (1, 1)

    return (w0blk, b0c, wh0p, bh0n, wi1p, bi1c, bh1n, wh1p, w1p, bfc1, w2row, b2)


# --------------------------------------------------------------------------- #
# Pure-JAX reference (PyTorch semantics, unpadded, f32) for validation
# --------------------------------------------------------------------------- #
def gru_model_reference(x, params):
    (wih0, whh0, bih0, bhh0, wih1, whh1, bih1, bhh1,
     fc1w, fc1b, fc2w, fc2b) = params
    B, T, _ = x.shape
    H = HIDDEN

    def run_layer(seq, wih, whh, bih, bhh):
        h = jnp.zeros((B, H), jnp.float32)
        outs = []
        for t in range(T):
            gi = seq[t] @ wih.T + bih
            gh = h @ whh.T + bhh
            r = jax.nn.sigmoid(gi[:, :H] + gh[:, :H])
            z = jax.nn.sigmoid(gi[:, H:2 * H] + gh[:, H:2 * H])
            n = jnp.tanh(gi[:, 2 * H:] + r * gh[:, 2 * H:])
            h = (1.0 - z) * n + z * h
            outs.append(h)
        return outs

    out0 = run_layer([x[:, t, :] for t in range(T)], wih0, whh0, bih0, bhh0)
    out1 = run_layer(out0, wih1, whh1, bih1, bhh1)
    flat = jnp.concatenate(out1, axis=1)
    h1 = flat @ fc1w.T + fc1b
    h1 = jnp.where(h1 > 0, h1, LEAKY_SLOPE * h1)
    return h1 @ fc2w.T + fc2b


# NOTE: the kernel uses bf16 MXU operands with f32 accumulation (per the perf
# review); the pure-f32 PyTorch-parity reference above is used with a 5e-2
# tolerance, which comfortably covers the bf16 quantization of weights/activations.

if __name__ == "__main__":
    key = jax.random.PRNGKey(0)
    k_x, k_p = jax.random.split(key)

    batch = 2
    x = jax.random.normal(k_x, (batch, SEQ_LEN, INPUT_SIZE), jnp.float32)
    params = init_params(k_p)
    kernel_params = prepare_kernel_params(params)

    y = jax.block_until_ready(gru_model_forward(x, kernel_params))
    y_ref = jax.block_until_ready(gru_model_reference(x, params))

    assert y.shape == (batch, 1)
    assert jnp.allclose(y, y_ref, rtol=5e-2, atol=5e-2), (y, y_ref)

    print("KERNEL_OK")
</pallas_src>

<mosaic_0001>
module attributes {stable_mosaic.version = 11 : i64} {
  func.func @gru_model_kernel(%arg0: i32, %arg1: memref<8x21xf32, #tpu.memory_space<vmem>>, %arg2: memref<21x2688xbf16, #tpu.memory_space<vmem>>, %arg3: memref<1x384xf32, #tpu.memory_space<vmem>>, %arg4: memref<128x384xbf16, #tpu.memory_space<vmem>>, %arg5: memref<1x128xf32, #tpu.memory_space<vmem>>, %arg6: memref<128x384xbf16, #tpu.memory_space<vmem>>, %arg7: memref<1x384xf32, #tpu.memory_space<vmem>>, %arg8: memref<1x128xf32, #tpu.memory_space<vmem>>, %arg9: memref<128x384xbf16, #tpu.memory_space<vmem>>, %arg10: memref<7x128x256xbf16, #tpu.memory_space<vmem>>, %arg11: memref<1x256xf32, #tpu.memory_space<vmem>>, %arg12: memref<1x256xf32, #tpu.memory_space<vmem>>, %arg13: memref<1x1xf32, #tpu.memory_space<vmem>>, %arg14: memref<8x1xf32, #tpu.memory_space<vmem>>, %arg15: memref<8x2688xf32, #tpu.memory_space<vmem>>, %arg16: memref<56x128xf32, #tpu.memory_space<vmem>>, %arg17: memref<56x384xf32, #tpu.memory_space<vmem>>, %arg18: memref<8x256xf32, #tpu.memory_space<vmem>>) attributes {dimension_semantics = [#tpu.dimension_semantics<parallel>], iteration_bounds = array<i64: 1>, scalar_prefetch = 0 : i64, scratch_operands = 4 : i64, tpu.core_type = #tpu.core_type<tc>, window_params = [{transform_indices = @transform_0, window_bounds = array<i64: 8, 21>}, {pipeline_mode = #tpu.pipeline_mode<synchronous>, transform_indices = @transform_1, window_bounds = array<i64: 21, 2688>}, {pipeline_mode = #tpu.pipeline_mode<synchronous>, transform_indices = @transform_2, window_bounds = array<i64: 1, 384>}, {pipeline_mode = #tpu.pipeline_mode<synchronous>, transform_indices = @transform_3, window_bounds = array<i64: 128, 384>}, {pipeline_mode = #tpu.pipeline_mode<synchronous>, transform_indices = @transform_4, window_bounds = array<i64: 1, 128>}, {pipeline_mode = #tpu.pipeline_mode<synchronous>, transform_indices = @transform_5, window_bounds = array<i64: 128, 384>}, {pipeline_mode = #tpu.pipeline_mode<synchronous>, transform_indices = @transform_6, window_bounds = array<i64: 1, 384>}, {pipeline_mode = #tpu.pipeline_mode<synchronous>, transform_indices = @transform_7, window_bounds = array<i64: 1, 128>}, {pipeline_mode = #tpu.pipeline_mode<synchronous>, transform_indices = @transform_8, window_bounds = array<i64: 128, 384>}, {pipeline_mode = #tpu.pipeline_mode<synchronous>, transform_indices = @transform_9, window_bounds = array<i64: 7, 128, 256>}, {pipeline_mode = #tpu.pipeline_mode<synchronous>, transform_indices = @transform_10, window_bounds = array<i64: 1, 256>}, {pipeline_mode = #tpu.pipeline_mode<synchronous>, transform_indices = @transform_11, window_bounds = array<i64: 1, 256>}, {pipeline_mode = #tpu.pipeline_mode<synchronous>, transform_indices = @transform_12, window_bounds = array<i64: 1, 1>}, {transform_indices = @transform_13, window_bounds = array<i64: 8, 1>}]} {
    %c0 = arith.constant 0 : index
    %c0_0 = arith.constant 0 : index
    %0 = vector.load %arg3[%c0, %c0_0] : memref<1x384xf32, #tpu.memory_space<vmem>>, vector<1x384xf32>
    %c0_1 = arith.constant 0 : index
    %c0_2 = arith.constant 0 : index
    %1 = vector.load %arg4[%c0_1, %c0_2] : memref<128x384xbf16, #tpu.memory_space<vmem>>, vector<128x384xbf16>
    %c0_3 = arith.constant 0 : index
    %c0_4 = arith.constant 0 : index
    %2 = vector.load %arg5[%c0_3, %c0_4] : memref<1x128xf32, #tpu.memory_space<vmem>>, vector<1x128xf32>
    %c0_5 = arith.constant 0 : index
    %c0_6 = arith.constant 0 : index
    %3 = vector.load %arg9[%c0_5, %c0_6] : memref<128x384xbf16, #tpu.memory_space<vmem>>, vector<128x384xbf16>
    %c0_7 = arith.constant 0 : index
    %c0_8 = arith.constant 0 : index
    %4 = vector.load %arg8[%c0_7, %c0_8] : memref<1x128xf32, #tpu.memory_space<vmem>>, vector<1x128xf32>
    %c0_9 = arith.constant 0 : index
    %c0_10 = arith.constant 0 : index
    %5 = vector.load %arg1[%c0_9, %c0_10] : memref<8x21xf32, #tpu.memory_space<vmem>>, vector<8x21xf32>
    %6 = arith.truncf %5 : vector<8x21xf32> to vector<8x21xbf16>
    %c0_11 = arith.constant 0 : index
    %c0_12 = arith.constant 0 : index
    %7 = vector.load %arg2[%c0_11, %c0_12] : memref<21x2688xbf16, #tpu.memory_space<vmem>>, vector<21x2688xbf16>
    %cst = arith.constant dense<0.000000e+00> : vector<8x2688xf32>
    %8 = tpu.matmul %6, %7, %cst {dimension_numbers = #tpu.dot_dimension_numbers<[1], [0], [0], [1], [0, 0, 1, 1], [], []>} : vector<8x21xbf16>, vector<21x2688xbf16>, vector<8x2688xf32> -> vector<8x2688xf32>
    %c0_13 = arith.constant 0 : index
    %c0_14 = arith.constant 0 : index
    %9 = vector.load %arg15[%c0_13, %c0_14] : memref<8x2688xf32, #tpu.memory_space<vmem>>, vector<8x2688xf32>
    tpu.vector_store %arg15[%c0_13, %c0_14], %8 {strides = array<i32>} : memref<8x2688xf32, #tpu.memory_space<vmem>>, vector<8x2688xf32>,
    %c0_15 = arith.constant 0 : index
    %c0_16 = arith.constant 0 : index
    %10 = vector.load %arg15[%c0_15, %c0_16] : memref<8x2688xf32, #tpu.memory_space<vmem>>, vector<8x384xf32>
    %11 = vector.broadcast %0 : vector<1x384xf32> to vector<8x384xf32>
    %12 = arith.addf %10, %11 : vector<8x384xf32>
    %13 = vector.extract_strided_slice %12 {offsets = [0, 0], sizes = [8, 128], strides = [1, 1]} : vector<8x384xf32> to vector<8x128xf32>
    %14 = arith.negf %13 : vector<8x128xf32>
    %15 = math.exp %14 : vector<8x128xf32>
    %cst_17 = arith.constant 1.000000e+00 : f32
    %16 = vector.broadcast %cst_17 : f32 to vector<8x128xf32>
    %17 = arith.addf %16, %15 : vector<8x128xf32>
    %18 = arith.divf %16, %17 : vector<8x128xf32>
    %19 = vector.extract_strided_slice %12 {offsets = [0, 128], sizes = [8, 128], strides = [1, 1]} : vector<8x384xf32> to vector<8x128xf32>
    %20 = arith.negf %19 : vector<8x128xf32>
    %21 = math.exp %20 : vector<8x128xf32>
    %cst_18 = arith.constant 1.000000e+00 : f32
    %22 = vector.broadcast %cst_18 : f32 to vector<8x128xf32>
    %23 = arith.addf %22, %21 : vector<8x128xf32>
    %24 = arith.divf %22, %23 : vector<8x128xf32>
    %25 = vector.extract_strided_slice %12 {offsets = [0, 256], sizes = [8, 128], strides = [1, 1]} : vector<8x384xf32> to vector<8x128xf32>
    %26 = vector.broadcast %2 : vector<1x128xf32> to vector<8x128xf32>
    %27 = arith.mulf %18, %26 : vector<8x128xf32>
    %28 = arith.addf %25, %27 : vector<8x128xf32>
    %29 = math.tanh %28 : vector<8x128xf32>
    %cst_19 = arith.constant 1.000000e+00 : f32
    %30 = vector.broadcast %cst_19 : f32 to vector<8x128xf32>
    %31 = arith.subf %30, %24 : vector<8x128xf32>
    %32 = arith.mulf %31, %29 : vector<8x128xf32>
    %c0_20 = arith.constant 0 : index
    %c0_21 = arith.constant 0 : index
    %33 = vector.load %arg16[%c0_20, %c0_21] : memref<56x128xf32, #tpu.memory_space<vmem>>, vector<8x128xf32>
    tpu.vector_store %arg16[%c0_20, %c0_21], %32 {strides = array<i32>} : memref<56x128xf32, #tpu.memory_space<vmem>>, vector<8x128xf32>,
    %c0_22 = arith.constant 0 : index
    %c384 = arith.constant 384 : index
    %34 = vector.load %arg15[%c0_22, %c384] : memref<8x2688xf32, #tpu.memory_space<vmem>>, vector<8x384xf32>
    %35 = vector.broadcast %0 : vector<1x384xf32> to vector<8x384xf32>
    %36 = arith.addf %34, %35 : vector<8x384xf32>
    %37 = arith.truncf %32 : vector<8x128xf32> to vector<8x128xbf16>
    %cst_23 = arith.constant dense<0.000000e+00> : vector<8x384xf32>
    %38 = tpu.matmul %37, %1, %cst_23 {dimension_numbers = #tpu.dot_dimension_numbers<[1], [0], [0], [1], [0, 0, 1, 1], [], []>} : vector<8x128xbf16>, vector<128x384xbf16>, vector<8x384xf32> -> vector<8x384xf32>
    %39 = vector.extract_strided_slice %36 {offsets = [0, 0], sizes = [8, 128], strides = [1, 1]} : vector<8x384xf32> to vector<8x128xf32>
    %40 = vector.extract_strided_slice %38 {offsets = [0, 0], sizes = [8, 128], strides = [1, 1]} : vector<8x384xf32> to vector<8x128xf32>
    %41 = arith.addf %39, %40 : vector<8x128xf32>
    %42 = arith.negf %41 : vector<8x128xf32>
    %43 = math.exp %42 : vector<8x128xf32>
    %cst_24 = arith.constant 1.000000e+00 : f32
    %44 = vector.broadcast %cst_24 : f32 to vector<8x128xf32>
    %45 = arith.addf %44, %43 : vector<8x128xf32>
    %46 = arith.divf %44, %45 : vector<8x128xf32>
    %47 = vector.extract_strided_slice %36 {offsets = [0, 128], sizes = [8, 128], strides = [1, 1]} : vector<8x384xf32> to vector<8x128xf32>
    %48 = vector.extract_strided_slice %38 {offsets = [0, 128], sizes = [8, 128], strides = [1, 1]} : vector<8x384xf32> to vector<8x128xf32>
    %49 = arith.addf %47, %48 : vector<8x128xf32>
    %50 = arith.negf %49 : vector<8x128xf32>
    %51 = math.exp %50 : vector<8x128xf32>
    %cst_25 = arith.constant 1.000000e+00 : f32
    %52 = vector.broadcast %cst_25 : f32 to vector<8x128xf32>
    %53 = arith.addf %52, %51 : vector<8x128xf32>
    %54 = arith.divf %52, %53 : vector<8x128xf32>
    %55 = vector.extract_strided_slice %36 {offsets = [0, 256], sizes = [8, 128], strides = [1, 1]} : vector<8x384xf32> to vector<8x128xf32>
    %56 = vector.extract_strided_slice %38 {offsets = [0, 256], sizes = [8, 128], strides = [1, 1]} : vector<8x384xf32> to vector<8x128xf32>
    %57 = vector.broadcast %2 : vector<1x128xf32> to vector<8x128xf32>
    %58 = arith.addf %56, %57 : vector<8x128xf32>
    %59 = arith.mulf %46, %58 : vector<8x128xf32>
    %60 = arith.addf %55, %59 : vector<8x128xf32>
    %61 = math.tanh %60 : vector<8x128xf32>
    %cst_26 = arith.constant 1.000000e+00 : f32
    %62 = vector.broadcast %cst_26 : f32 to vector<8x128xf32>
    %63 = arith.subf %62, %54 : vector<8x128xf32>
    %64 = arith.mulf %63, %61 : vector<8x128xf32>
    %65 = arith.mulf %54, %32 : vector<8x128xf32>
    %66 = arith.addf %64, %65 : vector<8x128xf32>
    %c8 = arith.constant 8 : index
    %c0_27 = arith.constant 0 : index
    %67 = vector.load %arg16[%c8, %c0_27] : memref<56x128xf32, #tpu.memory_space<vmem>>, vector<8x128xf32>
    tpu.vector_store %arg16[%c8, %c0_27], %66 {strides = array<i32>} : memref<56x128xf32, #tpu.memory_space<vmem>>, vector<8x128xf32>,
    %c0_28 = arith.constant 0 : index
    %c768 = arith.constant 768 : index
    %68 = vector.load %arg15[%c0_28, %c768] : memref<8x2688xf32, #tpu.memory_space<vmem>>, vector<8x384xf32>
    %69 = vector.broadcast %0 : vector<1x384xf32> to vector<8x384xf32>
    %70 = arith.addf %68, %69 : vector<8x384xf32>
    %71 = arith.truncf %66 : vector<8x128xf32> to vector<8x128xbf16>
    %cst_29 = arith.constant dense<0.000000e+00> : vector<8x384xf32>
    %72 = tpu.matmul %71, %1, %cst_29 {dimension_numbers = #tpu.dot_dimension_numbers<[1], [0], [0], [1], [0, 0, 1, 1], [], []>} : vector<8x128xbf16>, vector<128x384xbf16>, vector<8x384xf32> -> vector<8x384xf32>
    %73 = vector.extract_strided_slice %70 {offsets = [0, 0], sizes = [8, 128], strides = [1, 1]} : vector<8x384xf32> to vector<8x128xf32>
    %74 = vector.extract_strided_slice %72 {offsets = [0, 0], sizes = [8, 128], strides = [1, 1]} : vector<8x384xf32> to vector<8x128xf32>
    %75 = arith.addf %73, %74 : vector<8x128xf32>
    %76 = arith.negf %75 : vector<8x128xf32>
    %77 = math.exp %76 : vector<8x128xf32>
    %cst_30 = arith.constant 1.000000e+00 : f32
    %78 = vector.broadcast %cst_30 : f32 to vector<8x128xf32>
    %79 = arith.addf %78, %77 : vector<8x128xf32>
    %80 = arith.divf %78, %79 : vector<8x128xf32>
    %81 = vector.extract_strided_slice %70 {offsets = [0, 128], sizes = [8, 128], strides = [1, 1]} : vector<8x384xf32> to vector<8x128xf32>
    %82 = vector.extract_strided_slice %72 {offsets = [0, 128], sizes = [8, 128], strides = [1, 1]} : vector<8x384xf32> to vector<8x128xf32>
    %83 = arith.addf %81, %82 : vector<8x128xf32>
    %84 = arith.negf %83 : vector<8x128xf32>
    %85 = math.exp %84 : vector<8x128xf32>
    %cst_31 = arith.constant 1.000000e+00 : f32
    %86 = vector.broadcast %cst_31 : f32 to vector<8x128xf32>
    %87 = arith.addf %86, %85 : vector<8x128xf32>
    %88 = arith.divf %86, %87 : vector<8x128xf32>
    %89 = vector.extract_strided_slice %70 {offsets = [0, 256], sizes = [8, 128], strides = [1, 1]} : vector<8x384xf32> to vector<8x128xf32>
    %90 = vector.extract_strided_slice %72 {offsets = [0, 256], sizes = [8, 128], strides = [1, 1]} : vector<8x384xf32> to vector<8x128xf32>
    %91 = vector.broadcast %2 : vector<1x128xf32> to vector<8x128xf32>
    %92 = arith.addf %90, %91 : vector<8x128xf32>
    %93 = arith.mulf %80, %92 : vector<8x128xf32>
    %94 = arith.addf %89, %93 : vector<8x128xf32>
    %95 = math.tanh %94 : vector<8x128xf32>
    %cst_32 = arith.constant 1.000000e+00 : f32
    %96 = vector.broadcast %cst_32 : f32 to vector<8x128xf32>
    %97 = arith.subf %96, %88 : vector<8x128xf32>
    %98 = arith.mulf %97, %95 : vector<8x128xf32>
    %99 = arith.mulf %88, %66 : vector<8x128xf32>
    %100 = arith.addf %98, %99 : vector<8x128xf32>
    %c16 = arith.constant 16 : index
    %c0_33 = arith.constant 0 : index
    %101 = vector.load %arg16[%c16, %c0_33] : memref<56x128xf32, #tpu.memory_space<vmem>>, vector<8x128xf32>
    tpu.vector_store %arg16[%c16, %c0_33], %100 {strides = array<i32>} : memref<56x128xf32, #tpu.memory_space<vmem>>, vector<8x128xf32>,
    %c0_34 = arith.constant 0 : index
    %c1152 = arith.constant 1152 : index
    %102 = vector.load %arg15[%c0_34, %c1152] : memref<8x2688xf32, #tpu.memory_space<vmem>>, vector<8x384xf32>
    %103 = vector.broadcast %0 : vector<1x384xf32> to vector<8x384xf32>
    %104 = arith.addf %102, %103 : vector<8x384xf32>
    %105 = arith.truncf %100 : vector<8x128xf32> to vector<8x128xbf16>
    %cst_35 = arith.constant dense<0.000000e+00> : vector<8x384xf32>
    %106 = tpu.matmul %105, %1, %cst_35 {dimension_numbers = #tpu.dot_dimension_numbers<[1], [0], [0], [1], [0, 0, 1, 1], [], []>} : vector<8x128xbf16>, vector<128x384xbf16>, vector<8x384xf32> -> vector<8x384xf32>
    %107 = vector.extract_strided_slice %104 {offsets = [0, 0], sizes = [8, 128], strides = [1, 1]} : vector<8x384xf32> to vector<8x128xf32>
    %108 = vector.extract_strided_slice %106 {offsets = [0, 0], sizes = [8, 128], strides = [1, 1]} : vector<8x384xf32> to vector<8x128xf32>
    %109 = arith.addf %107, %108 : vector<8x128xf32>
    %110 = arith.negf %109 : vector<8x128xf32>
    %111 = math.exp %110 : vector<8x128xf32>
    %cst_36 = arith.constant 1.000000e+00 : f32
    %112 = vector.broadcast %cst_36 : f32 to vector<8x128xf32>
    %113 = arith.addf %112, %111 : vector<8x128xf32>
    %114 = arith.divf %112, %113 : vector<8x128xf32>
    %115 = vector.extract_strided_slice %104 {offsets = [0, 128], sizes = [8, 128], strides = [1, 1]} : vector<8x384xf32> to vector<8x128xf32>
    %116 = vector.extract_strided_slice %106 {offsets = [0, 128], sizes = [8, 128], strides = [1, 1]} : vector<8x384xf32> to vector<8x128xf32>
    %117 = arith.addf %115, %116 : vector<8x128xf32>
    %118 = arith.negf %117 : vector<8x128xf32>
    %119 = math.exp %118 : vector<8x128xf32>
    %cst_37 = arith.constant 1.000000e+00 : f32
    %120 = vector.broadcast %cst_37 : f32 to vector<8x128xf32>
    %121 = arith.addf %120, %119 : vector<8x128xf32>
    %122 = arith.divf %120, %121 : vector<8x128xf32>
    %123 = vector.extract_strided_slice %104 {offsets = [0, 256], sizes = [8, 128], strides = [1, 1]} : vector<8x384xf32> to vector<8x128xf32>
    %124 = vector.extract_strided_slice %106 {offsets = [0, 256], sizes = [8, 128], strides = [1, 1]} : vector<8x384xf32> to vector<8x128xf32>
    %125 = vector.broadcast %2 : vector<1x128xf32> to vector<8x128xf32>
    %126 = arith.addf %124, %125 : vector<8x128xf32>
    %127 = arith.mulf %114, %126 : vector<8x128xf32>
    %128 = arith.addf %123, %127 : vector<8x128xf32>
    %129 = math.tanh %128 : vector<8x128xf32>
    %cst_38 = arith.constant 1.000000e+00 : f32
    %130 = vector.broadcast %cst_38 : f32 to vector<8x128xf32>
    %131 = arith.subf %130, %122 : vector<8x128xf32>
    %132 = arith.mulf %131, %129 : vector<8x128xf32>
    %133 = arith.mulf %122, %100 : vector<8x128xf32>
    %134 = arith.addf %132, %133 : vector<8x128xf32>
    %c24 = arith.constant 24 : index
    %c0_39 = arith.constant 0 : index
    %135 = vector.load %arg16[%c24, %c0_39] : memref<56x128xf32, #tpu.memory_space<vmem>>, vector<8x128xf32>
    tpu.vector_store %arg16[%c24, %c0_39], %134 {strides = array<i32>} : memref<56x128xf32, #tpu.memory_space<vmem>>, vector<8x128xf32>,
    %c0_40 = arith.constant 0 : index
    %c1536 = arith.constant 1536 : index
    %136 = vector.load %arg15[%c0_40, %c1536] : memref<8x2688xf32, #tpu.memory_space<vmem>>, vector<8x384xf32>
    %137 = vector.broadcast %0 : vector<1x384xf32> to vector<8x384xf32>
    %138 = arith.addf %136, %137 : vector<8x384xf32>
    %139 = arith.truncf %134 : vector<8x128xf32> to vector<8x128xbf16>
    %cst_41 = arith.constant dense<0.000000e+00> : vector<8x384xf32>
    %140 = tpu.matmul %139, %1, %cst_41 {dimension_numbers = #tpu.dot_dimension_numbers<[1], [0], [0], [1], [0, 0, 1, 1], [], []>} : vector<8x128xbf16>, vector<128x384xbf16>, vector<8x384xf32> -> vector<8x384xf32>
    %141 = vector.extract_strided_slice %138 {offsets = [0, 0], sizes = [8, 128], strides = [1, 1]} : vector<8x384xf32> to vector<8x128xf32>
    %142 = vector.extract_strided_slice %140 {offsets = [0, 0], sizes = [8, 128], strides = [1, 1]} : vector<8x384xf32> to vector<8x128xf32>
    %143 = arith.addf %141, %142 : vector<8x128xf32>
    %144 = arith.negf %143 : vector<8x128xf32>
    %145 = math.exp %144 : vector<8x128xf32>
    %cst_42 = arith.constant 1.000000e+00 : f32
    %146 = vector.broadcast %cst_42 : f32 to vector<8x128xf32>
    %147 = arith.addf %146, %145 : vector<8x128xf32>
    %148 = arith.divf %146, %147 : vector<8x128xf32>
    %149 = vector.extract_strided_slice %138 {offsets = [0, 128], sizes = [8, 128], strides = [1, 1]} : vector<8x384xf32> to vector<8x128xf32>
    %150 = vector.extract_strided_slice %140 {offsets = [0, 128], sizes = [8, 128], strides = [1, 1]} : vector<8x384xf32> to vector<8x128xf32>
    %151 = arith.addf %149, %150 : vector<8x128xf32>
    %152 = arith.negf %151 : vector<8x128xf32>
    %153 = math.exp %152 : vector<8x128xf32>
    %cst_43 = arith.constant 1.000000e+00 : f32
    %154 = vector.broadcast %cst_43 : f32 to vector<8x128xf32>
    %155 = arith.addf %154, %153 : vector<8x128xf32>
    %156 = arith.divf %154, %155 : vector<8x128xf32>
    %157 = vector.extract_strided_slice %138 {offsets = [0, 256], sizes = [8, 128], strides = [1, 1]} : vector<8x384xf32> to vector<8x128xf32>
    %158 = vector.extract_strided_slice %140 {offsets = [0, 256], sizes = [8, 128], strides = [1, 1]} : vector<8x384xf32> to vector<8x128xf32>
    %159 = vector.broadcast %2 : vector<1x128xf32> to vector<8x128xf32>
    %160 = arith.addf %158, %159 : vector<8x128xf32>
    %161 = arith.mulf %148, %160 : vector<8x128xf32>
    %162 = arith.addf %157, %161 : vector<8x128xf32>
    %163 = math.tanh %162 : vector<8x128xf32>
    %cst_44 = arith.constant 1.000000e+00 : f32
    %164 = vector.broadcast %cst_44 : f32 to vector<8x128xf32>
    %165 = arith.subf %164, %156 : vector<8x128xf32>
    %166 = arith.mulf %165, %163 : vector<8x128xf32>
    %167 = arith.mulf %156, %134 : vector<8x128xf32>
    %168 = arith.addf %166, %167 : vector<8x128xf32>
    %c32 = arith.constant 32 : index
    %c0_45 = arith.constant 0 : index
    %169 = vector.load %arg16[%c32, %c0_45] : memref<56x128xf32, #tpu.memory_space<vmem>>, vector<8x128xf32>
    tpu.vector_store %arg16[%c32, %c0_45], %168 {strides = array<i32>} : memref<56x128xf32, #tpu.memory_space<vmem>>, vector<8x128xf32>,
    %c0_46 = arith.constant 0 : index
    %c1920 = arith.constant 1920 : index
    %170 = vector.load %arg15[%c0_46, %c1920] : memref<8x2688xf32, #tpu.memory_space<vmem>>, vector<8x384xf32>
    %171 = vector.broadcast %0 : vector<1x384xf32> to vector<8x384xf32>
    %172 = arith.addf %170, %171 : vector<8x384xf32>
    %173 = arith.truncf %168 : vector<8x128xf32> to vector<8x128xbf16>
    %cst_47 = arith.constant dense<0.000000e+00> : vector<8x384xf32>
    %174 = tpu.matmul %173, %1, %cst_47 {dimension_numbers = #tpu.dot_dimension_numbers<[1], [0], [0], [1], [0, 0, 1, 1], [], []>} : vector<8x128xbf16>, vector<128x384xbf16>, vector<8x384xf32> -> vector<8x384xf32>
    %175 = vector.extract_strided_slice %172 {offsets = [0, 0], sizes = [8, 128], strides = [1, 1]} : vector<8x384xf32> to vector<8x128xf32>
    %176 = vector.extract_strided_slice %174 {offsets = [0, 0], sizes = [8, 128], strides = [1, 1]} : vector<8x384xf32> to vector<8x128xf32>
    %177 = arith.addf %175, %176 : vector<8x128xf32>
    %178 = arith.negf %177 : vector<8x128xf32>
    %179 = math.exp %178 : vector<8x128xf32>
    %cst_48 = arith.constant 1.000000e+00 : f32
    %180 = vector.broadcast %cst_48 : f32 to vector<8x128xf32>
    %181 = arith.addf %180, %179 : vector<8x128xf32>
    %182 = arith.divf %180, %181 : vector<8x128xf32>
    %183 = vector.extract_strided_slice %172 {offsets = [0, 128], sizes = [8, 128], strides = [1, 1]} : vector<8x384xf32> to vector<8x128xf32>
    %184 = vector.extract_strided_slice %174 {offsets = [0, 128], sizes = [8, 128], strides = [1, 1]} : vector<8x384xf32> to vector<8x128xf32>
    %185 = arith.addf %183, %184 : vector<8x128xf32>
    %186 = arith.negf %185 : vector<8x128xf32>
    %187 = math.exp %186 : vector<8x128xf32>
    %cst_49 = arith.constant 1.000000e+00 : f32
    %188 = vector.broadcast %cst_49 : f32 to vector<8x128xf32>
    %189 = arith.addf %188, %187 : vector<8x128xf32>
    %190 = arith.divf %188, %189 : vector<8x128xf32>
    %191 = vector.extract_strided_slice %172 {offsets = [0, 256], sizes = [8, 128], strides = [1, 1]} : vector<8x384xf32> to vector<8x128xf32>
    %192 = vector.extract_strided_slice %174 {offsets = [0, 256], sizes = [8, 128], strides = [1, 1]} : vector<8x384xf32> to vector<8x128xf32>
    %193 = vector.broadcast %2 : vector<1x128xf32> to vector<8x128xf32>
    %194 = arith.addf %192, %193 : vector<8x128xf32>
    %195 = arith.mulf %182, %194 : vector<8x128xf32>
    %196 = arith.addf %191, %195 : vector<8x128xf32>
    %197 = math.tanh %196 : vector<8x128xf32>
    %cst_50 = arith.constant 1.000000e+00 : f32
    %198 = vector.broadcast %cst_50 : f32 to vector<8x128xf32>
    %199 = arith.subf %198, %190 : vector<8x128xf32>
    %200 = arith.mulf %199, %197 : vector<8x128xf32>
    %201 = arith.mulf %190, %168 : vector<8x128xf32>
    %202 = arith.addf %200, %201 : vector<8x128xf32>
    %c40 = arith.constant 40 : index
    %c0_51 = arith.constant 0 : index
    %203 = vector.load %arg16[%c40, %c0_51] : memref<56x128xf32, #tpu.memory_space<vmem>>, vector<8x128xf32>
    tpu.vector_store %arg16[%c40, %c0_51], %202 {strides = array<i32>} : memref<56x128xf32, #tpu.memory_space<vmem>>, vector<8x128xf32>,
    %c0_52 = arith.constant 0 : index
    %c2304 = arith.constant 2304 : index
    %204 = vector.load %arg15[%c0_52, %c2304] : memref<8x2688xf32, #tpu.memory_space<vmem>>, vector<8x384xf32>
    %205 = vector.broadcast %0 : vector<1x384xf32> to vector<8x384xf32>
    %206 = arith.addf %204, %205 : vector<8x384xf32>
    %207 = arith.truncf %202 : vector<8x128xf32> to vector<8x128xbf16>
    %cst_53 = arith.constant dense<0.000000e+00> : vector<8x384xf32>
    %208 = tpu.matmul %207, %1, %cst_53 {dimension_numbers = #tpu.dot_dimension_numbers<[1], [0], [0], [1], [0, 0, 1, 1], [], []>} : vector<8x128xbf16>, vector<128x384xbf16>, vector<8x384xf32> -> vector<8x384xf32>
    %209 = vector.extract_strided_slice %206 {offsets = [0, 0], sizes = [8, 128], strides = [1, 1]} : vector<8x384xf32> to vector<8x128xf32>
    %210 = vector.extract_strided_slice %208 {offsets = [0, 0], sizes = [8, 128], strides = [1, 1]} : vector<8x384xf32> to vector<8x128xf32>
    %211 = arith.addf %209, %210 : vector<8x128xf32>
    %212 = arith.negf %211 : vector<8x128xf32>
    %213 = math.exp %212 : vector<8x128xf32>
    %cst_54 = arith.constant 1.000000e+00 : f32
    %214 = vector.broadcast %cst_54 : f32 to vector<8x128xf32>
    %215 = arith.addf %214, %213 : vector<8x128xf32>
    %216 = arith.divf %214, %215 : vector<8x128xf32>
    %217 = vector.extract_strided_slice %206 {offsets = [0, 128], sizes = [8, 128], strides = [1, 1]} : vector<8x384xf32> to vector<8x128xf32>
    %218 = vector.extract_strided_slice %208 {offsets = [0, 128], sizes = [8, 128], strides = [1, 1]} : vector<8x384xf32> to vector<8x128xf32>
    %219 = arith.addf %217, %218 : vector<8x128xf32>
    %220 = arith.negf %219 : vector<8x128xf32>
    %221 = math.exp %220 : vector<8x128xf32>
    %cst_55 = arith.constant 1.000000e+00 : f32
    %222 = vector.broadcast %cst_55 : f32 to vector<8x128xf32>
    %223 = arith.addf %222, %221 : vector<8x128xf32>
    %224 = arith.divf %222, %223 : vector<8x128xf32>
    %225 = vector.extract_strided_slice %206 {offsets = [0, 256], sizes = [8, 128], strides = [1, 1]} : vector<8x384xf32> to vector<8x128xf32>
    %226 = vector.extract_strided_slice %208 {offsets = [0, 256], sizes = [8, 128], strides = [1, 1]} : vector<8x384xf32> to vector<8x128xf32>
    %227 = vector.broadcast %2 : vector<1x128xf32> to vector<8x128xf32>
    %228 = arith.addf %226, %227 : vector<8x128xf32>
    %229 = arith.mulf %216, %228 : vector<8x128xf32>
    %230 = arith.addf %225, %229 : vector<8x128xf32>
    %231 = math.tanh %230 : vector<8x128xf32>
    %cst_56 = arith.constant 1.000000e+00 : f32
    %232 = vector.broadcast %cst_56 : f32 to vector<8x128xf32>
    %233 = arith.subf %232, %224 : vector<8x128xf32>
    %234 = arith.mulf %233, %231 : vector<8x128xf32>
    %235 = arith.mulf %224, %202 : vector<8x128xf32>
    %236 = arith.addf %234, %235 : vector<8x128xf32>
    %c48 = arith.constant 48 : index
    %c0_57 = arith.constant 0 : index
    %237 = vector.load %arg16[%c48, %c0_57] : memref<56x128xf32, #tpu.memory_space<vmem>>, vector<8x128xf32>
    tpu.vector_store %arg16[%c48, %c0_57], %236 {strides = array<i32>} : memref<56x128xf32, #tpu.memory_space<vmem>>, vector<8x128xf32>,
    %c0_58 = arith.constant 0 : index
    %c0_59 = arith.constant 0 : index
    %238 = vector.load %arg16[%c0_58, %c0_59] : memref<56x128xf32, #tpu.memory_space<vmem>>, vector<56x128xf32>
    %239 = arith.truncf %238 : vector<56x128xf32> to vector<56x128xbf16>
    %c0_60 = arith.constant 0 : index
    %c0_61 = arith.constant 0 : index
    %240 = vector.load %arg6[%c0_60, %c0_61] : memref<128x384xbf16, #tpu.memory_space<vmem>>, vector<128x384xbf16>
    %cst_62 = arith.constant dense<0.000000e+00> : vector<56x384xf32>
    %241 = tpu.matmul %239, %240, %cst_62 {dimension_numbers = #tpu.dot_dimension_numbers<[1], [0], [0], [1], [0, 0, 1, 1], [], []>} : vector<56x128xbf16>, vector<128x384xbf16>, vector<56x384xf32> -> vector<56x384xf32>
    %c0_63 = arith.constant 0 : index
    %c0_64 = arith.constant 0 : index
    %242 = vector.load %arg7[%c0_63, %c0_64] : memref<1x384xf32, #tpu.memory_space<vmem>>, vector<1x384xf32>
    %243 = vector.broadcast %242 : vector<1x384xf32> to vector<56x384xf32>
    %244 = arith.addf %241, %243 : vector<56x384xf32>
    %c0_65 = arith.constant 0 : index
    %c0_66 = arith.constant 0 : index
    %245 = vector.load %arg17[%c0_65, %c0_66] : memref<56x384xf32, #tpu.memory_space<vmem>>, vector<56x384xf32>
    tpu.vector_store %arg17[%c0_65, %c0_66], %244 {strides = array<i32>} : memref<56x384xf32, #tpu.memory_space<vmem>>, vector<56x384xf32>,
    %c0_67 = arith.constant 0 : index
    %c0_68 = arith.constant 0 : index
    %246 = vector.load %arg17[%c0_67, %c0_68] : memref<56x384xf32, #tpu.memory_space<vmem>>, vector<8x384xf32>
    %247 = vector.extract_strided_slice %246 {offsets = [0, 0], sizes = [8, 128], strides = [1, 1]} : vector<8x384xf32> to vector<8x128xf32>
    %248 = arith.negf %247 : vector<8x128xf32>
    %249 = math.exp %248 : vector<8x128xf32>
    %cst_69 = arith.constant 1.000000e+00 : f32
    %250 = vector.broadcast %cst_69 : f32 to vector<8x128xf32>
    %251 = arith.addf %250, %249 : vector<8x128xf32>
    %252 = arith.divf %250, %251 : vector<8x128xf32>
    %253 = vector.extract_strided_slice %246 {offsets = [0, 128], sizes = [8, 128], strides = [1, 1]} : vector<8x384xf32> to vector<8x128xf32>
    %254 = arith.negf %253 : vector<8x128xf32>
    %255 = math.exp %254 : vector<8x128xf32>
    %cst_70 = arith.constant 1.000000e+00 : f32
    %256 = vector.broadcast %cst_70 : f32 to vector<8x128xf32>
    %257 = arith.addf %256, %255 : vector<8x128xf32>
    %258 = arith.divf %256, %257 : vector<8x128xf32>
    %259 = vector.extract_strided_slice %246 {offsets = [0, 256], sizes = [8, 128], strides = [1, 1]} : vector<8x384xf32> to vector<8x128xf32>
    %260 = vector.broadcast %4 : vector<1x128xf32> to vector<8x128xf32>
    %261 = arith.mulf %252, %260 : vector<8x128xf32>
    %262 = arith.addf %259, %261 : vector<8x128xf32>
    %263 = math.tanh %262 : vector<8x128xf32>
    %cst_71 = arith.constant 1.000000e+00 : f32
    %264 = vector.broadcast %cst_71 : f32 to vector<8x128xf32>
    %265 = arith.subf %264, %258 : vector<8x128xf32>
    %266 = arith.mulf %265, %263 : vector<8x128xf32>
    %267 = arith.truncf %266 : vector<8x128xf32> to vector<8x128xbf16>
    %c0_72 = arith.constant 0 : index
    %c0_73 = arith.constant 0 : index
    %c0_74 = arith.constant 0 : index
    %268 = vector.load %arg10[%c0_72, %c0_73, %c0_74] : memref<7x128x256xbf16, #tpu.memory_space<vmem>>, vector<1x128x256xbf16>
    %269 = vector.shape_cast %268 : vector<1x128x256xbf16> to vector<128x256xbf16>
    %cst_75 = arith.constant dense<0.000000e+00> : vector<8x256xf32>
    %270 = tpu.matmul %267, %269, %cst_75 {dimension_numbers = #tpu.dot_dimension_numbers<[1], [0], [0], [1], [0, 0, 1, 1], [], []>} : vector<8x128xbf16>, vector<128x256xbf16>, vector<8x256xf32> -> vector<8x256xf32>
    %c0_76 = arith.constant 0 : index
    %c0_77 = arith.constant 0 : index
    %271 = vector.load %arg18[%c0_76, %c0_77] : memref<8x256xf32, #tpu.memory_space<vmem>>, vector<8x256xf32>
    tpu.vector_store %arg18[%c0_76, %c0_77], %270 {strides = array<i32>} : memref<8x256xf32, #tpu.memory_space<vmem>>, vector<8x256xf32>,
    %c8_78 = arith.constant 8 : index
    %c0_79 = arith.constant 0 : index
    %272 = vector.load %arg17[%c8_78, %c0_79] : memref<56x384xf32, #tpu.memory_space<vmem>>, vector<8x384xf32>
    %273 = arith.truncf %266 : vector<8x128xf32> to vector<8x128xbf16>
    %cst_80 = arith.constant dense<0.000000e+00> : vector<8x384xf32>
    %274 = tpu.matmul %273, %3, %cst_80 {dimension_numbers = #tpu.dot_dimension_numbers<[1], [0], [0], [1], [0, 0, 1, 1], [], []>} : vector<8x128xbf16>, vector<128x384xbf16>, vector<8x384xf32> -> vector<8x384xf32>
    %275 = vector.extract_strided_slice %272 {offsets = [0, 0], sizes = [8, 128], strides = [1, 1]} : vector<8x384xf32> to vector<8x128xf32>
    %276 = vector.extract_strided_slice %274 {offsets = [0, 0], sizes = [8, 128], strides = [1, 1]} : vector<8x384xf32> to vector<8x128xf32>
    %277 = arith.addf %275, %276 : vector<8x128xf32>
    %278 = arith.negf %277 : vector<8x128xf32>
    %279 = math.exp %278 : vector<8x128xf32>
    %cst_81 = arith.constant 1.000000e+00 : f32
    %280 = vector.broadcast %cst_81 : f32 to vector<8x128xf32>
    %281 = arith.addf %280, %279 : vector<8x128xf32>
    %282 = arith.divf %280, %281 : vector<8x128xf32>
    %283 = vector.extract_strided_slice %272 {offsets = [0, 128], sizes = [8, 128], strides = [1, 1]} : vector<8x384xf32> to vector<8x128xf32>
    %284 = vector.extract_strided_slice %274 {offsets = [0, 128], sizes = [8, 128], strides = [1, 1]} : vector<8x384xf32> to vector<8x128xf32>
    %285 = arith.addf %283, %284 : vector<8x128xf32>
    %286 = arith.negf %285 : vector<8x128xf32>
    %287 = math.exp %286 : vector<8x128xf32>
    %cst_82 = arith.constant 1.000000e+00 : f32
    %288 = vector.broadcast %cst_82 : f32 to vector<8x128xf32>
    %289 = arith.addf %288, %287 : vector<8x128xf32>
    %290 = arith.divf %288, %289 : vector<8x128xf32>
    %291 = vector.extract_strided_slice %272 {offsets = [0, 256], sizes = [8, 128], strides = [1, 1]} : vector<8x384xf32> to vector<8x128xf32>
    %292 = vector.extract_strided_slice %274 {offsets = [0, 256], sizes = [8, 128], strides = [1, 1]} : vector<8x384xf32> to vector<8x128xf32>
    %293 = vector.broadcast %4 : vector<1x128xf32> to vector<8x128xf32>
    %294 = arith.addf %292, %293 : vector<8x128xf32>
    %295 = arith.mulf %282, %294 : vector<8x128xf32>
    %296 = arith.addf %291, %295 : vector<8x128xf32>
    %297 = math.tanh %296 : vector<8x128xf32>
    %cst_83 = arith.constant 1.000000e+00 : f32
    %298 = vector.broadcast %cst_83 : f32 to vector<8x128xf32>
    %299 = arith.subf %298, %290 : vector<8x128xf32>
    %300 = arith.mulf %299, %297 : vector<8x128xf32>
    %301 = arith.mulf %290, %266 : vector<8x128xf32>
    %302 = arith.addf %300, %301 : vector<8x128xf32>
    %303 = arith.truncf %302 : vector<8x128xf32> to vector<8x128xbf16>
    %c1 = arith.constant 1 : index
    %c0_84 = arith.constant 0 : index
    %c0_85 = arith.constant 0 : index
    %304 = vector.load %arg10[%c1, %c0_84, %c0_85] : memref<7x128x256xbf16, #tpu.memory_space<vmem>>, vector<1x128x256xbf16>
    %305 = vector.shape_cast %304 : vector<1x128x256xbf16> to vector<128x256xbf16>
    %cst_86 = arith.constant dense<0.000000e+00> : vector<8x256xf32>
    %306 = tpu.matmul %303, %305, %cst_86 {dimension_numbers = #tpu.dot_dimension_numbers<[1], [0], [0], [1], [0, 0, 1, 1], [], []>} : vector<8x128xbf16>, vector<128x256xbf16>, vector<8x256xf32> -> vector<8x256xf32>
    %c0_87 = arith.constant 0 : index
    %c0_88 = arith.constant 0 : index
    %307 = vector.load %arg18[%c0_87, %c0_88] : memref<8x256xf32, #tpu.memory_space<vmem>>, vector<8x256xf32>
    %308 = arith.addf %307, %306 : vector<8x256xf32>
    %c0_89 = arith.constant 0 : index
    %c0_90 = arith.constant 0 : index
    %309 = vector.load %arg18[%c0_89, %c0_90] : memref<8x256xf32, #tpu.memory_space<vmem>>, vector<8x256xf32>
    tpu.vector_store %arg18[%c0_89, %c0_90], %308 {strides = array<i32>} : memref<8x256xf32, #tpu.memory_space<vmem>>, vector<8x256xf32>,
    %c16_91 = arith.constant 16 : index
    %c0_92 = arith.constant 0 : index
    %310 = vector.load %arg17[%c16_91, %c0_92] : memref<56x384xf32, #tpu.memory_space<vmem>>, vector<8x384xf32>
    %311 = arith.truncf %302 : vector<8x128xf32> to vector<8x128xbf16>
    %cst_93 = arith.constant dense<0.000000e+00> : vector<8x384xf32>
    %312 = tpu.matmul %311, %3, %cst_93 {dimension_numbers = #tpu.dot_dimension_numbers<[1], [0], [0], [1], [0, 0, 1, 1], [], []>} : vector<8x128xbf16>, vector<128x384xbf16>, vector<8x384xf32> -> vector<8x384xf32>
    %313 = vector.extract_strided_slice %310 {offsets = [0, 0], sizes = [8, 128], strides = [1, 1]} : vector<8x384xf32> to vector<8x128xf32>
    %314 = vector.extract_strided_slice %312 {offsets = [0, 0], sizes = [8, 128], strides = [1, 1]} : vector<8x384xf32> to vector<8x128xf32>
    %315 = arith.addf %313, %314 : vector<8x128xf32>
    %316 = arith.negf %315 : vector<8x128xf32>
    %317 = math.exp %316 : vector<8x128xf32>
    %cst_94 = arith.constant 1.000000e+00 : f32
    %318 = vector.broadcast %cst_94 : f32 to vector<8x128xf32>
    %319 = arith.addf %318, %317 : vector<8x128xf32>
    %320 = arith.divf %318, %319 : vector<8x128xf32>
    %321 = vector.extract_strided_slice %310 {offsets = [0, 128], sizes = [8, 128], strides = [1, 1]} : vector<8x384xf32> to vector<8x128xf32>
    %322 = vector.extract_strided_slice %312 {offsets = [0, 128], sizes = [8, 128], strides = [1, 1]} : vector<8x384xf32> to vector<8x128xf32>
    %323 = arith.addf %321, %322 : vector<8x128xf32>
    %324 = arith.negf %323 : vector<8x128xf32>
    %325 = math.exp %324 : vector<8x128xf32>
    %cst_95 = arith.constant 1.000000e+00 : f32
    %326 = vector.broadcast %cst_95 : f32 to vector<8x128xf32>
    %327 = arith.addf %326, %325 : vector<8x128xf32>
    %328 = arith.divf %326, %327 : vector<8x128xf32>
    %329 = vector.extract_strided_slice %310 {offsets = [0, 256], sizes = [8, 128], strides = [1, 1]} : vector<8x384xf32> to vector<8x128xf32>
    %330 = vector.extract_strided_slice %312 {offsets = [0, 256], sizes = [8, 128], strides = [1, 1]} : vector<8x384xf32> to vector<8x128xf32>
    %331 = vector.broadcast %4 : vector<1x128xf32> to vector<8x128xf32>
    %332 = arith.addf %330, %331 : vector<8x128xf32>
    %333 = arith.mulf %320, %332 : vector<8x128xf32>
    %334 = arith.addf %329, %333 : vector<8x128xf32>
    %335 = math.tanh %334 : vector<8x128xf32>
    %cst_96 = arith.constant 1.000000e+00 : f32
    %336 = vector.broadcast %cst_96 : f32 to vector<8x128xf32>
    %337 = arith.subf %336, %328 : vector<8x128xf32>
    %338 = arith.mulf %337, %335 : vector<8x128xf32>
    %339 = arith.mulf %328, %302 : vector<8x128xf32>
    %340 = arith.addf %338, %339 : vector<8x128xf32>
    %341 = arith.truncf %340 : vector<8x128xf32> to vector<8x128xbf16>
    %c2 = arith.constant 2 : index
    %c0_97 = arith.constant 0 : index
    %c0_98 = arith.constant 0 : index
    %342 = vector.load %arg10[%c2, %c0_97, %c0_98] : memref<7x128x256xbf16, #tpu.memory_space<vmem>>, vector<1x128x256xbf16>
    %343 = vector.shape_cast %342 : vector<1x128x256xbf16> to vector<128x256xbf16>
    %cst_99 = arith.constant dense<0.000000e+00> : vector<8x256xf32>
    %344 = tpu.matmul %341, %343, %cst_99 {dimension_numbers = #tpu.dot_dimension_numbers<[1], [0], [0], [1], [0, 0, 1, 1], [], []>} : vector<8x128xbf16>, vector<128x256xbf16>, vector<8x256xf32> -> vector<8x256xf32>
    %c0_100 = arith.constant 0 : index
    %c0_101 = arith.constant 0 : index
    %345 = vector.load %arg18[%c0_100, %c0_101] : memref<8x256xf32, #tpu.memory_space<vmem>>, vector<8x256xf32>
    %346 = arith.addf %345, %344 : vector<8x256xf32>
    %c0_102 = arith.constant 0 : index
    %c0_103 = arith.constant 0 : index
    %347 = vector.load %arg18[%c0_102, %c0_103] : memref<8x256xf32, #tpu.memory_space<vmem>>, vector<8x256xf32>
    tpu.vector_store %arg18[%c0_102, %c0_103], %346 {strides = array<i32>} : memref<8x256xf32, #tpu.memory_space<vmem>>, vector<8x256xf32>,
    %c24_104 = arith.constant 24 : index
    %c0_105 = arith.constant 0 : index
    %348 = vector.load %arg17[%c24_104, %c0_105] : memref<56x384xf32, #tpu.memory_space<vmem>>, vector<8x384xf32>
    %349 = arith.truncf %340 : vector<8x128xf32> to vector<8x128xbf16>
    %cst_106 = arith.constant dense<0.000000e+00> : vector<8x384xf32>
    %350 = tpu.matmul %349, %3, %cst_106 {dimension_numbers = #tpu.dot_dimension_numbers<[1], [0], [0], [1], [0, 0, 1, 1], [], []>} : vector<8x128xbf16>, vector<128x384xbf16>, vector<8x384xf32> -> vector<8x384xf32>
    %351 = vector.extract_strided_slice %348 {offsets = [0, 0], sizes = [8, 128], strides = [1, 1]} : vector<8x384xf32> to vector<8x128xf32>
    %352 = vector.extract_strided_slice %350 {offsets = [0, 0], sizes = [8, 128], strides = [1, 1]} : vector<8x384xf32> to vector<8x128xf32>
    %353 = arith.addf %351, %352 : vector<8x128xf32>
    %354 = arith.negf %353 : vector<8x128xf32>
    %355 = math.exp %354 : vector<8x128xf32>
    %cst_107 = arith.constant 1.000000e+00 : f32
    %356 = vector.broadcast %cst_107 : f32 to vector<8x128xf32>
    %357 = arith.addf %356, %355 : vector<8x128xf32>
    %358 = arith.divf %356, %357 : vector<8x128xf32>
    %359 = vector.extract_strided_slice %348 {offsets = [0, 128], sizes = [8, 128], strides = [1, 1]} : vector<8x384xf32> to vector<8x128xf32>
    %360 = vector.extract_strided_slice %350 {offsets = [0, 128], sizes = [8, 128], strides = [1, 1]} : vector<8x384xf32> to vector<8x128xf32>
    %361 = arith.addf %359, %360 : vector<8x128xf32>
    %362 = arith.negf %361 : vector<8x128xf32>
    %363 = math.exp %362 : vector<8x128xf32>
    %cst_108 = arith.constant 1.000000e+00 : f32
    %364 = vector.broadcast %cst_108 : f32 to vector<8x128xf32>
    %365 = arith.addf %364, %363 : vector<8x128xf32>
    %366 = arith.divf %364, %365 : vector<8x128xf32>
    %367 = vector.extract_strided_slice %348 {offsets = [0, 256], sizes = [8, 128], strides = [1, 1]} : vector<8x384xf32> to vector<8x128xf32>
    %368 = vector.extract_strided_slice %350 {offsets = [0, 256], sizes = [8, 128], strides = [1, 1]} : vector<8x384xf32> to vector<8x128xf32>
    %369 = vector.broadcast %4 : vector<1x128xf32> to vector<8x128xf32>
    %370 = arith.addf %368, %369 : vector<8x128xf32>
    %371 = arith.mulf %358, %370 : vector<8x128xf32>
    %372 = arith.addf %367, %371 : vector<8x128xf32>
    %373 = math.tanh %372 : vector<8x128xf32>
    %cst_109 = arith.constant 1.000000e+00 : f32
    %374 = vector.broadcast %cst_109 : f32 to vector<8x128xf32>
    %375 = arith.subf %374, %366 : vector<8x128xf32>
    %376 = arith.mulf %375, %373 : vector<8x128xf32>
    %377 = arith.mulf %366, %340 : vector<8x128xf32>
    %378 = arith.addf %376, %377 : vector<8x128xf32>
    %379 = arith.truncf %378 : vector<8x128xf32> to vector<8x128xbf16>
    %c3 = arith.constant 3 : index
    %c0_110 = arith.constant 0 : index
    %c0_111 = arith.constant 0 : index
    %380 = vector.load %arg10[%c3, %c0_110, %c0_111] : memref<7x128x256xbf16, #tpu.memory_space<vmem>>, vector<1x128x256xbf16>
    %381 = vector.shape_cast %380 : vector<1x128x256xbf16> to vector<128x256xbf16>
    %cst_112 = arith.constant dense<0.000000e+00> : vector<8x256xf32>
    %382 = tpu.matmul %379, %381, %cst_112 {dimension_numbers = #tpu.dot_dimension_numbers<[1], [0], [0], [1], [0, 0, 1, 1], [], []>} : vector<8x128xbf16>, vector<128x256xbf16>, vector<8x256xf32> -> vector<8x256xf32>
    %c0_113 = arith.constant 0 : index
    %c0_114 = arith.constant 0 : index
    %383 = vector.load %arg18[%c0_113, %c0_114] : memref<8x256xf32, #tpu.memory_space<vmem>>, vector<8x256xf32>
    %384 = arith.addf %383, %382 : vector<8x256xf32>
    %c0_115 = arith.constant 0 : index
    %c0_116 = arith.constant 0 : index
    %385 = vector.load %arg18[%c0_115, %c0_116] : memref<8x256xf32, #tpu.memory_space<vmem>>, vector<8x256xf32>
    tpu.vector_store %arg18[%c0_115, %c0_116], %384 {strides = array<i32>} : memref<8x256xf32, #tpu.memory_space<vmem>>, vector<8x256xf32>,
    %c32_117 = arith.constant 32 : index
    %c0_118 = arith.constant 0 : index
    %386 = vector.load %arg17[%c32_117, %c0_118] : memref<56x384xf32, #tpu.memory_space<vmem>>, vector<8x384xf32>
    %387 = arith.truncf %378 : vector<8x128xf32> to vector<8x128xbf16>
    %cst_119 = arith.constant dense<0.000000e+00> : vector<8x384xf32>
    %388 = tpu.matmul %387, %3, %cst_119 {dimension_numbers = #tpu.dot_dimension_numbers<[1], [0], [0], [1], [0, 0, 1, 1], [], []>} : vector<8x128xbf16>, vector<128x384xbf16>, vector<8x384xf32> -> vector<8x384xf32>
    %389 = vector.extract_strided_slice %386 {offsets = [0, 0], sizes = [8, 128], strides = [1, 1]} : vector<8x384xf32> to vector<8x128xf32>
    %390 = vector.extract_strided_slice %388 {offsets = [0, 0], sizes = [8, 128], strides = [1, 1]} : vector<8x384xf32> to vector<8x128xf32>
    %391 = arith.addf %389, %390 : vector<8x128xf32>
    %392 = arith.negf %391 : vector<8x128xf32>
    %393 = math.exp %392 : vector<8x128xf32>
    %cst_120 = arith.constant 1.000000e+00 : f32
    %394 = vector.broadcast %cst_120 : f32 to vector<8x128xf32>
    %395 = arith.addf %394, %393 : vector<8x128xf32>
    %396 = arith.divf %394, %395 : vector<8x128xf32>
    %397 = vector.extract_strided_slice %386 {offsets = [0, 128], sizes = [8, 128], strides = [1, 1]} : vector<8x384xf32> to vector<8x128xf32>
    %398 = vector.extract_strided_slice %388 {offsets = [0, 128], sizes = [8, 128], strides = [1, 1]} : vector<8x384xf32> to vector<8x128xf32>
    %399 = arith.addf %397, %398 : vector<8x128xf32>
    %400 = arith.negf %399 : vector<8x128xf32>
    %401 = math.exp %400 : vector<8x128xf32>
    %cst_121 = arith.constant 1.000000e+00 : f32
    %402 = vector.broadcast %cst_121 : f32 to vector<8x128xf32>
    %403 = arith.addf %402, %401 : vector<8x128xf32>
    %404 = arith.divf %402, %403 : vector<8x128xf32>
    %405 = vector.extract_strided_slice %386 {offsets = [0, 256], sizes = [8, 128], strides = [1, 1]} : vector<8x384xf32> to vector<8x128xf32>
    %406 = vector.extract_strided_slice %388 {offsets = [0, 256], sizes = [8, 128], strides = [1, 1]} : vector<8x384xf32> to vector<8x128xf32>
    %407 = vector.broadcast %4 : vector<1x128xf32> to vector<8x128xf32>
    %408 = arith.addf %406, %407 : vector<8x128xf32>
    %409 = arith.mulf %396, %408 : vector<8x128xf32>
    %410 = arith.addf %405, %409 : vector<8x128xf32>
    %411 = math.tanh %410 : vector<8x128xf32>
    %cst_122 = arith.constant 1.000000e+00 : f32
    %412 = vector.broadcast %cst_122 : f32 to vector<8x128xf32>
    %413 = arith.subf %412, %404 : vector<8x128xf32>
    %414 = arith.mulf %413, %411 : vector<8x128xf32>
    %415 = arith.mulf %404, %378 : vector<8x128xf32>
    %416 = arith.addf %414, %415 : vector<8x128xf32>
    %417 = arith.truncf %416 : vector<8x128xf32> to vector<8x128xbf16>
    %c4 = arith.constant 4 : index
    %c0_123 = arith.constant 0 : index
    %c0_124 = arith.constant 0 : index
    %418 = vector.load %arg10[%c4, %c0_123, %c0_124] : memref<7x128x256xbf16, #tpu.memory_space<vmem>>, vector<1x128x256xbf16>
    %419 = vector.shape_cast %418 : vector<1x128x256xbf16> to vector<128x256xbf16>
    %cst_125 = arith.constant dense<0.000000e+00> : vector<8x256xf32>
    %420 = tpu.matmul %417, %419, %cst_125 {dimension_numbers = #tpu.dot_dimension_numbers<[1], [0], [0], [1], [0, 0, 1, 1], [], []>} : vector<8x128xbf16>, vector<128x256xbf16>, vector<8x256xf32> -> vector<8x256xf32>
    %c0_126 = arith.constant 0 : index
    %c0_127 = arith.constant 0 : index
    %421 = vector.load %arg18[%c0_126, %c0_127] : memref<8x256xf32, #tpu.memory_space<vmem>>, vector<8x256xf32>
    %422 = arith.addf %421, %420 : vector<8x256xf32>
    %c0_128 = arith.constant 0 : index
    %c0_129 = arith.constant 0 : index
    %423 = vector.load %arg18[%c0_128, %c0_129] : memref<8x256xf32, #tpu.memory_space<vmem>>, vector<8x256xf32>
    tpu.vector_store %arg18[%c0_128, %c0_129], %422 {strides = array<i32>} : memref<8x256xf32, #tpu.memory_space<vmem>>, vector<8x256xf32>,
    %c40_130 = arith.constant 40 : index
    %c0_131 = arith.constant 0 : index
    %424 = vector.load %arg17[%c40_130, %c0_131] : memref<56x384xf32, #tpu.memory_space<vmem>>, vector<8x384xf32>
    %425 = arith.truncf %416 : vector<8x128xf32> to vector<8x128xbf16>
    %cst_132 = arith.constant dense<0.000000e+00> : vector<8x384xf32>
    %426 = tpu.matmul %425, %3, %cst_132 {dimension_numbers = #tpu.dot_dimension_numbers<[1], [0], [0], [1], [0, 0, 1, 1], [], []>} : vector<8x128xbf16>, vector<128x384xbf16>, vector<8x384xf32> -> vector<8x384xf32>
    %427 = vector.extract_strided_slice %424 {offsets = [0, 0], sizes = [8, 128], strides = [1, 1]} : vector<8x384xf32> to vector<8x128xf32>
    %428 = vector.extract_strided_slice %426 {offsets = [0, 0], sizes = [8, 128], strides = [1, 1]} : vector<8x384xf32> to vector<8x128xf32>
    %429 = arith.addf %427, %428 : vector<8x128xf32>
    %430 = arith.negf %429 : vector<8x128xf32>
    %431 = math.exp %430 : vector<8x128xf32>
    %cst_133 = arith.constant 1.000000e+00 : f32
    %432 = vector.broadcast %cst_133 : f32 to vector<8x128xf32>
    %433 = arith.addf %432, %431 : vector<8x128xf32>
    %434 = arith.divf %432, %433 : vector<8x128xf32>
    %435 = vector.extract_strided_slice %424 {offsets = [0, 128], sizes = [8, 128], strides = [1, 1]} : vector<8x384xf32> to vector<8x128xf32>
    %436 = vector.extract_strided_slice %426 {offsets = [0, 128], sizes = [8, 128], strides = [1, 1]} : vector<8x384xf32> to vector<8x128xf32>
    %437 = arith.addf %435, %436 : vector<8x128xf32>
    %438 = arith.negf %437 : vector<8x128xf32>
    %439 = math.exp %438 : vector<8x128xf32>
    %cst_134 = arith.constant 1.000000e+00 : f32
    %440 = vector.broadcast %cst_134 : f32 to vector<8x128xf32>
    %441 = arith.addf %440, %439 : vector<8x128xf32>
    %442 = arith.divf %440, %441 : vector<8x128xf32>
    %443 = vector.extract_strided_slice %424 {offsets = [0, 256], sizes = [8, 128], strides = [1, 1]} : vector<8x384xf32> to vector<8x128xf32>
    %444 = vector.extract_strided_slice %426 {offsets = [0, 256], sizes = [8, 128], strides = [1, 1]} : vector<8x384xf32> to vector<8x128xf32>
    %445 = vector.broadcast %4 : vector<1x128xf32> to vector<8x128xf32>
    %446 = arith.addf %444, %445 : vector<8x128xf32>
    %447 = arith.mulf %434, %446 : vector<8x128xf32>
    %448 = arith.addf %443, %447 : vector<8x128xf32>
    %449 = math.tanh %448 : vector<8x128xf32>
    %cst_135 = arith.constant 1.000000e+00 : f32
    %450 = vector.broadcast %cst_135 : f32 to vector<8x128xf32>
    %451 = arith.subf %450, %442 : vector<8x128xf32>
    %452 = arith.mulf %451, %449 : vector<8x128xf32>
    %453 = arith.mulf %442, %416 : vector<8x128xf32>
    %454 = arith.addf %452, %453 : vector<8x128xf32>
    %455 = arith.truncf %454 : vector<8x128xf32> to vector<8x128xbf16>
    %c5 = arith.constant 5 : index
    %c0_136 = arith.constant 0 : index
    %c0_137 = arith.constant 0 : index
    %456 = vector.load %arg10[%c5, %c0_136, %c0_137] : memref<7x128x256xbf16, #tpu.memory_space<vmem>>, vector<1x128x256xbf16>
    %457 = vector.shape_cast %456 : vector<1x128x256xbf16> to vector<128x256xbf16>
    %cst_138 = arith.constant dense<0.000000e+00> : vector<8x256xf32>
    %458 = tpu.matmul %455, %457, %cst_138 {dimension_numbers = #tpu.dot_dimension_numbers<[1], [0], [0], [1], [0, 0, 1, 1], [], []>} : vector<8x128xbf16>, vector<128x256xbf16>, vector<8x256xf32> -> vector<8x256xf32>
    %c0_139 = arith.constant 0 : index
    %c0_140 = arith.constant 0 : index
    %459 = vector.load %arg18[%c0_139, %c0_140] : memref<8x256xf32, #tpu.memory_space<vmem>>, vector<8x256xf32>
    %460 = arith.addf %459, %458 : vector<8x256xf32>
    %c0_141 = arith.constant 0 : index
    %c0_142 = arith.constant 0 : index
    %461 = vector.load %arg18[%c0_141, %c0_142] : memref<8x256xf32, #tpu.memory_space<vmem>>, vector<8x256xf32>
    tpu.vector_store %arg18[%c0_141, %c0_142], %460 {strides = array<i32>} : memref<8x256xf32, #tpu.memory_space<vmem>>, vector<8x256xf32>,
    %c48_143 = arith.constant 48 : index
    %c0_144 = arith.constant 0 : index
    %462 = vector.load %arg17[%c48_143, %c0_144] : memref<56x384xf32, #tpu.memory_space<vmem>>, vector<8x384xf32>
    %463 = arith.truncf %454 : vector<8x128xf32> to vector<8x128xbf16>
    %cst_145 = arith.constant dense<0.000000e+00> : vector<8x384xf32>
    %464 = tpu.matmul %463, %3, %cst_145 {dimension_numbers = #tpu.dot_dimension_numbers<[1], [0], [0], [1], [0, 0, 1, 1], [], []>} : vector<8x128xbf16>, vector<128x384xbf16>, vector<8x384xf32> -> vector<8x384xf32>
    %465 = vector.extract_strided_slice %462 {offsets = [0, 0], sizes = [8, 128], strides = [1, 1]} : vector<8x384xf32> to vector<8x128xf32>
    %466 = vector.extract_strided_slice %464 {offsets = [0, 0], sizes = [8, 128], strides = [1, 1]} : vector<8x384xf32> to vector<8x128xf32>
    %467 = arith.addf %465, %466 : vector<8x128xf32>
    %468 = arith.negf %467 : vector<8x128xf32>
    %469 = math.exp %468 : vector<8x128xf32>
    %cst_146 = arith.constant 1.000000e+00 : f32
    %470 = vector.broadcast %cst_146 : f32 to vector<8x128xf32>
    %471 = arith.addf %470, %469 : vector<8x128xf32>
    %472 = arith.divf %470, %471 : vector<8x128xf32>
    %473 = vector.extract_strided_slice %462 {offsets = [0, 128], sizes = [8, 128], strides = [1, 1]} : vector<8x384xf32> to vector<8x128xf32>
    %474 = vector.extract_strided_slice %464 {offsets = [0, 128], sizes = [8, 128], strides = [1, 1]} : vector<8x384xf32> to vector<8x128xf32>
    %475 = arith.addf %473, %474 : vector<8x128xf32>
    %476 = arith.negf %475 : vector<8x128xf32>
    %477 = math.exp %476 : vector<8x128xf32>
    %cst_147 = arith.constant 1.000000e+00 : f32
    %478 = vector.broadcast %cst_147 : f32 to vector<8x128xf32>
    %479 = arith.addf %478, %477 : vector<8x128xf32>
    %480 = arith.divf %478, %479 : vector<8x128xf32>
    %481 = vector.extract_strided_slice %462 {offsets = [0, 256], sizes = [8, 128], strides = [1, 1]} : vector<8x384xf32> to vector<8x128xf32>
    %482 = vector.extract_strided_slice %464 {offsets = [0, 256], sizes = [8, 128], strides = [1, 1]} : vector<8x384xf32> to vector<8x128xf32>
    %483 = vector.broadcast %4 : vector<1x128xf32> to vector<8x128xf32>
    %484 = arith.addf %482, %483 : vector<8x128xf32>
    %485 = arith.mulf %472, %484 : vector<8x128xf32>
    %486 = arith.addf %481, %485 : vector<8x128xf32>
    %487 = math.tanh %486 : vector<8x128xf32>
    %cst_148 = arith.constant 1.000000e+00 : f32
    %488 = vector.broadcast %cst_148 : f32 to vector<8x128xf32>
    %489 = arith.subf %488, %480 : vector<8x128xf32>
    %490 = arith.mulf %489, %487 : vector<8x128xf32>
    %491 = arith.mulf %480, %454 : vector<8x128xf32>
    %492 = arith.addf %490, %491 : vector<8x128xf32>
    %493 = arith.truncf %492 : vector<8x128xf32> to vector<8x128xbf16>
    %c6 = arith.constant 6 : index
    %c0_149 = arith.constant 0 : index
    %c0_150 = arith.constant 0 : index
    %494 = vector.load %arg10[%c6, %c0_149, %c0_150] : memref<7x128x256xbf16, #tpu.memory_space<vmem>>, vector<1x128x256xbf16>
    %495 = vector.shape_cast %494 : vector<1x128x256xbf16> to vector<128x256xbf16>
    %cst_151 = arith.constant dense<0.000000e+00> : vector<8x256xf32>
    %496 = tpu.matmul %493, %495, %cst_151 {dimension_numbers = #tpu.dot_dimension_numbers<[1], [0], [0], [1], [0, 0, 1, 1], [], []>} : vector<8x128xbf16>, vector<128x256xbf16>, vector<8x256xf32> -> vector<8x256xf32>
    %c0_152 = arith.constant 0 : index
    %c0_153 = arith.constant 0 : index
    %497 = vector.load %arg18[%c0_152, %c0_153] : memref<8x256xf32, #tpu.memory_space<vmem>>, vector<8x256xf32>
    %498 = arith.addf %497, %496 : vector<8x256xf32>
    %c0_154 = arith.constant 0 : index
    %c0_155 = arith.constant 0 : index
    %499 = vector.load %arg18[%c0_154, %c0_155] : memref<8x256xf32, #tpu.memory_space<vmem>>, vector<8x256xf32>
    tpu.vector_store %arg18[%c0_154, %c0_155], %498 {strides = array<i32>} : memref<8x256xf32, #tpu.memory_space<vmem>>, vector<8x256xf32>,
    %c0_156 = arith.constant 0 : index
    %c0_157 = arith.constant 0 : index
    %500 = vector.load %arg18[%c0_156, %c0_157] : memref<8x256xf32, #tpu.memory_space<vmem>>, vector<8x256xf32>
    %c0_158 = arith.constant 0 : index
    %c0_159 = arith.constant 0 : index
    %501 = vector.load %arg11[%c0_158, %c0_159] : memref<1x256xf32, #tpu.memory_space<vmem>>, vector<1x256xf32>
    %502 = vector.broadcast %501 : vector<1x256xf32> to vector<8x256xf32>
    %503 = arith.addf %500, %502 : vector<8x256xf32>
    %cst_160 = arith.constant 0.000000e+00 : f32
    %504 = vector.broadcast %cst_160 : f32 to vector<8x256xf32>
    %505 = arith.cmpf ogt, %503, %504 : vector<8x256xf32>
    %cst_161 = arith.constant 0.00999999977 : f32
    %506 = vector.broadcast %cst_161 : f32 to vector<8x256xf32>
    %507 = arith.mulf %506, %503 : vector<8x256xf32>
    %508 = arith.select %505, %503, %507 : vector<8x256xi1>, vector<8x256xf32>
    %c0_162 = arith.constant 0 : index
    %c0_163 = arith.constant 0 : index
    %509 = vector.load %arg12[%c0_162, %c0_163] : memref<1x256xf32, #tpu.memory_space<vmem>>, vector<1x256xf32>
    %510 = vector.broadcast %509 : vector<1x256xf32> to vector<8x256xf32>
    %511 = arith.mulf %508, %510 : vector<8x256xf32>
    %cst_164 = arith.constant dense<0.000000e+00> : vector<8xf32>
    %512 = vector.multi_reduction <add>, %511, %cst_164 [1] : vector<8x256xf32> to vector<8xf32>
    %513 = vector.shape_cast %512 : vector<8xf32> to vector<8x1xf32>
    %c0_165 = arith.constant 0 : index
    %c0_166 = arith.constant 0 : index
    %514 = vector.load %arg13[%c0_165, %c0_166] : memref<1x1xf32, #tpu.memory_space<vmem>>, vector<1x1xf32>
    %515 = vector.broadcast %514 : vector<1x1xf32> to vector<8x1xf32>
    %516 = arith.addf %513, %515 : vector<8x1xf32>
    %c0_167 = arith.constant 0 : index
    %c0_168 = arith.constant 0 : index
    %517 = vector.load %arg14[%c0_167, %c0_168] : memref<8x1xf32, #tpu.memory_space<vmem>>, vector<8x1xf32>
    tpu.vector_store %arg14[%c0_167, %c0_168], %516 {strides = array<i32>} : memref<8x1xf32, #tpu.memory_space<vmem>>, vector<8x1xf32>,
    return
  }
  func.func @transform_0(%arg0: i32) -> (i32, i32) {
    %c0_i32 = arith.constant 0 : i32
    %c0_i32_0 = arith.constant 0 : i32
    return %arg0, %c0_i32 : i32, i32
  }
  func.func @transform_1(%arg0: i32) -> (i32, i32) {
    %c0_i32 = arith.constant 0 : i32
    %c0_i32_0 = arith.constant 0 : i32
    %c0_i32_1 = arith.constant 0 : i32
    return %c0_i32, %c0_i32_0 : i32, i32
  }
  func.func @transform_2(%arg0: i32) -> (i32, i32) {
    %c0_i32 = arith.constant 0 : i32
    %c0_i32_0 = arith.constant 0 : i32
    %c0_i32_1 = arith.constant 0 : i32
    return %c0_i32, %c0_i32_0 : i32, i32
  }
  func.func @transform_3(%arg0: i32) -> (i32, i32) {
    %c0_i32 = arith.constant 0 : i32
    %c0_i32_0 = arith.constant 0 : i32
    %c0_i32_1 = arith.constant 0 : i32
    return %c0_i32, %c0_i32_0 : i32, i32
  }
  func.func @transform_4(%arg0: i32) -> (i32, i32) {
    %c0_i32 = arith.constant 0 : i32
    %c0_i32_0 = arith.constant 0 : i32
    %c0_i32_1 = arith.constant 0 : i32
    return %c0_i32, %c0_i32_0 : i32, i32
  }
  func.func @transform_5(%arg0: i32) -> (i32, i32) {
    %c0_i32 = arith.constant 0 : i32
    %c0_i32_0 = arith.constant 0 : i32
    %c0_i32_1 = arith.constant 0 : i32
    return %c0_i32, %c0_i32_0 : i32, i32
  }
  func.func @transform_6(%arg0: i32) -> (i32, i32) {
    %c0_i32 = arith.constant 0 : i32
    %c0_i32_0 = arith.constant 0 : i32
    %c0_i32_1 = arith.constant 0 : i32
    return %c0_i32, %c0_i32_0 : i32, i32
  }
  func.func @transform_7(%arg0: i32) -> (i32, i32) {
    %c0_i32 = arith.constant 0 : i32
    %c0_i32_0 = arith.constant 0 : i32
    %c0_i32_1 = arith.constant 0 : i32
    return %c0_i32, %c0_i32_0 : i32, i32
  }
  func.func @transform_8(%arg0: i32) -> (i32, i32) {
    %c0_i32 = arith.constant 0 : i32
    %c0_i32_0 = arith.constant 0 : i32
    %c0_i32_1 = arith.constant 0 : i32
    return %c0_i32, %c0_i32_0 : i32, i32
  }
  func.func @transform_9(%arg0: i32) -> (i32, i32, i32) {
    %c0_i32 = arith.constant 0 : i32
    %c0_i32_0 = arith.constant 0 : i32
    %c0_i32_1 = arith.constant 0 : i32
    %c0_i32_2 = arith.constant 0 : i32
    return %c0_i32, %c0_i32_0, %c0_i32_1 : i32, i32, i32
  }
  func.func @transform_10(%arg0: i32) -> (i32, i32) {
    %c0_i32 = arith.constant 0 : i32
    %c0_i32_0 = arith.constant 0 : i32
    %c0_i32_1 = arith.constant 0 : i32
    return %c0_i32, %c0_i32_0 : i32, i32
  }
  func.func @transform_11(%arg0: i32) -> (i32, i32) {
    %c0_i32 = arith.constant 0 : i32
    %c0_i32_0 = arith.constant 0 : i32
    %c0_i32_1 = arith.constant 0 : i32
    return %c0_i32, %c0_i32_0 : i32, i32
  }
  func.func @transform_12(%arg0: i32) -> (i32, i32) {
    %c0_i32 = arith.constant 0 : i32
    %c0_i32_0 = arith.constant 0 : i32
    %c0_i32_1 = arith.constant 0 : i32
    return %c0_i32, %c0_i32_0 : i32, i32
  }
  func.func @transform_13(%arg0: i32) -> (i32, i32) {
    %c0_i32 = arith.constant 0 : i32
    %c0_i32_0 = arith.constant 0 : i32
    return %arg0, %c0_i32 : i32, i32
  }
}

</mosaic_0001>

<bundles_post_ra>
// kernel: tpu_custom_call.1
= control target key start
LH: loop header
LB: loop body
LE: loop exit
PB: predicated region body
PF: predicated region fallthrough
CT: control target
= control target key end

     0   :  { %s6331_s0 = inlined_call_operand.hbm [shape: f32[8,21], index: 0, kind: input, shape index: {}]   ;;  %s6332_s1 = inlined_call_operand.hbm [shape: bf16[21,2688], index: 1, kind: input, shape index: {}]   ;;  %s6333_s2 = inlined_call_operand.vmem [shape: f32[1,384], index: 2, kind: input, shape index: {}]   ;;  %s6334_s3 = inlined_call_operand.hbm [shape: bf16[128,384], index: 3, kind: input, shape index: {}]   ;;  %s6335_s4 = inlined_call_operand.vmem [shape: f32[1,128], index: 4, kind: input, shape index: {}]   ;;  %s6336_s5 = inlined_call_operand.hbm [shape: bf16[128,384], index: 5, kind: input, shape index: {}]   ;;  %s6337_s6 = inlined_call_operand.vmem [shape: f32[1,384], index: 6, kind: input, shape index: {}]   ;;  %s6338_s7 = inlined_call_operand.vmem [shape: f32[1,128], index: 7, kind: input, shape index: {}]   ;;  %s6339_s8 = inlined_call_operand.hbm [shape: bf16[128,384], index: 8, kind: input, shape index: {}]   ;;  %s6340_s9 = inlined_call_operand.hbm [shape: bf16[7,128,256], index: 9, kind: input, shape index: {}]   ;;  %s6341_s10 = inlined_call_operand.vmem [shape: f32[1,256], index: 10, kind: input, shape index: {}]   ;;  %s6342_s11 = inlined_call_operand.vmem [shape: f32[1,256], index: 11, kind: input, shape index: {}]   ;;  %s6343_s12 = inlined_call_operand.<no memory space> [shape: f32[1,1], index: 12, kind: input, shape index: {}]   ;;  %s6344_s13 = inlined_call_operand.vmem [shape: f32[8,1], index: 13, kind: output, shape index: {}]  }
   0x1   :  { %v18_v0 = vstv %s6343_s12 }
   0x2   :  { %19 = vst [vmem:[#allocation6] sm:$0x1] %v18_v0 }
   0x3   :  { %20 = vsyncpa [#allocation8], 0 }
   0x4   :  { %21 = vsyncpa [#allocation10], 0 }
   0x5   :  { %22 = vsyncpa [#allocation13], 0 }
   0x6   :  { %23 = vsyncpa [#allocation16], 0  ;;  %s5296_s27 = smov [#allocation9]   ;;  %s5156_s14 = scalar_lea.hbm %s6332_s1, 4032 }
   0x7   :  { %s39_s28 = sshll.u32 %s5296_s27, 4  ;;  %p5157_p0 = scmp.ne.s32.totalorder %s6332_s1, %s5156_s14  ;;  %s40_s28 = int_to_ptr.vmem [resolvable:$true] %s39_s28 }
   0x8   :  { %p5160_p1 = scmp.lt.u32.totalorder %s5156_s14, %s6332_s1 }
   0xa   :  { %p5162_p2 = pnand %p5160_p1, %p5157_p0 }
   0xc   :  { %5165 = shalt.err (!%p5162_p2)
}
   0xd   :  { %s5166_s12 = scalar_lea.vmem %s40_s28, 4032  ;;  %p5171_p4 = scmp.lt.s32.totalorder %s40_s28, %s40_s28 }
   0xe   :  { %p5167_p3 = scmp.ne.s32.totalorder %s40_s28, %s5166_s12  ;;  %p5172_p5 = scmp.lt.s32.totalorder %s5166_s12, %s5166_s12 }
  0x10   :  { %p5173_p6 = por %p5172_p5, %p5171_p4 }
  0x12   :  { %p5174_p7 = pnand %p5173_p6, %p5167_p3 }
  0x14   :  { %5177 = shalt.err (!%p5174_p7)
}
  0x15   :  { %s5297_s19 = smov 1344   ;;  %s5298_s20 = smov 84  }
  0x16   :  { %45 = dma.hbm_to_vmem [thread:$0]  %s6332_s1, 4032, %s40_s28, [#allocation10], %s5297_s19, %s5297_s19, %s5298_s20  }
  0x17   :  { %s5299_s23 = smov [#allocation12]   ;;  %s5300_s25 = smov [#allocation7]  }
  0x18   :  { %s67_s24 = sshll.u32 %s5299_s23, 4  ;;  %s30_s26 = sshll.u32 %s5300_s25, 4  ;;  %s68_s24 = int_to_ptr.vmem [resolvable:$true] %s67_s24  ;;  %s31_s26 = int_to_ptr.vmem [resolvable:$true] %s30_s26 }
  0x19   :  { %s5178_s30 = scalar_lea.hbm %s6336_s5, 3072 }
  0x1a   :  { %p5179_p8 = scmp.ne.s32.totalorder %s6336_s5, %s5178_s30  ;;  %p5182_p9 = scmp.lt.u32.totalorder %s5178_s30, %s6336_s5 }
  0x1c   :  { %p5184_p10 = pnand %p5182_p9, %p5179_p8 }
  0x1e   :  { %5187 = shalt.err (!%p5184_p10)
}
  0x1f   :  { %s5188_s1 = scalar_lea.vmem %s68_s24, 3072  ;;  %p5193_p12 = scmp.lt.s32.totalorder %s68_s24, %s68_s24 }
  0x20   :  { %p5189_p11 = scmp.ne.s32.totalorder %s68_s24, %s5188_s1  ;;  %p5194_p13 = scmp.lt.s32.totalorder %s5188_s1, %s5188_s1 }
  0x22   :  { %p5195_p0 = por %p5194_p13, %p5193_p12 }
  0x24   :  { %p5196_p1 = pnand %p5195_p0, %p5189_p11 }
  0x26   :  { %5199 = shalt.err (!%p5196_p1)
}
  0x27   :  { %s5301_s28 = smov 192   ;;  %s5302_s18 = smov 12  }
  0x28   :  { %73 = dma.hbm_to_vmem [thread:$0]  %s6336_s5, 3072, %s68_s24, [#allocation13], %s5301_s28, %s5301_s28, %s5302_s18  }
  0x29   :  { %s5200_s22 = scalar_lea.hbm %s6331_s0, 128 }
  0x2a   :  { %p5201_p2 = scmp.ne.s32.totalorder %s6331_s0, %s5200_s22  ;;  %p5204_p3 = scmp.lt.u32.totalorder %s5200_s22, %s6331_s0 }
  0x2c   :  { %p5206_p4 = pnand %p5204_p3, %p5201_p2 }
  0x2e   :  { %5209 = shalt.err (!%p5206_p4)
}
  0x2f   :  { %s5210_s30 = scalar_lea.vmem %s31_s26, 128  ;;  %p5215_p6 = scmp.lt.s32.totalorder %s31_s26, %s31_s26 }
  0x30   :  { %p5211_p5 = scmp.ne.s32.totalorder %s31_s26, %s5210_s30  ;;  %p5216_p7 = scmp.lt.s32.totalorder %s5210_s30, %s5210_s30 }
  0x32   :  { %p5217_p8 = por %p5216_p7, %p5215_p6 }
  0x34   :  { %p5218_p9 = pnand %p5217_p8, %p5211_p5 }
  0x36   :  { %5221 = shalt.err (!%p5218_p9)
}
  0x37   :  { %33 = dma.hbm_to_vmem [thread:$0]  %s6331_s0, 128, %s31_s26, [#allocation8]  }
  0x38   :  { %s5303_s14 = smov [#allocation11]   ;;  %s5304_s16 = smov [#allocation14]  }
  0x39   :  { %s53_s15 = sshll.u32 %s5303_s14, 4  ;;  %s83_s17 = sshll.u32 %s5304_s16, 4  ;;  %s54_s15 = int_to_ptr.vmem [resolvable:$true] %s53_s15  ;;  %s84_s17 = int_to_ptr.vmem [resolvable:$true] %s83_s17 }
  0x3a   :  { %s5222_s19 = scalar_lea.hbm %s6334_s3, 3072 }
  0x3b   :  { %p5223_p10 = scmp.ne.s32.totalorder %s6334_s3, %s5222_s19  ;;  %p5226_p11 = scmp.lt.u32.totalorder %s5222_s19, %s6334_s3 }
  0x3d   :  { %p5228_p12 = pnand %p5226_p11, %p5223_p10 }
  0x3f   :  { %5231 = shalt.err (!%p5228_p12)
}
  0x40   :  { %s5232_s0 = scalar_lea.vmem %s54_s15, 3072  ;;  %p5237_p0 = scmp.lt.s32.totalorder %s54_s15, %s54_s15 }
  0x41   :  { %p5233_p13 = scmp.ne.s32.totalorder %s54_s15, %s5232_s0  ;;  %p5238_p1 = scmp.lt.s32.totalorder %s5232_s0, %s5232_s0 }
  0x43   :  { %p5239_p2 = por %p5238_p1, %p5237_p0 }
  0x45   :  { %p5240_p3 = pnand %p5239_p2, %p5233_p13 }
  0x47   :  { %5243 = shalt.err (!%p5240_p3)
}
  0x48   :  { %59 = dma.hbm_to_vmem [thread:$0]  %s6334_s3, 3072, %s54_s15, [#allocation10], %s5301_s28, %s5301_s28, %s5302_s18  }
  0x49   :  { %s5244_s30 = scalar_lea.hbm %s6339_s8, 3072 }
  0x4a   :  { %p5245_p4 = scmp.ne.s32.totalorder %s6339_s8, %s5244_s30  ;;  %p5248_p5 = scmp.lt.u32.totalorder %s5244_s30, %s6339_s8 }
  0x4c   :  { %p5250_p6 = pnand %p5248_p5, %p5245_p4 }
  0x4e   :  { %5253 = shalt.err (!%p5250_p6)
}
  0x4f   :  { %s5254_s1 = scalar_lea.vmem %s84_s17, 3072  ;;  %p5259_p8 = scmp.lt.s32.totalorder %s84_s17, %s84_s17 }
  0x50   :  { %p5255_p7 = scmp.ne.s32.totalorder %s84_s17, %s5254_s1  ;;  %p5260_p9 = scmp.lt.s32.totalorder %s5254_s1, %s5254_s1 }
  0x52   :  { %p5261_p10 = por %p5260_p9, %p5259_p8 }
  0x54   :  { %p5262_p11 = pnand %p5261_p10, %p5255_p7 }
  0x56   :  { %5265 = shalt.err (!%p5262_p11)
}
  0x57   :  { %89 = dma.hbm_to_vmem [thread:$0]  %s6339_s8, 3072, %s84_s17, [#allocation13], %s5301_s28, %s5301_s28, %s5302_s18  }
  0x58   :  { %s5305_s12 = smov [#allocation15]   ;;  %s5266_s22 = scalar_lea.hbm %s6340_s9, 14336 }
  0x59   :  { %s95_s19 = sshll.u32 %s5305_s12, 4  ;;  %p5267_p12 = scmp.ne.s32.totalorder %s6340_s9, %s5266_s22  ;;  %s96_s19 = int_to_ptr.vmem [resolvable:$true] %s95_s19 }
  0x5a   :  { %p5270_p13 = scmp.lt.u32.totalorder %s5266_s22, %s6340_s9 }
  0x5c   :  { %p5272_p0 = pnand %p5270_p13, %p5267_p12 }
  0x5e   :  { %5275 = shalt.err (!%p5272_p0)
}
  0x5f   :  { %s5276_s27 = scalar_lea.vmem %s96_s19, 14336  ;;  %p5281_p2 = scmp.lt.s32.totalorder %s96_s19, %s96_s19 }
  0x60   :  { %p5277_p1 = scmp.ne.s32.totalorder %s96_s19, %s5276_s27  ;;  %p5282_p3 = scmp.lt.s32.totalorder %s5276_s27, %s5276_s27 }
  0x62   :  { %p5283_p4 = por %p5282_p3, %p5281_p2 }
  0x64   :  { %p5284_p5 = pnand %p5283_p4, %p5277_p1 }
  0x66   :  { %5287 = shalt.err (!%p5284_p5)
}
  0x67   :  { %s5306_s8 = smov 128   ;;  %s5307_s28 = smov 8  }
  0x68   :  { %101 = dma.hbm_to_vmem [thread:$0]  %s6340_s9, 14336, %s96_s19, [#allocation16], %s5306_s8, %s5306_s8, %s5307_s28  }
  0x69   :  { %5288 = dma.done.wait [#allocation8], 128  }
  0x6a   :  { %5289 = vsyncadd [#allocation8], 4294967168 }
  0x6b   :  { %5290 = dma.done.wait [#allocation10], 7104  }
  0x6c   :  { %5291 = vsyncadd [#allocation10], 4294960192 }
  0x6d   :  { %5292 = dma.done.wait [#allocation13], 6144  }
  0x6e   :  { %5293 = vsyncadd [#allocation13], 4294961152 }
  0x6f   :  { %5294 = dma.done.wait [#allocation16], 14336  }
  0x70   :  { %5295 = vsyncadd [#allocation16], 4294952960  ;;  %v6346_v1 = vmov 0   ;;  %vm392_vm0 = vcmask 1041408   ;;  %vm393_vm1 = vcmask 1042432   ;;  %v5309_v2 = vmov 65535  }
  0x71   :  { %491 = vmatprep.mubr.bf16.mxu0 %v6346_v1  ;;  %614 = vmatprep.mubr.bf16.mxu1 %v6346_v1  ;;  %v394_v3 = vsel %vm392_vm0, 4294967295, %v5309_v2  ;;  %v4674_v4 = vld [vmem:[#allocation9 + $0x4] ss:$84 sps:$4 sm:$0xff]   ;;  %v4676_v5 = vld [vmem:[#allocation9] ss:$84 sps:$4 sm:$0xff]   ;;  %vm388_vm2 = vcmask 171008  }
  0x72   :  { %v218_v6 = vld [vmem:[#allocation9 + $0xa8] sm:$0x77]  ;;  %v5468_v7 = vsel %vm393_vm1, %v394_v3, 0  ;;  %459 = vmatprep.subr.bf16.mxu0 %v4674_v4  ;;  %v194_v10 = vld [vmem:[#allocation7] sm:$0xff]  ;;  %v219_v11 = vld [vmem:[#allocation9 + $0xb0] sm:$0x77] }
  0x73   :  { %v3993_v8 = vcombine.high %v218_v6, %v218_v6  ;;  %v3992_v9 = vcombine.low %v218_v6, %v218_v6  ;;  %460 = vmatpush1.bf16.msra.mxu0 %v4676_v5  ;;  %v4681_v14 = vld [vmem:[#allocation9 + $0xc] ss:$84 sps:$4 sm:$0xff]   ;;  %v3995_v15 = vcombine.high %v219_v11, %v219_v11  ;;  %v5472_v16 = vpack.c.bf16 %v194_v10, %v194_v10  ;;  %v4689_v17 = vld [vmem:[#allocation9 + $0x1c] ss:$84 sps:$4 sm:$0xff]   ;;  %v4686_v31 = vld [vmem:[#allocation9 + $0x14] ss:$84 sps:$4 sm:$0xff]  }
  0x74   :  { %v4691_v18 = vld [vmem:[#allocation9 + $0x18] ss:$84 sps:$4 sm:$0xff]   ;;  %v4679_v19 = vld [vmem:[#allocation9 + $0x8] ss:$84 sps:$4 sm:$0xff]   ;;  %v3994_v20 = vcombine.low %v219_v11, %v219_v11  ;;  %582 = vmatprep.subr.bf16.mxu1 %v4689_v17  ;;  %v221_v22 = vld [vmem:[#allocation9 + $0xc0] sm:$0x77] }
  0x75   :  { %v400_v12 = vand.u32 %v3993_v8, %v5468_v7  ;;  %v397_v13 = vand.u32 %v3992_v9, %v5468_v7  ;;  %v406_v21 = vand.u32 %v3995_v15, %v5468_v7  ;;  %v220_v23 = vld [vmem:[#allocation9 + $0xb8] sm:$0x77]  ;;  %583 = vmatpush1.bf16.msra.mxu1 %v4691_v18  ;;  %v3999_v24 = vcombine.high %v221_v22, %v221_v22  ;;  %v4701_v29 = vld [vmem:[#allocation9 + $0x2c] ss:$84 sps:$4 sm:$0xff]   ;;  %v223_v30 = vld [vmem:[#allocation9 + $0xd0] sm:$0x77] }
  0x76   :  { %v3998_v25 = vcombine.low %v221_v22, %v221_v22  ;;  %v403_v26 = vand.u32 %v3994_v20, %v5468_v7  ;;  %v3997_v32 = vcombine.high %v220_v23, %v220_v23  ;;  %v4003_v33 = vcombine.high %v223_v30, %v223_v30  ;;  %v4684_v34 = vld [vmem:[#allocation9 + $0x10] ss:$84 sps:$4 sm:$0xff]   ;;  %v4699_v35 = vld [vmem:[#allocation9 + $0x28] ss:$84 sps:$4 sm:$0xff]   ;;  %v4709_v46 = vld [vmem:[#allocation9 + $0x38] ss:$84 sps:$4 sm:$0xff]  }
  0x77   :  { %461 = vmatprep.subr.bf16.mxu0 %v400_v12  ;;  %v418_v27 = vand.u32 %v3999_v24, %v5468_v7  ;;  %v4002_v36 = vcombine.low %v223_v30, %v223_v30  ;;  %v3996_v37 = vcombine.low %v220_v23, %v220_v23  ;;  %v222_v38 = vld [vmem:[#allocation9 + $0xc8] sm:$0x77]  ;;  %v4711_v41 = vld [vmem:[#allocation9 + $0x3c] ss:$84 sps:$4 sm:$0xff]   ;;  %v4694_v42 = vld [vmem:[#allocation9 + $0x24] ss:$84 sps:$4 sm:$0xff]  }
  0x78   :  { %462 = vmatpush1.bf16.msra.mxu0 %v397_v13  ;;  %v415_v28 = vand.u32 %v3998_v25, %v5468_v7  ;;  %v412_v39 = vand.u32 %v3997_v32, %v5468_v7  ;;  %v430_v40 = vand.u32 %v4003_v33, %v5468_v7  ;;  %v4001_v45 = vcombine.high %v222_v38, %v222_v38  ;;  %v4692_v47 = vld [vmem:[#allocation9 + $0x20] ss:$84 sps:$4 sm:$0xff]   ;;  %v224_v49 = vld [vmem:[#allocation9 + $0xd8] sm:$0x77]  ;;  %v4702_v54 = vld [vmem:[#allocation9 + $0x30] ss:$84 sps:$4 sm:$0xff]  }
  0x79   :  { %500 = vmatprep.subr.bf16.mxu0 %v4681_v14  ;;  %584 = vmatprep.subr.bf16.mxu1 %v418_v27  ;;  %v427_v43 = vand.u32 %v4002_v36, %v5468_v7  ;;  %v409_v44 = vand.u32 %v3996_v37, %v5468_v7  ;;  %v4000_v48 = vcombine.low %v222_v38, %v222_v38  ;;  %v4704_v51 = vld [vmem:[#allocation9 + $0x34] ss:$84 sps:$4 sm:$0xff]   ;;  %v225_v58 = vld [vmem:[#allocation9 + $0xe0] sm:$0x77]  ;;  %v6348_v11 = vmov 0.0  }
  0x7a   :  { %585 = vmatpush1.bf16.msra.mxu1 %v415_v28  ;;  %v424_v50 = vand.u32 %v4001_v45, %v5468_v7  ;;  %v4005_v53 = vcombine.high %v224_v49, %v224_v49  ;;  %v4004_v55 = vcombine.low %v224_v49, %v224_v49  ;;  %v4714_v59 = vld [vmem:[#allocation9 + $0x44] ss:$84 sps:$4 sm:$0xff]   ;;  %v4007_v60 = vcombine.high %v225_v58, %v225_v58  ;;  %v4712_v61 = vld [vmem:[#allocation9 + $0x40] ss:$84 sps:$4 sm:$0xff]   ;;  %v226_v63 = vld [vmem:[#allocation9 + $0xe8] sm:$0x77] }
  0x7b   :  { %4013 = vmatmul.mubr.msk.bf16.vlgmr.msra.gmra.mrb[0].mxu0 %vm388_vm2, %v5472_v16  ;;  %664 = vmatprep.subr.bf16.mxu1 %v4701_v29  ;;  %v421_v52 = vand.u32 %v4000_v48, %v5468_v7  ;;  %v4006_v62 = vcombine.low %v225_v58, %v225_v58  ;;  %v4009_v2 = vcombine.high %v226_v63, %v226_v63  ;;  %v4721_v8 = vld [vmem:[#allocation9 + $0x4c] ss:$84 sps:$4 sm:$0xff]   ;;  %v4719_v9 = vld [vmem:[#allocation9 + $0x48] ss:$84 sps:$4 sm:$0xff]   ;;  %v4722_v10 = vld [vmem:[#allocation9 + $0x50] ss:$84 sps:$4 sm:$0xff]  }
  0x7c   :  { %501 = vmatpush1.bf16.msra.mxu0 %v4679_v19  ;;  %532 = vmatprep.mubr.bf16.mxu0 %v6346_v1  ;;  %v436_v56 = vand.u32 %v4005_v53, %v5468_v7  ;;  %v433_v57 = vand.u32 %v4004_v55, %v5468_v7  ;;  %v442_v0 = vand.u32 %v4007_v60, %v5468_v7  ;;  %v227_v12 = vld [vmem:[#allocation9 + $0xf0] sm:$0x77]  ;;  %v4725_v15 = vld [vmem:[#allocation9 + $0xf8] ss:$0 sps:$4 sm:$0x77]   ;;  %vm5311_vm3 = vmmov 0  }
  0x7d   :  { %502 = vmatprep.subr.bf16.mxu0 %v406_v21  ;;  %4016 = vmatmul.mubr.msk.bf16.vlgmr.msra.gmra.mrb[0].mxu1 %vm388_vm2, %v5472_v16  ;;  %v439_v3 = vand.u32 %v4006_v62, %v5468_v7  ;;  %v4008_v4 = vcombine.low %v226_v63, %v226_v63  ;;  %v448_v5 = vand.u32 %v4009_v2, %v5468_v7  ;;  %v5521_v20 = vld [vmem:[#allocation11 + $0x4] ss:$12 sps:$4 sm:$0xff]   ;;  %v5524_v21 = vld [vmem:[#allocation11] ss:$12 sps:$4 sm:$0xff]   ;;  %v5526_v22 = vld [vmem:[#allocation11 + $0x8] ss:$12 sps:$4 sm:$0xff]  }
  0x7e   :  { %665 = vmatpush1.bf16.msra.mxu1 %v4699_v35  ;;  %696 = vmatprep.mubr.bf16.mxu1 %v6346_v1  ;;  %v4010_v13 = vcombine.low %v227_v12, %v227_v12  ;;  %v4011_v14 = vcombine.high %v227_v12, %v227_v12  ;;  %v457_v19 = vand.u32 %v4725_v15, %v5468_v7  ;;  %v5540_v23 = vld [vmem:[#allocation11 + $0x18] ss:$12 sps:$4 sm:$0xff]   ;;  %v5542_v24 = vld [vmem:[#allocation11 + $0x20] ss:$12 sps:$4 sm:$0xff]   ;;  %v5553_v25 = vld [vmem:[#allocation11 + $0x30] ss:$12 sps:$4 sm:$0xff]  }
  0x7f   :  { %666 = vmatprep.subr.bf16.mxu1 %v430_v40  ;;  %v445_v6 = vand.u32 %v4008_v4, %v5468_v7  ;;  %v5560_v27 = vld [vmem:[#allocation11 + $0x4c] ss:$12 sps:$4 sm:$0xff]   ;;  %v5563_v28 = vld [vmem:[#allocation11 + $0x48] ss:$12 sps:$4 sm:$0xff]   ;;  %v5565_v29 = vld [vmem:[#allocation11 + $0x50] ss:$12 sps:$4 sm:$0xff]  }
  0x80   :  { %503 = vmatpush1.bf16.msra.mxu0 %v403_v26  ;;  %v454_v17 = vand.u32 %v4011_v14, %v5468_v7  ;;  %v451_v18 = vand.u32 %v4010_v13, %v5468_v7  ;;  %v5537_v7 = vld [vmem:[#allocation11 + $0x1c] ss:$12 sps:$4 sm:$0xff]   ;;  %v5555_v26 = vld [vmem:[#allocation11 + $0x38] ss:$12 sps:$4 sm:$0xff]   ;;  %v5584_v35 = vld [vmem:[#allocation11 + $0x80] ss:$12 sps:$4 sm:$0xff]  }
  0x81   :  { %541 = vmatprep.subr.bf16.mxu0 %v4686_v31  ;;  %v5570_v30 = vld [vmem:[#allocation11 + $0x64] ss:$12 sps:$4 sm:$0xff]   ;;  %v5573_v31 = vld [vmem:[#allocation11 + $0x60] ss:$12 sps:$4 sm:$0xff]   ;;  %v5575_v32 = vld [vmem:[#allocation11 + $0x68] ss:$12 sps:$4 sm:$0xff]  }
  0x82   :  { %667 = vmatpush1.bf16.msra.mxu1 %v427_v43  ;;  %v5578_v33 = vld [vmem:[#allocation11 + $0x7c] ss:$12 sps:$4 sm:$0xff]   ;;  %v5588_v36 = vld [vmem:[#allocation11 + $0x94] ss:$12 sps:$4 sm:$0xff]   ;;  %v5594_v38 = vld [vmem:[#allocation11 + $0x98] ss:$12 sps:$4 sm:$0xff]  }
  0x83   :  { %4014 = vmatmul.mubr.msk.bf16.vlgmr.msra.gmra.mrb[4].mxu0 %vm388_vm2, %v5472_v16  ;;  %746 = vmatprep.subr.bf16.mxu1 %v4711_v41  ;;  %v5592_v37 = vld [vmem:[#allocation11 + $0x90] ss:$12 sps:$4 sm:$0xff]   ;;  %v5602_v40 = vld [vmem:[#allocation11 + $0xa8] ss:$12 sps:$4 sm:$0xff]   ;;  %vm3961_vm6 = vcmask 7168  }
  0x84   :  { %542 = vmatpush1.bf16.msra.mxu0 %v4684_v34  ;;  %573 = vmatprep.mubr.bf16.mxu0 %v6346_v1  ;;  %v5582_v34 = vld [vmem:[#allocation11 + $0x78] ss:$12 sps:$4 sm:$0xff]   ;;  %v5604_v41 = vld [vmem:[#allocation11 + $0xb0] ss:$12 sps:$4 sm:$0xff]  }
  0x85   :  { %543 = vmatprep.subr.bf16.mxu0 %v412_v39  ;;  %4018 = vmatmul.mubr.msk.bf16.vlgmr.msra.gmra.mrb[4].mxu1 %vm388_vm2, %v5472_v16  ;;  %v5598_v39 = vld [vmem:[#allocation11 + $0xac] ss:$12 sps:$4 sm:$0xff]  }
  0x86   :  { %747 = vmatpush1.bf16.msra.mxu1 %v4709_v46  ;;  %778 = vmatprep.mubr.bf16.mxu1 %v6346_v1  ;;  %v127_v45 = vld [vmem:[%s6333_s2] sm:$0x7] }
  0x87   :  { %748 = vmatprep.subr.bf16.mxu1 %v442_v0 }
  0x88   :  { %544 = vmatpush1.bf16.msra.mxu0 %v409_v44 }
  0x89   :  { %623 = vmatprep.subr.bf16.mxu0 %v4694_v42  ;;  %v934_v42 = vlaneseq }
  0x8a   :  { %749 = vmatpush1.bf16.msra.mxu1 %v439_v3 }
  0x8b   :  { %4015 = vmatmul.mubr.msk.bf16.vlgmr.msra.gmra.mrb[8].mxu0 %vm388_vm2, %v5472_v16  ;;  %828 = vmatprep.subr.bf16.mxu1 %v4721_v8  ;;  %v5612_v43 = vshrl.u32 %v934_v42, 7 }
  0x8c   :  { %624 = vmatpush1.bf16.msra.mxu0 %v4692_v47  ;;  %655 = vmatprep.mubr.bf16.mxu0 %v6346_v1 }
  0x8d   :  { %625 = vmatprep.subr.bf16.mxu0 %v424_v50  ;;  %4020 = vmatmul.mubr.msk.bf16.vlgmr.msra.gmra.mrb[8].mxu1 %vm388_vm2, %v5472_v16  ;;  %v5615_v44 = vsub.s32 0, %v5612_v43  ;;  %v5621_v46 = vsub.s32 1, %v5612_v43  ;;  %v6345_v8 = vsub.s32 2, %v5612_v43 }
  0x8e   :  { %860 = vmatprep.mubr.bf16.mxu1 %v6346_v1  ;;  %829 = vmatpush1.bf16.msra.mxu1 %v4719_v9 }
  0x8f   :  { %830 = vmatprep.subr.bf16.mxu1 %v454_v17  ;;  %6354 = vst [vmem:[#allocation21_spill] sm:$0xff] %v5615_v44  ;;  %6355 = vst [vmem:[#allocation22_spill] sm:$0xff] %v5621_v46  ;;  %v5624_v47 = vrot.slane %v127_v45, %v5615_v44  ;;  %v5627_v49 = vrot.slane %v127_v45, %v5621_v46  ;;  %v5644_v12 = vrot.slane %v127_v45, %v6345_v8  ;;  %v5653_v17 = vld [vmem:[%s6335_s4] ss:$0 sm:$0xff] }
  0x90   :  { %626 = vmatpush1.bf16.msra.mxu0 %v421_v52 }
  0x91   :  { %705 = vmatprep.subr.bf16.mxu0 %v4704_v51 }
  0x92   :  { %831 = vmatpush1.bf16.msra.mxu1 %v451_v18 }
  0x93   :  { %4017 = vmatmul.mubr.msk.bf16.vlgmr.msra.gmra.mrb[12].mxu0 %vm388_vm2, %v5472_v16  ;;  %1111 = vmatprep.subr.bf16.mxu1 %v5521_v20 }
  0x94   :  { %706 = vmatpush1.bf16.msra.mxu0 %v4702_v54  ;;  %737 = vmatprep.mubr.bf16.mxu0 %v6346_v1 }
  0x95   :  { %707 = vmatprep.subr.bf16.mxu0 %v436_v56  ;;  %4022 = vmatmul.mubr.msk.bf16.vlgmr.msra.gmra.mrb[12].mxu1 %vm388_vm2, %v5472_v16 }
  0x96   :  { %1112 = vmatpush1.bf16.msra.mxu1 %v5524_v21  ;;  %1143 = vmatprep.mubr.bf16.mxu1 %v6346_v1 }
  0x97   :  { %1113 = vmatprep.subr.bf16.mxu1 %v5537_v7 }
  0x98   :  { %708 = vmatpush1.bf16.msra.mxu0 %v433_v57 }
  0x99   :  { %787 = vmatprep.subr.bf16.mxu0 %v4714_v59 }
  0x9a   :  { %1114 = vmatpush1.bf16.msra.mxu1 %v5540_v23 }
  0x9b   :  { %4019 = vmatmul.mubr.msk.bf16.vlgmr.msra.gmra.mrb[16].mxu0 %vm388_vm2, %v5472_v16 }
  0x9c   :  { %819 = vmatprep.mubr.bf16.mxu0 %v6346_v1  ;;  %788 = vmatpush1.bf16.msra.mxu0 %v4712_v61 }
  0x9d   :  { %789 = vmatprep.subr.bf16.mxu0 %v448_v5 }
  0xa0   :  { %790 = vmatpush1.bf16.msra.mxu0 %v445_v6 }
  0xa1   :  { %4362 = vmatprep.subr.bf16.mxu0 %v6348_v11 }
  0xa3   :  { %4021 = vmatmul.mubr.msk.bf16.vlgmr.msra.gmra.mrb[20].mxu0 %vm388_vm2, %v5472_v16 }
  0xa4   :  { %4363 = vmatpush3.bf16.msra.mxu0 %v4722_v10  ;;  %4366 = vmatprep.mubr.msk.bf16.mxu0 %vm5311_vm3, %v6348_v11 }
  0xa5   :  { %4364 = vmatprep.subr.bf16.mxu0 %v6348_v11 }
  0xa8   :  { %4365 = vmatpush3.bf16.msra.mxu0 %v457_v19 }
  0xa9   :  { %4370 = vmatprep.subr.bf16.mxu0 %v6348_v11 }
  0xab   :  { %4367 = vmatmul.mubr.msk.bf16.vlgmr.msra.gmra.mrb[24].mxu0 %vm388_vm2, %v5472_v16  ;;  %v5550_v16 = vld [vmem:[#allocation11 + $0x34] ss:$12 sps:$4 sm:$0xff]  }
  0xac   :  { %4371 = vmatpush3.bf16.msra.mxu0 %v5526_v22  ;;  %4386 = vmatprep.mubr.msk.bf16.mxu0 %vm5311_vm3, %v6348_v11 }
  0xad   :  { %4372 = vmatprep.subr.bf16.mxu0 %v6348_v11  ;;  %1115 = vmatprep.subr.bf16.mxu1 %v5550_v16 }
  0xae   :  { %1116 = vmatpush1.bf16.msra.mxu1 %v5553_v25 }
  0xaf   :  { %1117 = vmatprep.subr.bf16.mxu1 %v5560_v27 }
  0xb0   :  { %4373 = vmatpush3.bf16.msra.mxu0 %v5542_v24 }
  0xb1   :  { %4374 = vmatprep.subr.bf16.mxu0 %v6348_v11 }
  0xb2   :  { %1118 = vmatpush1.bf16.msra.mxu1 %v5563_v28 }
  0xb3   :  { %1119 = vmatprep.subr.bf16.mxu1 %v5570_v30 }
  0xb4   :  { %4375 = vmatpush3.bf16.msra.mxu0 %v5555_v26 }
  0xb5   :  { %4376 = vmatprep.subr.bf16.mxu0 %v6348_v11 }
  0xb6   :  { %1120 = vmatpush1.bf16.msra.mxu1 %v5573_v31 }
  0xb7   :  { %1121 = vmatprep.subr.bf16.mxu1 %v5578_v33 }
  0xb8   :  { %4377 = vmatpush3.bf16.msra.mxu0 %v5565_v29 }
  0xb9   :  { %4378 = vmatprep.subr.bf16.mxu0 %v6348_v11 }
  0xba   :  { %1122 = vmatpush1.bf16.msra.mxu1 %v5582_v34 }
  0xbb   :  { %1123 = vmatprep.subr.bf16.mxu1 %v5588_v36 }
  0xbc   :  { %4379 = vmatpush3.bf16.msra.mxu0 %v5575_v32 }
  0xbd   :  { %4380 = vmatprep.subr.bf16.mxu0 %v6348_v11 }
  0xbe   :  { %1124 = vmatpush1.bf16.msra.mxu1 %v5592_v37 }
  0xbf   :  { %1125 = vmatprep.subr.bf16.mxu1 %v5598_v39 }
  0xc0   :  { %4381 = vmatpush3.bf16.msra.mxu0 %v5584_v35 }
  0xc1   :  { %4382 = vmatprep.subr.bf16.mxu0 %v6348_v11 }
  0xc2   :  { %1126 = vmatpush1.bf16.msra.mxu1 %v5602_v40 }
  0xc3   :  { %1222 = vmatprep.subr.bf16.mxu1 %v5521_v20 }
  0xc4   :  { %4383 = vmatpush3.bf16.msra.mxu0 %v5594_v38 }
  0xc5   :  { %4384 = vmatprep.subr.bf16.mxu0 %v6348_v11 }
  0xc8   :  { %4385 = vmatpush3.bf16.msra.mxu0 %v5604_v41 }
  0xc9   :  { %4390 = vmatprep.subr.bf16.mxu0 %v6348_v11 }
 0x14e   :  { %v493_v48 = vpop.f32.mrb[0].mxu0 }
 0x14f   :  { %v949_v50 = vadd.f32 %v5624_v47, %v493_v48  ;;  %v495_v51 = vpop.f32.mrb[1].mxu0 }
 0x150   :  { %v497_v52 = vpop.f32.mrb[2].mxu0  ;;  %v950_v55 = vadd.f32 %v5627_v49, %v495_v51 }
 0x151   :  { %v4024_v53 = vmul.f32 -1.442695, %v949_v50  ;;  %v498_v54 = vpop.f32.mrb[3].mxu0 }
 0x152   :  { %v4025_v56 = vmul.f32 -1.442695, %v950_v55 }
 0x153   :  { %4990 = vpow2.f32 %v4024_v53 }
 0x154   :  { %4992 = vpow2.f32 %v4025_v56 }
 0x156   :  { %v534_v57 = vpop.f32.mrb[4].mxu0 }
 0x157   :  { %v5631_v58 = vpop.f32.mrb[5].mxu0  ;;  %v951_v19 = vadd.f32 %v5644_v12, %v534_v57 }
 0x158   :  { %v538_v59 = vpop.f32.mrb[6].mxu0  ;;  %v5633_v62 = vpop.f32.mrb[4].mxu1 }
 0x159   :  { %v539_v60 = vpop.f32.mrb[7].mxu0  ;;  %v5635_v0 = vpop.f32.mrb[5].mxu1 }
 0x15a   :  { %v702_v3 = vpop.f32.mrb[6].mxu1 }
 0x15b   :  { %v703_v5 = vpop.f32.mrb[7].mxu1 }
 0x15d   :  { %v4991_v61 = vpop.eup %4990 }
 0x15e   :  { %v955_v63 = vadd.f32 1.0, %v4991_v61  ;;  %v5637_v2 = vpop.f32.mrb[8].mxu0  ;;  %v4993_v10 = vpop.eup %4992 }
 0x15f   :  { %v5639_v4 = vpop.f32.mrb[9].mxu0  ;;  %v961_v14 = vadd.f32 1.0, %v4993_v10 }
 0x160   :  { %4994 = vrcp.f32 %v955_v63  ;;  %v579_v6 = vpop.f32.mrb[10].mxu0  ;;  %v5696_v56 = vpop.f32.mrb[8].mxu1 }
 0x161   :  { %v580_v9 = vpop.f32.mrb[11].mxu0  ;;  %4996 = vrcp.f32 %v961_v14  ;;  %v5698_v57 = vpop.f32.mrb[9].mxu1 }
 0x162   :  { %v784_v59 = vpop.f32.mrb[10].mxu1 }
 0x163   :  { %v785_v60 = vpop.f32.mrb[11].mxu1 }
 0x166   :  { %v5646_v13 = vpop.f32.mrb[12].mxu0 }
 0x167   :  { %v5648_v15 = vpop.f32.mrb[13].mxu0 }
 0x168   :  { %v661_v18 = vpop.f32.mrb[14].mxu0 }
 0x169   :  { %v662_v42 = vpop.f32.mrb[15].mxu0  ;;  %v979_v18 = vadd.f32 %v5624_v47, %v5631_v58 }
 0x16a   :  { %v4995_v48 = vpop.eup %4994 }
 0x16b   :  { %v970_v50 = vmul.f32 %v4995_v48, %v5653_v17  ;;  %v4997_v51 = vpop.eup %4996 }
 0x16c   :  { %v973_v52 = vsub.f32 1.0, %v4997_v51 }
 0x16d   :  { %v971_v45 = vadd.f32 %v970_v50, %v951_v19  ;;  %v980_v19 = vadd.f32 %v5627_v49, %v5637_v2 }
 0x16f   :  { %4998 = vtanh.f32 %v971_v45 }
 0x176   :  { %v5700_v61 = vpop.f32.mrb[20].mxu0 }
 0x177   :  { %v5702_v63 = vpop.f32.mrb[21].mxu0 }
 0x178   :  { %v825_v3 = vpop.f32.mrb[22].mxu0 }
 0x179   :  { %v4999_v53 = vpop.eup %4998  ;;  %v826_v5 = vpop.f32.mrb[23].mxu0 }
 0x17a   :  { %v5657_v54 = vmul.f32 %v4999_v53, %v973_v52 }
 0x17c   :  { %v982_v55 = vpack.c.bf16 %v5657_v54, %v5657_v54 }
 0x17e   :  { %1144 = vmatmul.mubr.bf16.vlgmr.msra.gmra.mrb[16].mxu1 %v982_v55  ;;  %4387 = vmatmul.mubr.bf16.vlgmr.msra.gmra.mrb[28].mxu0 %v982_v55  ;;  %v5704_v6 = vpop.f32.mrb[24].mxu0 }
 0x17f   :  { %1223 = vmatpush1.bf16.msra.mxu1 %v5524_v21  ;;  %4391 = vmatpush3.bf16.msra.mxu0 %v5526_v22  ;;  %v4368_v9 = vpop.f32.mrb[25].mxu0 }
 0x180   :  { %1224 = vmatprep.subr.bf16.mxu1 %v5537_v7  ;;  %4392 = vmatprep.subr.bf16.mxu0 %v6348_v11  ;;  %v906_v10 = vpop.f32.mrb[26].mxu0 }
 0x181   :  { %1254 = vmatprep.mubr.bf16.mxu1 %v6346_v1  ;;  %4406 = vmatprep.mubr.msk.bf16.mxu0 %vm5311_vm3, %v6348_v11  ;;  %v4369_v14 = vpop.f32.mrb[27].mxu0 }
 0x183   :  { %1225 = vmatpush1.bf16.msra.mxu1 %v5540_v23  ;;  %4393 = vmatpush3.bf16.msra.mxu0 %v5542_v24 }
 0x184   :  { %1226 = vmatprep.subr.bf16.mxu1 %v5550_v16  ;;  %4394 = vmatprep.subr.bf16.mxu0 %v6348_v11 }
 0x187   :  { %1227 = vmatpush1.bf16.msra.mxu1 %v5553_v25  ;;  %4395 = vmatpush3.bf16.msra.mxu0 %v5555_v26 }
 0x188   :  { %1228 = vmatprep.subr.bf16.mxu1 %v5560_v27  ;;  %4396 = vmatprep.subr.bf16.mxu0 %v6348_v11 }
 0x18b   :  { %1229 = vmatpush1.bf16.msra.mxu1 %v5563_v28  ;;  %4397 = vmatpush3.bf16.msra.mxu0 %v5565_v29 }
 0x18c   :  { %1230 = vmatprep.subr.bf16.mxu1 %v5570_v30  ;;  %4398 = vmatprep.subr.bf16.mxu0 %v6348_v11 }
 0x18f   :  { %1231 = vmatpush1.bf16.msra.mxu1 %v5573_v31  ;;  %4399 = vmatpush3.bf16.msra.mxu0 %v5575_v32 }
 0x190   :  { %1232 = vmatprep.subr.bf16.mxu1 %v5578_v33  ;;  %4400 = vmatprep.subr.bf16.mxu0 %v6348_v11 }
 0x193   :  { %1233 = vmatpush1.bf16.msra.mxu1 %v5582_v34  ;;  %4401 = vmatpush3.bf16.msra.mxu0 %v5584_v35 }
 0x194   :  { %1234 = vmatprep.subr.bf16.mxu1 %v5588_v36  ;;  %4402 = vmatprep.subr.bf16.mxu0 %v6348_v11 }
 0x197   :  { %1235 = vmatpush1.bf16.msra.mxu1 %v5592_v37  ;;  %4403 = vmatpush3.bf16.msra.mxu0 %v5594_v38 }
 0x198   :  { %1236 = vmatprep.subr.bf16.mxu1 %v5598_v39  ;;  %4404 = vmatprep.subr.bf16.mxu0 %v6348_v11 }
 0x19b   :  { %1237 = vmatpush1.bf16.msra.mxu1 %v5602_v40  ;;  %4405 = vmatpush3.bf16.msra.mxu0 %v5604_v41 }
 0x19c   :  { %1333 = vmatprep.subr.bf16.mxu1 %v5521_v20  ;;  %4410 = vmatprep.subr.bf16.mxu0 %v6348_v11 }
 0x251   :  { %v1145_v42 = vpop.f32.mrb[16].mxu1  ;;  %v1186_v48 = vpop.f32.mrb[28].mxu0 }
 0x252   :  { %v1192_v50 = vadd.f32 %v1145_v42, %v979_v18  ;;  %v1147_v45 = vpop.f32.mrb[17].mxu1  ;;  %v4388_v51 = vpop.f32.mrb[29].mxu0  ;;  %v1206_v2 = vadd.f32 %v5653_v17, %v1186_v48  ;;  %v981_v18 = vadd.f32 %v5644_v12, %v5639_v4 }
 0x253   :  { %v1199_v52 = vadd.f32 %v1147_v45, %v980_v19  ;;  %v1149_v53 = vpop.f32.mrb[18].mxu1  ;;  %v1189_v55 = vpop.f32.mrb[30].mxu0 }
 0x254   :  { %v4051_v59 = vmul.f32 -1.442695, %v1192_v50  ;;  %v1150_v60 = vpop.f32.mrb[19].mxu1  ;;  %v4389_v3 = vpop.f32.mrb[31].mxu0 }
 0x255   :  { %v4052_v5 = vmul.f32 -1.442695, %v1199_v52 }
 0x256   :  { %5000 = vpow2.f32 %v4051_v59 }
 0x257   :  { %5002 = vpow2.f32 %v4052_v5 }
 0x260   :  { %v5001_v9 = vpop.eup %5000 }
 0x261   :  { %v1196_v10 = vadd.f32 1.0, %v5001_v9  ;;  %v5003_v58 = vpop.eup %5002 }
 0x262   :  { %v1203_v14 = vadd.f32 1.0, %v5003_v58 }
 0x263   :  { %5004 = vrcp.f32 %v1196_v10 }
 0x264   :  { %5006 = vrcp.f32 %v1203_v14 }
 0x26d   :  { %v5005_v8 = vpop.eup %5004 }
 0x26e   :  { %v1207_v19 = vmul.f32 %v5005_v8, %v1206_v2  ;;  %v5007_v50 = vpop.eup %5006 }
 0x26f   :  { %v1210_v45 = vsub.f32 1.0, %v5007_v50  ;;  %v1212_v53 = vmul.f32 %v5007_v50, %v5657_v54 }
 0x270   :  { %v1208_v42 = vadd.f32 %v1207_v19, %v981_v18 }
 0x272   :  { %5008 = vtanh.f32 %v1208_v42 }
 0x27c   :  { %v5009_v51 = vpop.eup %5008 }
 0x27d   :  { %v1211_v52 = vmul.f32 %v5009_v51, %v1210_v45 }
 0x27f   :  { %v5714_v55 = vadd.f32 %v1212_v53, %v1211_v52  ;;  %v1220_v53 = vadd.f32 %v5644_v12, %v5646_v13  ;;  %v1329_v13 = vadd.f32 %v5624_v47, %v5648_v15 }
 0x281   :  { %v1221_v59 = vpack.c.bf16 %v5714_v55, %v5714_v55 }
 0x283   :  { %1255 = vmatmul.mubr.bf16.vlgmr.msra.gmra.mrb[0].mxu1 %v1221_v59  ;;  %4407 = vmatmul.mubr.bf16.vlgmr.msra.gmra.mrb[32].mxu0 %v1221_v59 }
 0x284   :  { %1334 = vmatpush1.bf16.msra.mxu1 %v5524_v21  ;;  %4411 = vmatpush3.bf16.msra.mxu0 %v5526_v22 }
 0x285   :  { %1335 = vmatprep.subr.bf16.mxu1 %v5537_v7  ;;  %4412 = vmatprep.subr.bf16.mxu0 %v6348_v11 }
 0x286   :  { %1365 = vmatprep.mubr.bf16.mxu1 %v6346_v1  ;;  %4426 = vmatprep.mubr.msk.bf16.mxu0 %vm5311_vm3, %v6348_v11 }
 0x288   :  { %1336 = vmatpush1.bf16.msra.mxu1 %v5540_v23  ;;  %4413 = vmatpush3.bf16.msra.mxu0 %v5542_v24 }
 0x289   :  { %1337 = vmatprep.subr.bf16.mxu1 %v5550_v16  ;;  %4414 = vmatprep.subr.bf16.mxu0 %v6348_v11 }
 0x28c   :  { %1338 = vmatpush1.bf16.msra.mxu1 %v5553_v25  ;;  %4415 = vmatpush3.bf16.msra.mxu0 %v5555_v26 }
 0x28d   :  { %1339 = vmatprep.subr.bf16.mxu1 %v5560_v27  ;;  %4416 = vmatprep.subr.bf16.mxu0 %v6348_v11 }
 0x290   :  { %1340 = vmatpush1.bf16.msra.mxu1 %v5563_v28  ;;  %4417 = vmatpush3.bf16.msra.mxu0 %v5565_v29 }
 0x291   :  { %1341 = vmatprep.subr.bf16.mxu1 %v5570_v30  ;;  %4418 = vmatprep.subr.bf16.mxu0 %v6348_v11 }
 0x294   :  { %1342 = vmatpush1.bf16.msra.mxu1 %v5573_v31  ;;  %4419 = vmatpush3.bf16.msra.mxu0 %v5575_v32 }
 0x295   :  { %1343 = vmatprep.subr.bf16.mxu1 %v5578_v33  ;;  %4420 = vmatprep.subr.bf16.mxu0 %v6348_v11 }
 0x298   :  { %1344 = vmatpush1.bf16.msra.mxu1 %v5582_v34  ;;  %4421 = vmatpush3.bf16.msra.mxu0 %v5584_v35 }
 0x299   :  { %1345 = vmatprep.subr.bf16.mxu1 %v5588_v36  ;;  %4422 = vmatprep.subr.bf16.mxu0 %v6348_v11 }
 0x29c   :  { %1346 = vmatpush1.bf16.msra.mxu1 %v5592_v37  ;;  %4423 = vmatpush3.bf16.msra.mxu0 %v5594_v38 }
 0x29d   :  { %1347 = vmatprep.subr.bf16.mxu1 %v5598_v39  ;;  %4424 = vmatprep.subr.bf16.mxu0 %v6348_v11 }
 0x2a0   :  { %1348 = vmatpush1.bf16.msra.mxu1 %v5602_v40  ;;  %4425 = vmatpush3.bf16.msra.mxu0 %v5604_v41 }
 0x2a1   :  { %1444 = vmatprep.subr.bf16.mxu0 %v5521_v20  ;;  %4430 = vmatprep.subr.bf16.mxu1 %v6348_v11 }
 0x356   :  { %v1256_v4 = vpop.f32.mrb[0].mxu1  ;;  %v1297_v8 = vpop.f32.mrb[32].mxu0 }
 0x357   :  { %v4634_v48 = vadd.f32 %v1256_v4, %v5624_v47  ;;  %v1258_v60 = vpop.f32.mrb[1].mxu1  ;;  %v4408_v3 = vpop.f32.mrb[33].mxu0  ;;  %v1317_v51 = vadd.f32 %v5653_v17, %v1297_v8  ;;  %v1330_v8 = vadd.f32 %v5627_v49, %v5633_v62 }
 0x358   :  { %v1260_v5 = vpop.f32.mrb[2].mxu1  ;;  %v1300_v9 = vpop.f32.mrb[34].mxu0  ;;  %v4635_v2 = vadd.f32 %v1258_v60, %v5627_v49 }
 0x359   :  { %v4053_v10 = vmul.f32 -1.442695, %v4634_v48  ;;  %v1261_v58 = vpop.f32.mrb[3].mxu1  ;;  %v4409_v14 = vpop.f32.mrb[35].mxu0 }
 0x35a   :  { %v4054_v18 = vmul.f32 -1.442695, %v4635_v2 }
 0x35b   :  { %5010 = vpow2.f32 %v4053_v10 }
 0x35c   :  { %5012 = vpow2.f32 %v4054_v18 }
 0x365   :  { %v5011_v19 = vpop.eup %5010 }
 0x366   :  { %v1307_v42 = vadd.f32 1.0, %v5011_v19  ;;  %v5013_v50 = vpop.eup %5012 }
 0x367   :  { %v1314_v45 = vadd.f32 1.0, %v5013_v50 }
 0x368   :  { %5014 = vrcp.f32 %v1307_v42 }
 0x369   :  { %5016 = vrcp.f32 %v1314_v45 }
 0x372   :  { %v5015_v52 = vpop.eup %5014 }
 0x373   :  { %v1318_v59 = vmul.f32 %v5015_v52, %v1317_v51  ;;  %v5017_v48 = vpop.eup %5016 }
 0x374   :  { %v1321_v60 = vsub.f32 1.0, %v5017_v48  ;;  %v1323_v9 = vmul.f32 %v5017_v48, %v5714_v55 }
 0x375   :  { %v1319_v4 = vadd.f32 %v1318_v59, %v1220_v53 }
 0x377   :  { %5018 = vtanh.f32 %v1319_v4 }
 0x381   :  { %v5019_v3 = vpop.eup %5018 }
 0x382   :  { %v1322_v5 = vmul.f32 %v5019_v3, %v1321_v60 }
 0x384   :  { %v5759_v10 = vadd.f32 %v1323_v9, %v1322_v5  ;;  %v1331_v9 = vadd.f32 %v5644_v12, %v5635_v0 }
 0x386   :  { %v1332_v58 = vpack.c.bf16 %v5759_v10, %v5759_v10 }
 0x388   :  { %1366 = vmatmul.mubr.bf16.vlgmr.msra.gmra.mrb[20].mxu1 %v1332_v58  ;;  %4427 = vmatmul.mubr.bf16.vlgmr.msra.gmra.mrb[36].mxu0 %v1332_v58 }
 0x389   :  { %1445 = vmatpush1.bf16.msra.mxu0 %v5524_v21  ;;  %4431 = vmatpush3.bf16.msra.mxu1 %v5526_v22 }
 0x38a   :  { %1446 = vmatprep.subr.bf16.mxu0 %v5537_v7  ;;  %4432 = vmatprep.subr.bf16.mxu1 %v6348_v11 }
 0x38b   :  { %1476 = vmatprep.mubr.bf16.mxu0 %v6346_v1  ;;  %4446 = vmatprep.mubr.msk.bf16.mxu1 %vm5311_vm3, %v6348_v11 }
 0x38d   :  { %1447 = vmatpush1.bf16.msra.mxu0 %v5540_v23  ;;  %4433 = vmatpush3.bf16.msra.mxu1 %v5542_v24 }
 0x38e   :  { %1448 = vmatprep.subr.bf16.mxu0 %v5550_v16  ;;  %4434 = vmatprep.subr.bf16.mxu1 %v6348_v11 }
 0x391   :  { %1449 = vmatpush1.bf16.msra.mxu0 %v5553_v25  ;;  %4435 = vmatpush3.bf16.msra.mxu1 %v5555_v26 }
 0x392   :  { %1450 = vmatprep.subr.bf16.mxu0 %v5560_v27  ;;  %4436 = vmatprep.subr.bf16.mxu1 %v6348_v11 }
 0x395   :  { %1451 = vmatpush1.bf16.msra.mxu0 %v5563_v28  ;;  %4437 = vmatpush3.bf16.msra.mxu1 %v5565_v29 }
 0x396   :  { %1452 = vmatprep.subr.bf16.mxu0 %v5570_v30  ;;  %4438 = vmatprep.subr.bf16.mxu1 %v6348_v11 }
 0x399   :  { %1453 = vmatpush1.bf16.msra.mxu0 %v5573_v31  ;;  %4439 = vmatpush3.bf16.msra.mxu1 %v5575_v32 }
 0x39a   :  { %1454 = vmatprep.subr.bf16.mxu0 %v5578_v33  ;;  %4440 = vmatprep.subr.bf16.mxu1 %v6348_v11 }
 0x39d   :  { %1455 = vmatpush1.bf16.msra.mxu0 %v5582_v34  ;;  %4441 = vmatpush3.bf16.msra.mxu1 %v5584_v35 }
 0x39e   :  { %1456 = vmatprep.subr.bf16.mxu0 %v5588_v36  ;;  %4442 = vmatprep.subr.bf16.mxu1 %v6348_v11 }
 0x3a1   :  { %1457 = vmatpush1.bf16.msra.mxu0 %v5592_v37  ;;  %4443 = vmatpush3.bf16.msra.mxu1 %v5594_v38 }
 0x3a2   :  { %1458 = vmatprep.subr.bf16.mxu0 %v5598_v39  ;;  %4444 = vmatprep.subr.bf16.mxu1 %v6348_v11 }
 0x3a5   :  { %1459 = vmatpush1.bf16.msra.mxu0 %v5602_v40  ;;  %4445 = vmatpush3.bf16.msra.mxu1 %v5604_v41 }
 0x3a6   :  { %1555 = vmatprep.subr.bf16.mxu1 %v5521_v20  ;;  %4450 = vmatprep.subr.bf16.mxu0 %v6348_v11 }
 0x45b   :  { %v1367_v14 = vpop.f32.mrb[20].mxu1  ;;  %v1408_v2 = vpop.f32.mrb[36].mxu0 }
 0x45c   :  { %v1414_v18 = vadd.f32 %v1367_v14, %v1329_v13  ;;  %v1369_v19 = vpop.f32.mrb[21].mxu1  ;;  %v4428_v42 = vpop.f32.mrb[37].mxu0  ;;  %v1428_v62 = vadd.f32 %v5653_v17, %v1408_v2 }
 0x45d   :  { %v1421_v50 = vadd.f32 %v1369_v19, %v1330_v8  ;;  %v1371_v45 = vpop.f32.mrb[22].mxu1  ;;  %v1411_v51 = vpop.f32.mrb[38].mxu0 }
 0x45e   :  { %v4055_v52 = vmul.f32 -1.442695, %v1414_v18  ;;  %v1372_v53 = vpop.f32.mrb[23].mxu1  ;;  %v4429_v59 = vpop.f32.mrb[39].mxu0 }
 0x45f   :  { %v4056_v4 = vmul.f32 -1.442695, %v1421_v50 }
 0x460   :  { %5020 = vpow2.f32 %v4055_v52 }
 0x461   :  { %5022 = vpow2.f32 %v4056_v4 }
 0x46a   :  { %v5021_v48 = vpop.eup %5020 }
 0x46b   :  { %v1418_v60 = vadd.f32 1.0, %v5021_v48  ;;  %v5023_v15 = vpop.eup %5022 }
 0x46c   :  { %v1425_v3 = vadd.f32 1.0, %v5023_v15 }
 0x46d   :  { %5024 = vrcp.f32 %v1418_v60 }
 0x46e   :  { %5026 = vrcp.f32 %v1425_v3 }
 0x477   :  { %v5025_v5 = vpop.eup %5024 }
 0x478   :  { %v1429_v58 = vmul.f32 %v5025_v5, %v1428_v62  ;;  %v5027_v8 = vpop.eup %5026 }
 0x479   :  { %v1432_v14 = vsub.f32 1.0, %v5027_v8  ;;  %v1434_v42 = vmul.f32 %v5027_v8, %v5759_v10 }
 0x47a   :  { %v1430_v13 = vadd.f32 %v1429_v58, %v1331_v9 }
 0x47c   :  { %5028 = vtanh.f32 %v1430_v13 }
 0x486   :  { %v5029_v18 = vpop.eup %5028 }
 0x487   :  { %v1433_v19 = vmul.f32 %v5029_v18, %v1432_v14  ;;  %v1442_v14 = vadd.f32 %v5644_v12, %v5696_v56 }
 0x489   :  { %v5806_v50 = vadd.f32 %v1434_v42, %v1433_v19 }
 0x48b   :  { %v1443_v45 = vpack.c.bf16 %v5806_v50, %v5806_v50 }
 0x48d   :  { %1477 = vmatmul.mubr.bf16.vlgmr.msra.gmra.mrb[16].mxu0 %v1443_v45  ;;  %4447 = vmatmul.mubr.bf16.vlgmr.msra.gmra.mrb[24].mxu1 %v1443_v45 }
 0x48e   :  { %1556 = vmatpush1.bf16.msra.mxu1 %v5524_v21  ;;  %4451 = vmatpush3.bf16.msra.mxu0 %v5526_v22 }
 0x48f   :  { %1557 = vmatprep.subr.bf16.mxu1 %v5537_v7  ;;  %4452 = vmatprep.subr.bf16.mxu0 %v6348_v11 }
 0x490   :  { %1587 = vmatprep.mubr.bf16.mxu1 %v6346_v1  ;;  %4466 = vmatprep.mubr.msk.bf16.mxu0 %vm5311_vm3, %v6348_v11 }
 0x492   :  { %1558 = vmatpush1.bf16.msra.mxu1 %v5540_v23  ;;  %4453 = vmatpush3.bf16.msra.mxu0 %v5542_v24 }
 0x493   :  { %1559 = vmatprep.subr.bf16.mxu1 %v5550_v16  ;;  %4454 = vmatprep.subr.bf16.mxu0 %v6348_v11 }
 0x496   :  { %1560 = vmatpush1.bf16.msra.mxu1 %v5553_v25  ;;  %4455 = vmatpush3.bf16.msra.mxu0 %v5555_v26 }
 0x497   :  { %1561 = vmatprep.subr.bf16.mxu1 %v5560_v27  ;;  %4456 = vmatprep.subr.bf16.mxu0 %v6348_v11 }
 0x49a   :  { %1562 = vmatpush1.bf16.msra.mxu1 %v5563_v28  ;;  %4457 = vmatpush3.bf16.msra.mxu0 %v5565_v29 }
 0x49b   :  { %1563 = vmatprep.subr.bf16.mxu1 %v5570_v30  ;;  %4458 = vmatprep.subr.bf16.mxu0 %v6348_v11 }
 0x49e   :  { %1564 = vmatpush1.bf16.msra.mxu1 %v5573_v31  ;;  %4459 = vmatpush3.bf16.msra.mxu0 %v5575_v32 }
 0x49f   :  { %1565 = vmatprep.subr.bf16.mxu1 %v5578_v33  ;;  %4460 = vmatprep.subr.bf16.mxu0 %v6348_v11 }
 0x4a2   :  { %1566 = vmatpush1.bf16.msra.mxu1 %v5582_v34  ;;  %4461 = vmatpush3.bf16.msra.mxu0 %v5584_v35 }
 0x4a3   :  { %1567 = vmatprep.subr.bf16.mxu1 %v5588_v36  ;;  %4462 = vmatprep.subr.bf16.mxu0 %v6348_v11 }
 0x4a6   :  { %1568 = vmatpush1.bf16.msra.mxu1 %v5592_v37  ;;  %4463 = vmatpush3.bf16.msra.mxu0 %v5594_v38 }
 0x4a7   :  { %1569 = vmatprep.subr.bf16.mxu1 %v5598_v39  ;;  %4464 = vmatprep.subr.bf16.mxu0 %v6348_v11 }
 0x4aa   :  { %1570 = vmatpush1.bf16.msra.mxu1 %v5602_v40  ;;  %4465 = vmatpush3.bf16.msra.mxu0 %v5604_v41 }
 0x4ab   :  { %1666 = vmatprep.subr.bf16.mxu1 %v5521_v20  ;;  %4470 = vmatprep.subr.bf16.mxu0 %v6348_v11 }
 0x560   :  { %v1478_v0 = vpop.f32.mrb[16].mxu0  ;;  %v1519_v2 = vpop.f32.mrb[24].mxu1 }
 0x561   :  { %v4636_v51 = vadd.f32 %v1478_v0, %v5624_v47  ;;  %v1480_v52 = vpop.f32.mrb[17].mxu0  ;;  %v4448_v53 = vpop.f32.mrb[25].mxu1  ;;  %v1539_v13 = vadd.f32 %v5653_v17, %v1519_v2 }
 0x562   :  { %v1482_v59 = vpop.f32.mrb[18].mxu0  ;;  %v1522_v4 = vpop.f32.mrb[26].mxu1  ;;  %v4637_v3 = vadd.f32 %v1480_v52, %v5627_v49 }
 0x563   :  { %v4057_v48 = vmul.f32 -1.442695, %v4636_v51  ;;  %v1483_v60 = vpop.f32.mrb[19].mxu0  ;;  %v4449_v15 = vpop.f32.mrb[27].mxu1 }
 0x564   :  { %v4058_v62 = vmul.f32 -1.442695, %v4637_v3  ;;  %v4758_v3 = vld [vmem:[#allocation12] ss:$12 sps:$4 sm:$0xff]  }
 0x565   :  { %5030 = vpow2.f32 %v4057_v48 }
 0x566   :  { %5032 = vpow2.f32 %v4058_v62  ;;  %v4764_v62 = vld [vmem:[#allocation12 + $0x1c] ss:$12 sps:$4 sm:$0xff]  }
 0x56f   :  { %v5031_v5 = vpop.eup %5030 }
 0x570   :  { %v1529_v20 = vadd.f32 1.0, %v5031_v5  ;;  %v5033_v9 = vpop.eup %5032  ;;  %v4765_v5 = vld [vmem:[#allocation12 + $0x20] ss:$12 sps:$4 sm:$0xff]  }
 0x571   :  { %v1536_v58 = vadd.f32 1.0, %v5033_v9  ;;  %v4768_v9 = vld [vmem:[#allocation12 + $0x34] ss:$12 sps:$4 sm:$0xff]  }
 0x572   :  { %5034 = vrcp.f32 %v1529_v20  ;;  %v4762_v20 = vld [vmem:[#allocation12 + $0x18] ss:$12 sps:$4 sm:$0xff]  }
 0x573   :  { %5036 = vrcp.f32 %v1536_v58  ;;  %v4769_v58 = vld [vmem:[#allocation12 + $0x38] ss:$12 sps:$4 sm:$0xff]  }
 0x57c   :  { %v5035_v8 = vpop.eup %5034 }
 0x57d   :  { %v1540_v18 = vmul.f32 %v5035_v8, %v1539_v13  ;;  %v5037_v42 = vpop.eup %5036  ;;  %v4766_v13 = vld [vmem:[#allocation12 + $0x30] ss:$12 sps:$4 sm:$0xff]   ;;  %v4772_v8 = vld [vmem:[#allocation12 + $0x4c] ss:$12 sps:$4 sm:$0xff]  }
 0x57e   :  { %v1543_v45 = vsub.f32 1.0, %v5037_v42  ;;  %v1545_v52 = vmul.f32 %v5037_v42, %v5806_v50  ;;  %v4780_v42 = vld [vmem:[#allocation12 + $0x7c] ss:$12 sps:$4 sm:$0xff]  }
 0x57f   :  { %v1541_v19 = vadd.f32 %v1540_v18, %v1442_v14  ;;  %v4773_v14 = vld [vmem:[#allocation12 + $0x50] ss:$12 sps:$4 sm:$0xff]   ;;  %v4777_v18 = vld [vmem:[#allocation12 + $0x68] ss:$12 sps:$4 sm:$0xff]  }
 0x581   :  { %5038 = vtanh.f32 %v1541_v19  ;;  %v4774_v19 = vld [vmem:[#allocation12 + $0x60] ss:$12 sps:$4 sm:$0xff]  }
 0x58b   :  { %v5039_v0 = vpop.eup %5038 }
 0x58c   :  { %v1544_v51 = vmul.f32 %v5039_v0, %v1543_v45  ;;  %v4781_v45 = vld [vmem:[#allocation12 + $0x80] ss:$12 sps:$4 sm:$0xff]   ;;  %v4778_v0 = vld [vmem:[#allocation12 + $0x78] ss:$12 sps:$4 sm:$0xff]  }
 0x58e   :  { %v5851_v53 = vadd.f32 %v1545_v52, %v1544_v51  ;;  %v4784_v51 = vld [vmem:[#allocation12 + $0x94] ss:$12 sps:$4 sm:$0xff]   ;;  %v4785_v52 = vld [vmem:[#allocation12 + $0x98] ss:$12 sps:$4 sm:$0xff]  }
 0x590   :  { %v1554_v59 = vpack.c.bf16 %v5851_v53, %v5851_v53 }
 0x592   :  { %1588 = vmatmul.mubr.bf16.vlgmr.msra.gmra.mrb[28].mxu1 %v1554_v59  ;;  %4467 = vmatmul.mubr.bf16.vlgmr.msra.gmra.mrb[40].mxu0 %v1554_v59  ;;  %v4782_v59 = vld [vmem:[#allocation12 + $0x90] ss:$12 sps:$4 sm:$0xff]  }
 0x593   :  { %1667 = vmatpush1.bf16.msra.mxu1 %v5524_v21  ;;  %4471 = vmatpush3.bf16.msra.mxu0 %v5526_v22  ;;  %v4760_v21 = vld [vmem:[#allocation12 + $0x4] ss:$12 sps:$4 sm:$0xff]   ;;  %v4761_v22 = vld [vmem:[#allocation12 + $0x8] ss:$12 sps:$4 sm:$0xff]  }
 0x594   :  { %1668 = vmatprep.subr.bf16.mxu1 %v5537_v7  ;;  %4472 = vmatprep.subr.bf16.mxu0 %v6348_v11  ;;  %v1551_v7 = vadd.f32 %v5624_v47, %v5698_v57 }
 0x595   :  { %1698 = vmatprep.mubr.bf16.mxu1 %v6346_v1  ;;  %4486 = vmatprep.mubr.msk.bf16.mxu0 %vm5311_vm3, %v6348_v11 }
 0x597   :  { %1669 = vmatpush1.bf16.msra.mxu1 %v5540_v23  ;;  %4473 = vmatpush3.bf16.msra.mxu0 %v5542_v24  ;;  %v1552_v23 = vadd.f32 %v5627_v49, %v5700_v61 }
 0x598   :  { %1670 = vmatprep.subr.bf16.mxu1 %v5550_v16  ;;  %4474 = vmatprep.subr.bf16.mxu0 %v6348_v11 }
 0x59b   :  { %1671 = vmatpush1.bf16.msra.mxu1 %v5553_v25  ;;  %4475 = vmatpush3.bf16.msra.mxu0 %v5555_v26 }
 0x59c   :  { %1672 = vmatprep.subr.bf16.mxu1 %v5560_v27  ;;  %4476 = vmatprep.subr.bf16.mxu0 %v6348_v11 }
 0x59f   :  { %1673 = vmatpush1.bf16.msra.mxu1 %v5563_v28  ;;  %4477 = vmatpush3.bf16.msra.mxu0 %v5565_v29 }
 0x5a0   :  { %1674 = vmatprep.subr.bf16.mxu1 %v5570_v30  ;;  %4478 = vmatprep.subr.bf16.mxu0 %v6348_v11 }
 0x5a3   :  { %1675 = vmatpush1.bf16.msra.mxu1 %v5573_v31  ;;  %4479 = vmatpush3.bf16.msra.mxu0 %v5575_v32 }
 0x5a4   :  { %1676 = vmatprep.subr.bf16.mxu1 %v5578_v33  ;;  %4480 = vmatprep.subr.bf16.mxu0 %v6348_v11 }
 0x5a7   :  { %1677 = vmatpush1.bf16.msra.mxu1 %v5582_v34  ;;  %4481 = vmatpush3.bf16.msra.mxu0 %v5584_v35 }
 0x5a8   :  { %1678 = vmatprep.subr.bf16.mxu1 %v5588_v36  ;;  %4482 = vmatprep.subr.bf16.mxu0 %v6348_v11 }
 0x5ab   :  { %1679 = vmatpush1.bf16.msra.mxu1 %v5592_v37  ;;  %4483 = vmatpush3.bf16.msra.mxu0 %v5594_v38 }
 0x5ac   :  { %1680 = vmatprep.subr.bf16.mxu1 %v5598_v39  ;;  %4484 = vmatprep.subr.bf16.mxu0 %v6348_v11 }
 0x5af   :  { %1681 = vmatpush1.bf16.msra.mxu1 %v5602_v40  ;;  %4485 = vmatpush3.bf16.msra.mxu0 %v5604_v41  ;;  %v1553_v41 = vadd.f32 %v5644_v12, %v5702_v63  ;;  %v1777_v63 = vpack.c.bf16 %v5714_v55, %v5657_v54  ;;  %v4770_v54 = vld [vmem:[#allocation12 + $0x48] ss:$12 sps:$4 sm:$0xff]   ;;  %v4776_v55 = vld [vmem:[#allocation12 + $0x64] ss:$12 sps:$4 sm:$0xff]  }
 0x5b0   :  { %1958 = vmatprep.subr.bf16.mxu1 %v4760_v21  ;;  %4490 = vmatprep.subr.bf16.mxu0 %v4761_v22  ;;  %v4788_v21 = vld [vmem:[#allocation12 + $0xac] ss:$12 sps:$4 sm:$0xff]  }
 0x665   :  { %v1589_v24 = vpop.f32.mrb[28].mxu1  ;;  %v1630_v16 = vpop.f32.mrb[40].mxu0 }
 0x666   :  { %v1636_v25 = vadd.f32 %v1589_v24, %v1551_v7  ;;  %v1591_v26 = vpop.f32.mrb[29].mxu1  ;;  %v4468_v27 = vpop.f32.mrb[41].mxu0  ;;  %v1650_v39 = vadd.f32 %v5653_v17, %v1630_v16  ;;  %v4786_v7 = vld [vmem:[#allocation12 + $0xa8] ss:$12 sps:$4 sm:$0xff]   ;;  %v4792_v16 = vld [vmem:[#allocation15 + $0x4] ss:$8 sps:$4 sm:$0xff]  }
 0x667   :  { %v1643_v28 = vadd.f32 %v1591_v26, %v1552_v23  ;;  %v1593_v29 = vpop.f32.mrb[30].mxu1  ;;  %v1633_v30 = vpop.f32.mrb[42].mxu0  ;;  %v1778_v23 = vpack.c.bf16 %v5806_v50, %v5759_v10  ;;  %v5910_v26 = vld [vmem:[#allocation14 + $0x4] ss:$12 sps:$4 sm:$0xff]   ;;  %v5912_v10 = vld [vmem:[#allocation14] ss:$12 sps:$4 sm:$0xff]  }
 0x668   :  { %v4059_v31 = vmul.f32 -1.442695, %v1636_v25  ;;  %v1594_v32 = vpop.f32.mrb[31].mxu1  ;;  %v4469_v33 = vpop.f32.mrb[43].mxu0  ;;  %v4790_v25 = vld [vmem:[#allocation15] ss:$8 sps:$4 sm:$0xff]  }
 0x669   :  { %v4060_v34 = vmul.f32 -1.442695, %v1643_v28  ;;  %v4798_v50 = vld [vmem:[#allocation15 + $0x14] ss:$8 sps:$4 sm:$0xff]   ;;  %v5918_v28 = vld [vmem:[#allocation14 + $0x18] ss:$12 sps:$4 sm:$0xff]  }
 0x66a   :  { %5040 = vpow2.f32 %v4059_v31  ;;  %v5916_v27 = vld [vmem:[#allocation14 + $0x1c] ss:$12 sps:$4 sm:$0xff]   ;;  %v4804_v29 = vld [vmem:[#allocation15 + $0x24] ss:$8 sps:$4 sm:$0xff]   ;;  %v5922_v31 = vld [vmem:[#allocation14 + $0x34] ss:$12 sps:$4 sm:$0xff]  }
 0x66b   :  { %5042 = vpow2.f32 %v4060_v34  ;;  %v4802_v30 = vld [vmem:[#allocation15 + $0x20] ss:$8 sps:$4 sm:$0xff]   ;;  %v5924_v32 = vld [vmem:[#allocation14 + $0x30] ss:$12 sps:$4 sm:$0xff]  }
 0x66c   :  { %v4810_v33 = vld [vmem:[#allocation15 + $0x34] ss:$8 sps:$4 sm:$0xff]   ;;  %v4808_v34 = vld [vmem:[#allocation15 + $0x30] ss:$8 sps:$4 sm:$0xff]  }
 0x674   :  { %v5041_v35 = vpop.eup %5040 }
 0x675   :  { %v1640_v36 = vadd.f32 1.0, %v5041_v35  ;;  %v5043_v37 = vpop.eup %5042  ;;  %v5928_v35 = vld [vmem:[#allocation14 + $0x4c] ss:$12 sps:$4 sm:$0xff]  }
 0x676   :  { %v1647_v38 = vadd.f32 1.0, %v5043_v37  ;;  %v4816_v37 = vld [vmem:[#allocation15 + $0x44] ss:$8 sps:$4 sm:$0xff]  }
 0x677   :  { %5044 = vrcp.f32 %v1640_v36  ;;  %v5930_v36 = vld [vmem:[#allocation14 + $0x48] ss:$12 sps:$4 sm:$0xff]  }
 0x678   :  { %5046 = vrcp.f32 %v1647_v38  ;;  %v4814_v38 = vld [vmem:[#allocation15 + $0x40] ss:$8 sps:$4 sm:$0xff]  }
 0x681   :  { %v5045_v40 = vpop.eup %5044 }
 0x682   :  { %v1651_v56 = vmul.f32 %v5045_v40, %v1650_v39  ;;  %v5047_v61 = vpop.eup %5046  ;;  %v5934_v39 = vld [vmem:[#allocation14 + $0x64] ss:$12 sps:$4 sm:$0xff]   ;;  %v5936_v40 = vld [vmem:[#allocation14 + $0x60] ss:$12 sps:$4 sm:$0xff]  }
 0x683   :  { %v1654_v2 = vsub.f32 1.0, %v5047_v61  ;;  %v1656_v60 = vmul.f32 %v5047_v61, %v5851_v53  ;;  %v5942_v61 = vld [vmem:[#allocation14 + $0x78] ss:$12 sps:$4 sm:$0xff]  }
 0x684   :  { %v1652_v57 = vadd.f32 %v1651_v56, %v1553_v41  ;;  %v4820_v41 = vld [vmem:[#allocation15 + $0x50] ss:$8 sps:$4 sm:$0xff]   ;;  %v4822_v56 = vld [vmem:[#allocation15 + $0x54] ss:$8 sps:$4 sm:$0xff]  }
 0x686   :  { %5048 = vtanh.f32 %v1652_v57  ;;  %v5940_v57 = vld [vmem:[#allocation14 + $0x7c] ss:$12 sps:$4 sm:$0xff]  }
 0x690   :  { %v5049_v4 = vpop.eup %5048 }
 0x691   :  { %v1655_v48 = vmul.f32 %v5049_v4, %v1654_v2  ;;  %v4828_v2 = vld [vmem:[#allocation15 + $0x64] ss:$8 sps:$4 sm:$0xff]   ;;  %v5945_v4 = vld [vmem:[#allocation14 + $0x94] ss:$12 sps:$4 sm:$0xff]  }
 0x693   :  { %v5896_v15 = vadd.f32 %v1656_v60, %v1655_v48  ;;  %v4826_v48 = vld [vmem:[#allocation15 + $0x60] ss:$8 sps:$4 sm:$0xff]   ;;  %v5948_v60 = vld [vmem:[#allocation14 + $0x90] ss:$12 sps:$4 sm:$0xff]  }
 0x695   :  { %v1665_v17 = vpack.c.bf16 %v5896_v15, %v5896_v15  ;;  %v1779_v24 = vpack.c.bf16 %v5896_v15, %v5851_v53  ;;  %v4796_v53 = vld [vmem:[#allocation15 + $0x10] ss:$8 sps:$4 sm:$0xff]  }
 0x697   :  { %1699 = vmatmul.mubr.bf16.vlgmr.msra.gmra.mrb[12].mxu1 %v1665_v17  ;;  %4487 = vmatmul.mubr.bf16.vlgmr.msra.gmra.mrb[44].mxu0 %v1665_v17  ;;  %v5951_v17 = vld [vmem:[#allocation14 + $0xac] ss:$12 sps:$4 sm:$0xff]  }
 0x698   :  { %1959 = vmatpush1.bf16.msra.mxu1 %v4758_v3  ;;  %4491 = vmatpush3.bf16.msra.mxu0 %v4761_v22  ;;  %v4789_v22 = vld [vmem:[#allocation12 + $0xb0] ss:$12 sps:$4 sm:$0xff]  }
 0x699   :  { %4506 = vmatprep.mubr.bf16.mxu0 %v1777_v63  ;;  %1960 = vmatprep.subr.bf16.mxu1 %v4764_v62  ;;  %v4834_v3 = vld [vmem:[#allocation15 + $0x74] ss:$8 sps:$4 sm:$0xff]   ;;  %v4832_v62 = vld [vmem:[#allocation15 + $0x70] ss:$8 sps:$4 sm:$0xff]  }
 0x69a   :  { %4492 = vmatprep.subr.bf16.mxu0 %v4765_v5  ;;  %1990 = vmatprep.mubr.bf16.mxu1 %v6346_v1 }
 0x69c   :  { %1961 = vmatpush1.bf16.msra.mxu1 %v4762_v20  ;;  %4493 = vmatpush3.bf16.msra.mxu0 %v4765_v5  ;;  %v5954_v5 = vld [vmem:[#allocation14 + $0xa8] ss:$12 sps:$4 sm:$0xff]  }
 0x69d   :  { %1962 = vmatprep.subr.bf16.mxu1 %v4768_v9  ;;  %4494 = vmatprep.subr.bf16.mxu0 %v4769_v58 }
 0x6a0   :  { %1963 = vmatpush1.bf16.msra.mxu1 %v4766_v13  ;;  %4495 = vmatpush3.bf16.msra.mxu0 %v4769_v58 }
 0x6a1   :  { %1964 = vmatprep.subr.bf16.mxu1 %v4772_v8  ;;  %4496 = vmatprep.subr.bf16.mxu0 %v4773_v14 }
 0x6a4   :  { %1965 = vmatpush1.bf16.msra.mxu1 %v4770_v54  ;;  %4497 = vmatpush3.bf16.msra.mxu0 %v4773_v14 }
 0x6a5   :  { %1966 = vmatprep.subr.bf16.mxu1 %v4776_v55  ;;  %4498 = vmatprep.subr.bf16.mxu0 %v4777_v18 }
 0x6a8   :  { %1967 = vmatpush1.bf16.msra.mxu1 %v4774_v19  ;;  %4499 = vmatpush3.bf16.msra.mxu0 %v4777_v18 }
 0x6a9   :  { %1968 = vmatprep.subr.bf16.mxu1 %v4780_v42  ;;  %4500 = vmatprep.subr.bf16.mxu0 %v4781_v45 }
 0x6ac   :  { %1969 = vmatpush1.bf16.msra.mxu1 %v4778_v0  ;;  %4501 = vmatpush3.bf16.msra.mxu0 %v4781_v45 }
 0x6ad   :  { %1970 = vmatprep.subr.bf16.mxu1 %v4784_v51  ;;  %4502 = vmatprep.subr.bf16.mxu0 %v4785_v52 }
 0x6b0   :  { %1971 = vmatpush1.bf16.msra.mxu1 %v4782_v59  ;;  %4503 = vmatpush3.bf16.msra.mxu0 %v4785_v52  ;;  %v5130_v59 = vld [vmem:[%s6335_s4] ss:$0 sm:$0xff] }
 0x6b1   :  { %1972 = vmatprep.subr.bf16.mxu1 %v4788_v21  ;;  %4504 = vmatprep.subr.bf16.mxu0 %v4789_v22 }
 0x6b4   :  { %1973 = vmatpush1.bf16.msra.mxu1 %v4786_v7  ;;  %4505 = vmatpush3.bf16.msra.mxu0 %v4789_v22 }
 0x6b5   :  { %2237 = vmatprep.subr.bf16.mxu1 %v4792_v16  ;;  %2411 = vmatprep.subr.bf16.mxu0 %v5910_v26 }
 0x6b7   :  { %1991 = vmatmul.mubr.bf16.vlgmr.msra.gmra.mrb[32].mxu1 %v1777_v63  ;;  %4507 = vmatmul.mubr.bf16.vlgmr.msra.gmra.mrb[48].mxu0 %v1778_v23 }
 0x6b8   :  { %4510 = vmatprep.mubr.bf16.mxu0 %v1779_v24  ;;  %2000 = vmatprep.mubr.bf16.mxu1 %v6346_v1 }
 0x6b9   :  { %2238 = vmatpush1.bf16.msra.mxu1 %v4790_v25  ;;  %2412 = vmatpush1.bf16.msra.mxu0 %v5912_v10 }
 0x6ba   :  { %2239 = vmatprep.subr.bf16.mxu1 %v4798_v50  ;;  %2413 = vmatprep.subr.bf16.mxu0 %v5916_v27 }
 0x6bd   :  { %2240 = vmatpush1.bf16.msra.mxu1 %v4796_v53  ;;  %2414 = vmatpush1.bf16.msra.mxu0 %v5918_v28 }
 0x6be   :  { %2241 = vmatprep.subr.bf16.mxu1 %v4804_v29  ;;  %2415 = vmatprep.subr.bf16.mxu0 %v5922_v31 }
 0x6bf   :  { %2001 = vmatmul.mubr.bf16.gmra.mrb[36].mxu1 %v1778_v23 }
 0x6c0   :  { %2010 = vmatprep.mubr.bf16.mxu1 %v6346_v1 }
 0x6c1   :  { %2242 = vmatpush1.bf16.msra.mxu1 %v4802_v30  ;;  %2416 = vmatpush1.bf16.msra.mxu0 %v5924_v32 }
 0x6c2   :  { %2243 = vmatprep.subr.bf16.mxu1 %v4810_v33  ;;  %2417 = vmatprep.subr.bf16.mxu0 %v5928_v35 }
 0x6c5   :  { %2244 = vmatpush1.bf16.msra.mxu1 %v4808_v34  ;;  %2418 = vmatpush1.bf16.msra.mxu0 %v5930_v36 }
 0x6c6   :  { %2245 = vmatprep.subr.bf16.mxu1 %v4816_v37  ;;  %2419 = vmatprep.subr.bf16.mxu0 %v5934_v39 }
 0x6c7   :  { %2011 = vmatmul.mubr.bf16.gmra.mrb[40].mxu1 %v1779_v24 }
 0x6c8   :  { %2020 = vmatprep.mubr.bf16.mxu1 %v6346_v1 }
 0x6c9   :  { %2246 = vmatpush1.bf16.msra.mxu1 %v4814_v38  ;;  %2420 = vmatpush1.bf16.msra.mxu0 %v5936_v40 }
 0x6ca   :  { %2247 = vmatprep.subr.bf16.mxu1 %v4822_v56  ;;  %2421 = vmatprep.subr.bf16.mxu0 %v5940_v57 }
 0x6cd   :  { %2248 = vmatpush1.bf16.msra.mxu1 %v4820_v41  ;;  %2422 = vmatpush1.bf16.msra.mxu0 %v5942_v61 }
 0x6ce   :  { %2249 = vmatprep.subr.bf16.mxu1 %v4828_v2  ;;  %2423 = vmatprep.subr.bf16.mxu0 %v5945_v4 }
 0x6d1   :  { %2250 = vmatpush1.bf16.msra.mxu1 %v4826_v48  ;;  %2424 = vmatpush1.bf16.msra.mxu0 %v5948_v60 }
 0x6d2   :  { %2251 = vmatprep.subr.bf16.mxu1 %v4834_v3  ;;  %2425 = vmatprep.subr.bf16.mxu0 %v5951_v17 }
 0x6d5   :  { %2252 = vmatpush1.bf16.msra.mxu1 %v4832_v62  ;;  %2426 = vmatpush1.bf16.msra.mxu0 %v5954_v5 }
 0x6d6   :  { %4514 = vmatprep.subr.bf16.mxu1 %v6348_v11 }
 0x76a   :  { %v1700_v63 = vpop.f32.mrb[12].mxu1  ;;  %v1741_v20 = vpop.f32.mrb[44].mxu0 }
 0x76b   :  { %v4638_v9 = vadd.f32 %v1700_v63, %v5624_v47  ;;  %v1702_v58 = vpop.f32.mrb[13].mxu1  ;;  %v4488_v13 = vpop.f32.mrb[45].mxu0  ;;  %v1813_v47 = vld [vmem:[%s6337_s6] sm:$0x7]  ;;  %v1761_v21 = vadd.f32 %v5130_v59, %v1741_v20 }
 0x76c   :  { %v1704_v8 = vpop.f32.mrb[14].mxu1  ;;  %v1744_v14 = vpop.f32.mrb[46].mxu0  ;;  %v4639_v19 = vadd.f32 %v1702_v58, %v5627_v49  ;;  %v1664_v49 = vadd.f32 %v5644_v12, %v5704_v6  ;;  %v5970_v23 = vrot.slane %v1813_v47, %v5615_v44  ;;  %v5975_v50 = vrot.slane %v1813_v47, %v5621_v46 }
 0x76d   :  { %v4061_v54 = vmul.f32 -1.442695, %v4638_v9  ;;  %v1705_v55 = vpop.f32.mrb[15].mxu1  ;;  %v4489_v18 = vpop.f32.mrb[47].mxu0 }
 0x76e   :  { %v4062_v42 = vmul.f32 -1.442695, %v4639_v19 }
 0x76f   :  { %5050 = vpow2.f32 %v4061_v54 }
 0x770   :  { %5052 = vpow2.f32 %v4062_v42 }
 0x779   :  { %v5051_v45 = vpop.eup %5050 }
 0x77a   :  { %v1751_v0 = vadd.f32 1.0, %v5051_v45  ;;  %v5053_v51 = vpop.eup %5052  ;;  %v6356_v45 = vsub.s32 2, %v5612_v43 }
 0x77b   :  { %v1758_v52 = vadd.f32 1.0, %v5053_v51 }
 0x77c   :  { %5054 = vrcp.f32 %v1751_v0  ;;  %v6008_v0 = vrot.slane %v1813_v47, %v6356_v45  ;;  %v6019_v47 = vld [vmem:[#allocation14 + $0x8] ss:$12 sps:$4 sm:$0xff]   ;;  %v4860_v45 = vld [vmem:[#allocation15 + $0xc4] ss:$8 sps:$4 sm:$0xff]  }
 0x77d   :  { %5056 = vrcp.f32 %v1758_v52  ;;  %v6013_v52 = vld [vmem:[%s6338_s7] ss:$0 sm:$0xff] }
 0x786   :  { %v5055_v22 = vpop.eup %5054 }
 0x787   :  { %v1762_v7 = vmul.f32 %v5055_v22, %v1761_v21  ;;  %v5057_v41 = vpop.eup %5056 }
 0x788   :  { %v1765_v62 = vsub.f32 1.0, %v5057_v41  ;;  %v1767_v58 = vmul.f32 %v5057_v41, %v5896_v15  ;;  %v6043_v41 = vld [vmem:[#allocation14 + $0x80] ss:$12 sps:$4 sm:$0xff]  }
 0x789   :  { %v1763_v24 = vadd.f32 %v1762_v7, %v1664_v49 }
 0x78a   :  { %v1992_v16 = vpop.f32.mrb[32].mxu1  ;;  %v5972_v25 = vpop.f32.mrb[48].mxu0 }
 0x78b   :  { %5058 = vtanh.f32 %v1763_v24  ;;  %v1993_v53 = vadd.f32 %v1992_v16, %v5970_v23  ;;  %v1994_v29 = vpop.f32.mrb[33].mxu1  ;;  %v2063_v30 = vpop.f32.mrb[49].mxu0 }
 0x78c   :  { %v5978_v33 = vpop.f32.mrb[34].mxu1  ;;  %v5980_v12 = vpop.f32.mrb[50].mxu0  ;;  %v1995_v38 = vadd.f32 %v1994_v29, %v5975_v50  ;;  %v2064_v21 = vadd.f32 %v2063_v30, %v6008_v0  ;;  %v6024_v29 = vld [vmem:[#allocation14 + $0x20] ss:$12 sps:$4 sm:$0xff]   ;;  %v6031_v30 = vld [vmem:[#allocation14 + $0x38] ss:$12 sps:$4 sm:$0xff]  }
 0x78d   :  { %v4087_v6 = vmul.f32 -1.442695, %v1993_v53  ;;  %v5982_v34 = vpop.f32.mrb[35].mxu1  ;;  %v5984_v37 = vpop.f32.mrb[51].mxu0 }
 0x78e   :  { %v4088_v56 = vmul.f32 -1.442695, %v1995_v38  ;;  %v6039_v38 = vld [vmem:[#allocation14 + $0x68] ss:$12 sps:$4 sm:$0xff]  }
 0x78f   :  { %5060 = vpow2.f32 %v4087_v6  ;;  %v6035_v6 = vld [vmem:[#allocation14 + $0x50] ss:$12 sps:$4 sm:$0xff]  }
 0x790   :  { %5062 = vpow2.f32 %v4088_v56  ;;  %v6047_v56 = vld [vmem:[#allocation14 + $0x98] ss:$12 sps:$4 sm:$0xff]  }
 0x792   :  { %v5987_v2 = vpop.f32.mrb[36].mxu1 }
 0x793   :  { %v5989_v48 = vpop.f32.mrb[37].mxu1 }
 0x794   :  { %v5991_v3 = vpop.f32.mrb[38].mxu1 }
 0x795   :  { %v5059_v63 = vpop.eup %5058  ;;  %v5993_v20 = vpop.f32.mrb[39].mxu1 }
 0x796   :  { %v1766_v9 = vmul.f32 %v5059_v63, %v1765_v62  ;;  %v6051_v62 = vld [vmem:[#allocation14 + $0xb0] ss:$12 sps:$4 sm:$0xff]   ;;  %v4846_v63 = vld [vmem:[#allocation15 + $0x80] ss:$8 sps:$4 sm:$0xff]  }
 0x798   :  { %v1768_v13 = vadd.f32 %v1767_v58, %v1766_v9  ;;  %v4848_v9 = vld [vmem:[#allocation15 + $0x84] ss:$8 sps:$4 sm:$0xff]   ;;  %v4851_v58 = vld [vmem:[#allocation15 + $0x94] ss:$8 sps:$4 sm:$0xff]  }
 0x799   :  { %v5061_v8 = vpop.eup %5060  ;;  %2612 = vmatprep.subr.bf16.mxu0 %v4848_v9 }
 0x79a   :  { %v2120_v14 = vadd.f32 1.0, %v5061_v8  ;;  %v5996_v54 = vpop.f32.mrb[40].mxu1  ;;  %v1780_v55 = vpack.c.bf16 %v1768_v13, %v1768_v13  ;;  %v5063_v15 = vpop.eup %5062  ;;  %v4849_v13 = vld [vmem:[#allocation15 + $0x90] ss:$8 sps:$4 sm:$0xff]   ;;  %v4854_v8 = vld [vmem:[#allocation15 + $0xa4] ss:$8 sps:$4 sm:$0xff]  }
 0x79b   :  { %v5998_v18 = vpop.f32.mrb[41].mxu1  ;;  %v2126_v51 = vadd.f32 1.0, %v5063_v15  ;;  %v4855_v15 = vld [vmem:[#allocation15 + $0xb0] ss:$8 sps:$4 sm:$0xff]  }
 0x79c   :  { %5064 = vrcp.f32 %v2120_v14  ;;  %v6000_v19 = vpop.f32.mrb[42].mxu1  ;;  %2021 = vmatmul.mubr.bf16.gmra.mrb[44].mxu1 %v1780_v55  ;;  %4511 = vmatmul.mubr.bf16.gmra.mrb[52].mxu0 %v1780_v55  ;;  %v4852_v14 = vld [vmem:[#allocation15 + $0xa0] ss:$8 sps:$4 sm:$0xff]   ;;  %v4857_v55 = vld [vmem:[#allocation15 + $0xb4] ss:$8 sps:$4 sm:$0xff]  }
 0x79d   :  { %v6002_v42 = vpop.f32.mrb[43].mxu1  ;;  %2269 = vmatprep.mubr.bf16.mxu1 %v6346_v1  ;;  %2443 = vmatprep.mubr.bf16.mxu0 %v6346_v1  ;;  %5066 = vrcp.f32 %v2126_v51  ;;  %v4858_v51 = vld [vmem:[#allocation15 + $0xc0] ss:$8 sps:$4 sm:$0xff]  }
 0x7a6   :  { %v5065_v59 = vpop.eup %5064 }
 0x7a7   :  { %v2135_v22 = vmul.f32 %v5065_v59, %v6013_v52  ;;  %v5067_v7 = vpop.eup %5066  ;;  %v4863_v59 = vld [vmem:[#allocation15 + $0xd4] ss:$8 sps:$4 sm:$0xff]  }
 0x7a8   :  { %v2138_v24 = vsub.f32 1.0, %v5067_v7  ;;  %v4869_v7 = vld [vmem:[#allocation15 + $0xf4] ss:$8 sps:$4 sm:$0xff]  }
 0x7a9   :  { %v2136_v49 = vadd.f32 %v2135_v22, %v2064_v21  ;;  %v4861_v21 = vld [vmem:[#allocation15 + $0xd0] ss:$8 sps:$4 sm:$0xff]   ;;  %v4866_v22 = vld [vmem:[#allocation15 + $0xe4] ss:$8 sps:$4 sm:$0xff]  }
 0x7ab   :  { %5068 = vtanh.f32 %v2136_v49  ;;  %v4864_v49 = vld [vmem:[#allocation15 + $0xe0] ss:$8 sps:$4 sm:$0xff]  }
 0x7b5   :  { %v5069_v16 = vpop.eup %5068 }
 0x7b6   :  { %v6017_v43 = vmul.f32 %v5069_v16, %v2138_v24  ;;  %v4867_v24 = vld [vmem:[#allocation15 + $0xf0] ss:$8 sps:$4 sm:$0xff]  }
 0x7b8   :  { %v2140_v53 = vpack.c.bf16 %v6017_v43, %v6017_v43 }
 0x7ba   :  { %2270 = vmatmul.mubr.bf16.vlgmr.msra.gmra.mrb[48].mxu1 %v2140_v53  ;;  %2444 = vmatmul.mubr.bf16.vlgmr.msra.gmra.mrb[56].mxu0 %v2140_v53 }
 0x7bb   :  { %4515 = vmatpush3.bf16.msra.mxu1 %v6019_v47  ;;  %4530 = vmatprep.mubr.msk.bf16.mxu1 %vm5311_vm3, %v6348_v11 }
 0x7bc   :  { %4516 = vmatprep.subr.bf16.mxu1 %v6348_v11  ;;  %2644 = vmatprep.mubr.bf16.mxu0 %v6346_v1 }
 0x7bd   :  { %2613 = vmatpush1.bf16.msra.mxu0 %v4846_v63 }
 0x7be   :  { %2614 = vmatprep.subr.bf16.mxu0 %v4851_v58  ;;  %v1997_v58 = vadd.f32 %v5978_v33, %v5970_v23 }
 0x7bf   :  { %4517 = vmatpush3.bf16.msra.mxu1 %v6024_v29 }
 0x7c0   :  { %4518 = vmatprep.subr.bf16.mxu1 %v6348_v11 }
 0x7c1   :  { %2615 = vmatpush1.bf16.msra.mxu0 %v4849_v13  ;;  %v1999_v13 = vadd.f32 %v5982_v34, %v5975_v50 }
 0x7c2   :  { %2616 = vmatprep.subr.bf16.mxu0 %v4854_v8 }
 0x7c3   :  { %4519 = vmatpush3.bf16.msra.mxu1 %v6031_v30 }
 0x7c4   :  { %4520 = vmatprep.subr.bf16.mxu1 %v6348_v11 }
 0x7c5   :  { %2617 = vmatpush1.bf16.msra.mxu0 %v4852_v14 }
 0x7c6   :  { %2618 = vmatprep.subr.bf16.mxu0 %v4857_v55 }
 0x7c7   :  { %4521 = vmatpush3.bf16.msra.mxu1 %v6035_v6 }
 0x7c8   :  { %4522 = vmatprep.subr.bf16.mxu1 %v6348_v11 }
 0x7c9   :  { %2619 = vmatpush1.bf16.msra.mxu0 %v4855_v15 }
 0x7ca   :  { %2620 = vmatprep.subr.bf16.mxu0 %v4860_v45 }
 0x7cb   :  { %4523 = vmatpush3.bf16.msra.mxu1 %v6039_v38 }
 0x7cc   :  { %4524 = vmatprep.subr.bf16.mxu1 %v6348_v11 }
 0x7cd   :  { %2621 = vmatpush1.bf16.msra.mxu0 %v4858_v51 }
 0x7ce   :  { %2622 = vmatprep.subr.bf16.mxu0 %v4863_v59 }
 0x7cf   :  { %4525 = vmatpush3.bf16.msra.mxu1 %v6043_v41 }
 0x7d0   :  { %4526 = vmatprep.subr.bf16.mxu1 %v6348_v11 }
 0x7d1   :  { %2623 = vmatpush1.bf16.msra.mxu0 %v4861_v21 }
 0x7d2   :  { %2624 = vmatprep.subr.bf16.mxu0 %v4866_v22 }
 0x7d3   :  { %4527 = vmatpush3.bf16.msra.mxu1 %v6047_v56 }
 0x7d4   :  { %4528 = vmatprep.subr.bf16.mxu1 %v6348_v11 }
 0x7d5   :  { %2625 = vmatpush1.bf16.msra.mxu0 %v4864_v49 }
 0x7d6   :  { %2626 = vmatprep.subr.bf16.mxu0 %v4869_v7 }
 0x7d7   :  { %4529 = vmatpush3.bf16.msra.mxu1 %v6051_v62 }
 0x7d8   :  { %2662 = vmatprep.subr.bf16.mxu1 %v5910_v26 }
 0x7d9   :  { %2627 = vmatpush1.bf16.msra.mxu0 %v4867_v24 }
 0x7da   :  { %4531 = vmatmul.mubr.bf16.vlgmr.msra.gmra.mrb[52].mxu1 %v2140_v53  ;;  %4534 = vmatprep.subr.bf16.mxu0 %v6348_v11 }
 0x7db   :  { %2663 = vmatpush1.bf16.msra.mxu1 %v5912_v10  ;;  %2694 = vmatprep.mubr.bf16.mxu1 %v6346_v1 }
 0x7dc   :  { %2664 = vmatprep.subr.bf16.mxu1 %v5916_v27 }
 0x7df   :  { %2665 = vmatpush1.bf16.msra.mxu1 %v5918_v28 }
 0x7e0   :  { %2666 = vmatprep.subr.bf16.mxu1 %v5922_v31 }
 0x7e3   :  { %2667 = vmatpush1.bf16.msra.mxu1 %v5924_v32 }
 0x7e4   :  { %2668 = vmatprep.subr.bf16.mxu1 %v5928_v35 }
 0x7e7   :  { %2669 = vmatpush1.bf16.msra.mxu1 %v5930_v36 }
 0x7e8   :  { %2670 = vmatprep.subr.bf16.mxu1 %v5934_v39 }
 0x7eb   :  { %2671 = vmatpush1.bf16.msra.mxu1 %v5936_v40 }
 0x7ec   :  { %2672 = vmatprep.subr.bf16.mxu1 %v5940_v57 }
 0x7ef   :  { %2673 = vmatpush1.bf16.msra.mxu1 %v5942_v61 }
 0x7f0   :  { %2674 = vmatprep.subr.bf16.mxu1 %v5945_v4 }
 0x7f3   :  { %2675 = vmatpush1.bf16.msra.mxu1 %v5948_v60 }
 0x7f4   :  { %2676 = vmatprep.subr.bf16.mxu1 %v5951_v17 }
 0x7f7   :  { %2677 = vmatpush1.bf16.msra.mxu1 %v5954_v5 }
 0x86f   :  { %v6073_v16 = vpop.f32.mrb[52].mxu0 }
 0x870   :  { %v6075_v53 = vpop.f32.mrb[53].mxu0 }
 0x871   :  { %v4513_v63 = vpop.f32.mrb[54].mxu0 }
 0x872   :  { %v6077_v9 = vpop.f32.mrb[55].mxu0 }
 0x88d   :  { %v6083_v8 = vpop.f32.mrb[48].mxu1  ;;  %v2445_v14 = vpop.f32.mrb[56].mxu0 }
 0x88e   :  { %v2492_v55 = vadd.f32 %v2445_v14, %v1997_v58  ;;  %v6085_v15 = vpop.f32.mrb[49].mxu1  ;;  %v2447_v45 = vpop.f32.mrb[57].mxu0 }
 0x88f   :  { %v2499_v51 = vadd.f32 %v2447_v45, %v1999_v13  ;;  %v2275_v59 = vpop.f32.mrb[50].mxu1  ;;  %v2449_v21 = vpop.f32.mrb[58].mxu0  ;;  %v2067_v13 = vadd.f32 %v5984_v37, %v6008_v0  ;;  %v4872_v37 = vld [vmem:[#allocation15 + $0x104] ss:$8 sps:$4 sm:$0xff]  }
 0x890   :  { %v4130_v22 = vmul.f32 -1.442695, %v2492_v55  ;;  %v2276_v49 = vpop.f32.mrb[51].mxu1  ;;  %v2450_v7 = vpop.f32.mrb[59].mxu0  ;;  %2863 = vmatprep.subr.bf16.mxu1 %v4872_v37 }
 0x891   :  { %v4131_v24 = vmul.f32 -1.442695, %v2499_v51 }
 0x892   :  { %5070 = vpow2.f32 %v4130_v22 }
 0x893   :  { %5072 = vpow2.f32 %v4131_v24 }
 0x89c   :  { %v5071_v63 = vpop.eup %5070 }
 0x89d   :  { %v2496_v33 = vadd.f32 1.0, %v5071_v63  ;;  %v5073_v34 = vpop.eup %5072  ;;  %v4873_v63 = vld [vmem:[#allocation15 + $0x110] ss:$8 sps:$4 sm:$0xff]  }
 0x89e   :  { %v2503_v1 = vadd.f32 1.0, %v5073_v34  ;;  %v4876_v34 = vld [vmem:[#allocation15 + $0x120] ss:$8 sps:$4 sm:$0xff]  }
 0x89f   :  { %5074 = vrcp.f32 %v2496_v33  ;;  %v4878_v33 = vld [vmem:[#allocation15 + $0x124] ss:$8 sps:$4 sm:$0xff]  }
 0x8a0   :  { %5076 = vrcp.f32 %v2503_v1  ;;  %v6357_v1 = vmov 0.0  }
 0x8a9   :  { %v5075_v46 = vpop.eup %5074 }
 0x8aa   :  { %v5077_v51 = vpop.eup %5076 }
 0x8ab   :  { %v2510_v21 = vsub.f32 1.0, %v5077_v51  ;;  %v2512_v7 = vmul.f32 %v5077_v51, %v6017_v43  ;;  %v4875_v43 = vld [vmem:[#allocation15 + $0x114] ss:$8 sps:$4 sm:$0xff]   ;;  %v4890_v51 = vld [vmem:[#allocation15 + $0x164] ss:$8 sps:$4 sm:$0xff]  }
 0x8ad   :  { %v2486_v11 = vpop.f32.mrb[52].mxu1 }
 0x8ae   :  { %v2506_v58 = vadd.f32 %v6013_v52, %v2486_v11  ;;  %v4532_v14 = vpop.f32.mrb[53].mxu1 }
 0x8af   :  { %v2489_v44 = vpop.f32.mrb[54].mxu1  ;;  %v4879_v14 = vld [vmem:[#allocation15 + $0x130] ss:$8 sps:$4 sm:$0xff]  }
 0x8b0   :  { %v2507_v55 = vmul.f32 %v5075_v46, %v2506_v58  ;;  %v4533_v45 = vpop.f32.mrb[55].mxu1  ;;  %v6358_v44 = vmov 0   ;;  %v4870_v46 = vld [vmem:[#allocation15 + $0x100] ss:$8 sps:$4 sm:$0xff]   ;;  %v4881_v58 = vld [vmem:[#allocation15 + $0x134] ss:$8 sps:$4 sm:$0xff]  }
 0x8b1   :  { %v4887_v45 = vld [vmem:[#allocation15 + $0x154] ss:$8 sps:$4 sm:$0xff]  }
 0x8b2   :  { %v2508_v59 = vadd.f32 %v2507_v55, %v2067_v13  ;;  %v4884_v13 = vld [vmem:[#allocation15 + $0x144] ss:$8 sps:$4 sm:$0xff]   ;;  %v4882_v55 = vld [vmem:[#allocation15 + $0x140] ss:$8 sps:$4 sm:$0xff]  }
 0x8b4   :  { %5078 = vtanh.f32 %v2508_v59  ;;  %v4885_v59 = vld [vmem:[#allocation15 + $0x150] ss:$8 sps:$4 sm:$0xff]  }
 0x8be   :  { %v5079_v22 = vpop.eup %5078 }
 0x8bf   :  { %v2511_v49 = vmul.f32 %v5079_v22, %v2510_v21  ;;  %v4888_v21 = vld [vmem:[#allocation15 + $0x160] ss:$8 sps:$4 sm:$0xff]   ;;  %v4893_v22 = vld [vmem:[#allocation15 + $0x174] ss:$8 sps:$4 sm:$0xff]  }
 0x8c1   :  { %v6091_v24 = vadd.f32 %v2512_v7, %v2511_v49  ;;  %v4891_v49 = vld [vmem:[#allocation15 + $0x170] ss:$8 sps:$4 sm:$0xff]   ;;  %v2003_v7 = vadd.f32 %v5987_v2, %v5970_v23 }
 0x8c3   :  { %v2514_v11 = vpack.c.bf16 %v6091_v24, %v6091_v24 }
 0x8c5   :  { %2645 = vmatmul.mubr.bf16.vlgmr.msra.gmra.mrb[60].mxu0 %v2514_v11  ;;  %2695 = vmatmul.mubr.bf16.vlgmr.msra.gmra.mrb[56].mxu1 %v2514_v11 }
 0x8c6   :  { %4535 = vmatpush3.bf16.msra.mxu0 %v6019_v47  ;;  %4550 = vmatprep.mubr.msk.bf16.mxu0 %vm5311_vm3, %v6357_v1 }
 0x8c7   :  { %4536 = vmatprep.subr.bf16.mxu0 %v6357_v1  ;;  %2895 = vmatprep.mubr.bf16.mxu1 %v6358_v44 }
 0x8c8   :  { %2864 = vmatpush1.bf16.msra.mxu1 %v4870_v46 }
 0x8c9   :  { %2865 = vmatprep.subr.bf16.mxu1 %v4875_v43 }
 0x8ca   :  { %4537 = vmatpush3.bf16.msra.mxu0 %v6024_v29 }
 0x8cb   :  { %4538 = vmatprep.subr.bf16.mxu0 %v6357_v1 }
 0x8cc   :  { %2866 = vmatpush1.bf16.msra.mxu1 %v4873_v63 }
 0x8cd   :  { %2867 = vmatprep.subr.bf16.mxu1 %v4878_v33 }
 0x8ce   :  { %4539 = vmatpush3.bf16.msra.mxu0 %v6031_v30 }
 0x8cf   :  { %4540 = vmatprep.subr.bf16.mxu0 %v6357_v1 }
 0x8d0   :  { %2868 = vmatpush1.bf16.msra.mxu1 %v4876_v34 }
 0x8d1   :  { %2869 = vmatprep.subr.bf16.mxu1 %v4881_v58 }
 0x8d2   :  { %4541 = vmatpush3.bf16.msra.mxu0 %v6035_v6 }
 0x8d3   :  { %4542 = vmatprep.subr.bf16.mxu0 %v6357_v1 }
 0x8d4   :  { %2870 = vmatpush1.bf16.msra.mxu1 %v4879_v14 }
 0x8d5   :  { %2871 = vmatprep.subr.bf16.mxu1 %v4884_v13 }
 0x8d6   :  { %4543 = vmatpush3.bf16.msra.mxu0 %v6039_v38 }
 0x8d7   :  { %4544 = vmatprep.subr.bf16.mxu0 %v6357_v1 }
 0x8d8   :  { %2872 = vmatpush1.bf16.msra.mxu1 %v4882_v55 }
 0x8d9   :  { %2873 = vmatprep.subr.bf16.mxu1 %v4887_v45 }
 0x8da   :  { %4545 = vmatpush3.bf16.msra.mxu0 %v6043_v41 }
 0x8db   :  { %4546 = vmatprep.subr.bf16.mxu0 %v6357_v1 }
 0x8dc   :  { %2874 = vmatpush1.bf16.msra.mxu1 %v4885_v59 }
 0x8dd   :  { %2875 = vmatprep.subr.bf16.mxu1 %v4890_v51 }
 0x8de   :  { %4547 = vmatpush3.bf16.msra.mxu0 %v6047_v56 }
 0x8df   :  { %4548 = vmatprep.subr.bf16.mxu0 %v6357_v1 }
 0x8e0   :  { %2876 = vmatpush1.bf16.msra.mxu1 %v4888_v21 }
 0x8e1   :  { %2877 = vmatprep.subr.bf16.mxu1 %v4893_v22 }
 0x8e2   :  { %4549 = vmatpush3.bf16.msra.mxu0 %v6051_v62 }
 0x8e3   :  { %2913 = vmatprep.subr.bf16.mxu0 %v5910_v26 }
 0x8e4   :  { %2878 = vmatpush1.bf16.msra.mxu1 %v4891_v49 }
 0x8e5   :  { %4551 = vmatmul.mubr.bf16.vlgmr.msra.gmra.mrb[64].mxu0 %v2514_v11  ;;  %4554 = vmatprep.subr.bf16.mxu1 %v6357_v1  ;;  %v2005_v11 = vadd.f32 %v5989_v48, %v5975_v50 }
 0x8e6   :  { %2914 = vmatpush1.bf16.msra.mxu0 %v5912_v10  ;;  %2945 = vmatprep.mubr.bf16.mxu0 %v6358_v44 }
 0x8e7   :  { %2915 = vmatprep.subr.bf16.mxu0 %v5916_v27 }
 0x8ea   :  { %2916 = vmatpush1.bf16.msra.mxu0 %v5918_v28 }
 0x8eb   :  { %2917 = vmatprep.subr.bf16.mxu0 %v5922_v31 }
 0x8ee   :  { %2918 = vmatpush1.bf16.msra.mxu0 %v5924_v32 }
 0x8ef   :  { %2919 = vmatprep.subr.bf16.mxu0 %v5928_v35 }
 0x8f2   :  { %2920 = vmatpush1.bf16.msra.mxu0 %v5930_v36 }
 0x8f3   :  { %2921 = vmatprep.subr.bf16.mxu0 %v5934_v39 }
 0x8f6   :  { %2922 = vmatpush1.bf16.msra.mxu0 %v5936_v40 }
 0x8f7   :  { %2923 = vmatprep.subr.bf16.mxu0 %v5940_v57 }
 0x8fa   :  { %2924 = vmatpush1.bf16.msra.mxu0 %v5942_v61 }
 0x8fb   :  { %2925 = vmatprep.subr.bf16.mxu0 %v5945_v4 }
 0x8fe   :  { %2926 = vmatpush1.bf16.msra.mxu0 %v5948_v60 }
 0x8ff   :  { %2927 = vmatprep.subr.bf16.mxu0 %v5951_v17 }
 0x902   :  { %2928 = vmatpush1.bf16.msra.mxu0 %v5954_v5 }
 0x998   :  { %v2646_v46 = vpop.f32.mrb[60].mxu0  ;;  %v2696_v37 = vpop.f32.mrb[56].mxu1 }
 0x999   :  { %v6136_v43 = vadd.f32 %v2646_v46, %v6083_v8  ;;  %v2743_v63 = vadd.f32 %v2696_v37, %v2003_v7  ;;  %v2648_v33 = vpop.f32.mrb[61].mxu0  ;;  %v2698_v34 = vpop.f32.mrb[57].mxu1 }
 0x99a   :  { %v6139_v58 = vadd.f32 %v2648_v33, %v6085_v15  ;;  %v2750_v14 = vadd.f32 %v2698_v34, %v2005_v11  ;;  %v2650_v13 = vpop.f32.mrb[62].mxu0  ;;  %v2700_v55 = vpop.f32.mrb[58].mxu1  ;;  %v2072_v11 = vadd.f32 %v5972_v25, %v6008_v0  ;;  %v4894_v25 = vld [vmem:[#allocation15 + $0x180] ss:$8 sps:$4 sm:$0xff]  }
 0x99b   :  { %v4148_v45 = vmul.f32 -1.442695, %v2743_v63  ;;  %v2651_v59 = vpop.f32.mrb[63].mxu0  ;;  %v2701_v2 = vpop.f32.mrb[59].mxu1 }
 0x99c   :  { %v4149_v51 = vmul.f32 -1.442695, %v2750_v14 }
 0x99d   :  { %5080 = vpow2.f32 %v4148_v45 }
 0x99e   :  { %5082 = vpow2.f32 %v4149_v51 }
 0x9a7   :  { %v5081_v48 = vpop.eup %5080 }
 0x9a8   :  { %v2747_v21 = vadd.f32 1.0, %v5081_v48  ;;  %v5083_v8 = vpop.eup %5082  ;;  %v4899_v48 = vld [vmem:[#allocation15 + $0x194] ss:$8 sps:$4 sm:$0xff]  }
 0x9a9   :  { %v2754_v22 = vadd.f32 1.0, %v5083_v8  ;;  %v4902_v8 = vld [vmem:[#allocation15 + $0x1a4] ss:$8 sps:$4 sm:$0xff]  }
 0x9aa   :  { %5084 = vrcp.f32 %v2747_v21  ;;  %v4897_v21 = vld [vmem:[#allocation15 + $0x190] ss:$8 sps:$4 sm:$0xff]  }
 0x9ab   :  { %5086 = vrcp.f32 %v2754_v22  ;;  %v4900_v22 = vld [vmem:[#allocation15 + $0x1a0] ss:$8 sps:$4 sm:$0xff]  }
 0x9b4   :  { %v5085_v15 = vpop.eup %5084 }
 0x9b5   :  { %v5087_v14 = vpop.eup %5086 }
 0x9b6   :  { %v2761_v13 = vsub.f32 1.0, %v5087_v14  ;;  %v2763_v59 = vmul.f32 %v5087_v14, %v6091_v24  ;;  %v4896_v24 = vld [vmem:[#allocation15 + $0x184] ss:$8 sps:$4 sm:$0xff]   ;;  %v4915_v14 = vld [vmem:[#allocation15 + $0x1f0] ss:$8 sps:$4 sm:$0xff]  }
 0x9b7   :  { %3114 = vmatprep.subr.bf16.mxu0 %v4896_v24 }
 0x9b8   :  { %v2737_v49 = vpop.f32.mrb[64].mxu0 }
 0x9b9   :  { %v2757_v7 = vadd.f32 %v6013_v52, %v2737_v49  ;;  %v4552_v46 = vpop.f32.mrb[65].mxu0  ;;  %v4905_v49 = vld [vmem:[#allocation15 + $0x1b4] ss:$8 sps:$4 sm:$0xff]  }
 0x9ba   :  { %v2740_v37 = vpop.f32.mrb[66].mxu0  ;;  %v4908_v46 = vld [vmem:[#allocation15 + $0x1c4] ss:$8 sps:$4 sm:$0xff]  }
 0x9bb   :  { %v2758_v63 = vmul.f32 %v5085_v15, %v2757_v7  ;;  %v4553_v33 = vpop.f32.mrb[67].mxu0  ;;  %v4903_v7 = vld [vmem:[#allocation15 + $0x1b0] ss:$8 sps:$4 sm:$0xff]   ;;  %v4906_v15 = vld [vmem:[#allocation15 + $0x1c0] ss:$8 sps:$4 sm:$0xff]  }
 0x9bc   :  { %v4911_v37 = vld [vmem:[#allocation15 + $0x1d4] ss:$8 sps:$4 sm:$0xff]   ;;  %v4912_v33 = vld [vmem:[#allocation15 + $0x1e0] ss:$8 sps:$4 sm:$0xff]  }
 0x9bd   :  { %v2759_v34 = vadd.f32 %v2758_v63, %v2072_v11  ;;  %v4909_v11 = vld [vmem:[#allocation15 + $0x1d0] ss:$8 sps:$4 sm:$0xff]   ;;  %v4914_v63 = vld [vmem:[#allocation15 + $0x1e4] ss:$8 sps:$4 sm:$0xff]  }
 0x9bf   :  { %5088 = vtanh.f32 %v2759_v34  ;;  %v4917_v34 = vld [vmem:[#allocation15 + $0x1f4] ss:$8 sps:$4 sm:$0xff]  }
 0x9c9   :  { %v5089_v55 = vpop.eup %5088 }
 0x9ca   :  { %v2762_v45 = vmul.f32 %v5089_v55, %v2761_v13  ;;  %v2007_v13 = vadd.f32 %v5991_v3, %v5970_v23  ;;  %v2009_v55 = vadd.f32 %v5993_v20, %v5975_v50 }
 0x9cc   :  { %v6145_v2 = vadd.f32 %v2763_v59, %v2762_v45 }
 0x9ce   :  { %v2765_v51 = vpack.c.bf16 %v6145_v2, %v6145_v2 }
 0x9d0   :  { %2896 = vmatmul.mubr.bf16.vlgmr.msra.gmra.mrb[60].mxu1 %v2765_v51  ;;  %2946 = vmatmul.mubr.bf16.vlgmr.msra.gmra.mrb[68].mxu0 %v2765_v51 }
 0x9d1   :  { %4555 = vmatpush3.bf16.msra.mxu1 %v6019_v47  ;;  %4570 = vmatprep.mubr.msk.bf16.mxu1 %vm5311_vm3, %v6357_v1 }
 0x9d2   :  { %4556 = vmatprep.subr.bf16.mxu1 %v6357_v1  ;;  %3146 = vmatprep.mubr.bf16.mxu0 %v6358_v44 }
 0x9d3   :  { %3115 = vmatpush1.bf16.msra.mxu0 %v4894_v25 }
 0x9d4   :  { %3116 = vmatprep.subr.bf16.mxu0 %v4899_v48 }
 0x9d5   :  { %4557 = vmatpush3.bf16.msra.mxu1 %v6024_v29 }
 0x9d6   :  { %4558 = vmatprep.subr.bf16.mxu1 %v6357_v1 }
 0x9d7   :  { %3117 = vmatpush1.bf16.msra.mxu0 %v4897_v21 }
 0x9d8   :  { %3118 = vmatprep.subr.bf16.mxu0 %v4902_v8 }
 0x9d9   :  { %4559 = vmatpush3.bf16.msra.mxu1 %v6031_v30 }
 0x9da   :  { %4560 = vmatprep.subr.bf16.mxu1 %v6357_v1 }
 0x9db   :  { %3119 = vmatpush1.bf16.msra.mxu0 %v4900_v22 }
 0x9dc   :  { %3120 = vmatprep.subr.bf16.mxu0 %v4905_v49 }
 0x9dd   :  { %4561 = vmatpush3.bf16.msra.mxu1 %v6035_v6 }
 0x9de   :  { %4562 = vmatprep.subr.bf16.mxu1 %v6357_v1 }
 0x9df   :  { %3121 = vmatpush1.bf16.msra.mxu0 %v4903_v7 }
 0x9e0   :  { %3122 = vmatprep.subr.bf16.mxu0 %v4908_v46 }
 0x9e1   :  { %4563 = vmatpush3.bf16.msra.mxu1 %v6039_v38 }
 0x9e2   :  { %4564 = vmatprep.subr.bf16.mxu1 %v6357_v1 }
 0x9e3   :  { %3123 = vmatpush1.bf16.msra.mxu0 %v4906_v15 }
 0x9e4   :  { %3124 = vmatprep.subr.bf16.mxu0 %v4911_v37 }
 0x9e5   :  { %4565 = vmatpush3.bf16.msra.mxu1 %v6043_v41 }
 0x9e6   :  { %4566 = vmatprep.subr.bf16.mxu1 %v6357_v1 }
 0x9e7   :  { %3125 = vmatpush1.bf16.msra.mxu0 %v4909_v11 }
 0x9e8   :  { %3126 = vmatprep.subr.bf16.mxu0 %v4914_v63 }
 0x9e9   :  { %4567 = vmatpush3.bf16.msra.mxu1 %v6047_v56 }
 0x9ea   :  { %4568 = vmatprep.subr.bf16.mxu1 %v6357_v1 }
 0x9eb   :  { %3127 = vmatpush1.bf16.msra.mxu0 %v4912_v33 }
 0x9ec   :  { %3128 = vmatprep.subr.bf16.mxu0 %v4917_v34 }
 0x9ed   :  { %4569 = vmatpush3.bf16.msra.mxu1 %v6051_v62 }
 0x9ee   :  { %3164 = vmatprep.subr.bf16.mxu1 %v5910_v26 }
 0x9ef   :  { %3129 = vmatpush1.bf16.msra.mxu0 %v4915_v14 }
 0x9f0   :  { %4571 = vmatmul.mubr.bf16.vlgmr.msra.gmra.mrb[64].mxu1 %v2765_v51  ;;  %4574 = vmatprep.subr.bf16.mxu0 %v6357_v1 }
 0x9f1   :  { %3165 = vmatpush1.bf16.msra.mxu1 %v5912_v10  ;;  %3196 = vmatprep.mubr.bf16.mxu1 %v6358_v44 }
 0x9f2   :  { %3166 = vmatprep.subr.bf16.mxu1 %v5916_v27 }
 0x9f5   :  { %3167 = vmatpush1.bf16.msra.mxu1 %v5918_v28 }
 0x9f6   :  { %3168 = vmatprep.subr.bf16.mxu1 %v5922_v31 }
 0x9f9   :  { %3169 = vmatpush1.bf16.msra.mxu1 %v5924_v32 }
 0x9fa   :  { %3170 = vmatprep.subr.bf16.mxu1 %v5928_v35 }
 0x9fd   :  { %3171 = vmatpush1.bf16.msra.mxu1 %v5930_v36 }
 0x9fe   :  { %3172 = vmatprep.subr.bf16.mxu1 %v5934_v39 }
 0xa01   :  { %3173 = vmatpush1.bf16.msra.mxu1 %v5936_v40 }
 0xa02   :  { %3174 = vmatprep.subr.bf16.mxu1 %v5940_v57 }
 0xa05   :  { %3175 = vmatpush1.bf16.msra.mxu1 %v5942_v61 }
 0xa06   :  { %3176 = vmatprep.subr.bf16.mxu1 %v5945_v4 }
 0xa09   :  { %3177 = vmatpush1.bf16.msra.mxu1 %v5948_v60 }
 0xa0a   :  { %3178 = vmatprep.subr.bf16.mxu1 %v5951_v17 }
 0xa0d   :  { %3179 = vmatpush1.bf16.msra.mxu1 %v5954_v5 }
 0xaa3   :  { %v2897_v45 = vpop.f32.mrb[60].mxu1  ;;  %v2947_v59 = vpop.f32.mrb[68].mxu0 }
 0xaa4   :  { %v6190_v51 = vadd.f32 %v2897_v45, %v6136_v43  ;;  %v2994_v25 = vadd.f32 %v2947_v59, %v2007_v13  ;;  %v2899_v24 = vpop.f32.mrb[61].mxu1  ;;  %v2949_v48 = vpop.f32.mrb[69].mxu0  ;;  %v2075_v13 = vadd.f32 %v5980_v12, %v6008_v0  ;;  %v2013_v12 = vadd.f32 %v5996_v54, %v5970_v23 }
 0xaa5   :  { %v6193_v21 = vadd.f32 %v2899_v24, %v6139_v58  ;;  %v3001_v8 = vadd.f32 %v2949_v48, %v2009_v55  ;;  %v2901_v22 = vpop.f32.mrb[62].mxu1  ;;  %v2951_v49 = vpop.f32.mrb[70].mxu0 }
 0xaa6   :  { %v4166_v7 = vmul.f32 -1.442695, %v2994_v25  ;;  %v2902_v46 = vpop.f32.mrb[63].mxu1  ;;  %v2952_v3 = vpop.f32.mrb[71].mxu0 }
 0xaa7   :  { %v4167_v15 = vmul.f32 -1.442695, %v3001_v8 }
 0xaa8   :  { %5090 = vpow2.f32 %v4166_v7 }
 0xaa9   :  { %5092 = vpow2.f32 %v4167_v15 }
 0xab2   :  { %v5091_v20 = vpop.eup %5090 }
 0xab3   :  { %v2998_v37 = vadd.f32 1.0, %v5091_v20  ;;  %v5093_v43 = vpop.eup %5092 }
 0xab4   :  { %v3005_v11 = vadd.f32 1.0, %v5093_v43 }
 0xab5   :  { %5094 = vrcp.f32 %v2998_v37 }
 0xab6   :  { %5096 = vrcp.f32 %v3005_v11 }
 0xabf   :  { %v5095_v58 = vpop.eup %5094 }
 0xac0   :  { %v5097_v25 = vpop.eup %5096 }
 0xac1   :  { %v3012_v24 = vsub.f32 1.0, %v5097_v25  ;;  %v3014_v22 = vmul.f32 %v5097_v25, %v6145_v2  ;;  %v2015_v2 = vadd.f32 %v5998_v18, %v5975_v50 }
 0xac3   :  { %v2988_v63 = vpop.f32.mrb[64].mxu1 }
 0xac4   :  { %v3008_v33 = vadd.f32 %v6013_v52, %v2988_v63  ;;  %v4572_v34 = vpop.f32.mrb[65].mxu1 }
 0xac5   :  { %v2991_v14 = vpop.f32.mrb[66].mxu1 }
 0xac6   :  { %v3009_v55 = vmul.f32 %v5095_v58, %v3008_v33  ;;  %v4573_v45 = vpop.f32.mrb[67].mxu1 }
 0xac8   :  { %v3010_v59 = vadd.f32 %v3009_v55, %v2075_v13 }
 0xaca   :  { %5098 = vtanh.f32 %v3010_v59 }
 0xad4   :  { %v5099_v48 = vpop.eup %5098 }
 0xad5   :  { %v3013_v8 = vmul.f32 %v5099_v48, %v3012_v24 }
 0xad7   :  { %v6199_v49 = vadd.f32 %v3014_v22, %v3013_v8  ;;  %v2080_v8 = vadd.f32 %v6075_v53, %v6008_v0  ;;  %v5138_v53 = vld [vmem:[#allocation14 + $0x48] ss:$12 sps:$4 sm:$0xff]  }
 0xad9   :  { %v3016_v7 = vpack.c.bf16 %v6199_v49, %v6199_v49 }
 0xadb   :  { %3147 = vmatmul.mubr.bf16.vlgmr.msra.gmra.mrb[72].mxu0 %v3016_v7  ;;  %3197 = vmatmul.mubr.bf16.vlgmr.msra.gmra.mrb[68].mxu1 %v3016_v7 }
 0xadc   :  { %4575 = vmatpush3.bf16.msra.mxu0 %v6019_v47  ;;  %4590 = vmatprep.mubr.msk.bf16.mxu0 %vm5311_vm3, %v6357_v1 }
 0xadd   :  { %4576 = vmatprep.subr.bf16.mxu0 %v6357_v1  ;;  %3397 = vmatprep.mubr.bf16.mxu1 %v6358_v44 }
 0xae0   :  { %4577 = vmatpush3.bf16.msra.mxu0 %v6024_v29 }
 0xae1   :  { %4578 = vmatprep.subr.bf16.mxu0 %v6357_v1 }
 0xae4   :  { %4579 = vmatpush3.bf16.msra.mxu0 %v6031_v30 }
 0xae5   :  { %4580 = vmatprep.subr.bf16.mxu0 %v6357_v1 }
 0xae8   :  { %4581 = vmatpush3.bf16.msra.mxu0 %v6035_v6 }
 0xae9   :  { %4582 = vmatprep.subr.bf16.mxu0 %v6357_v1 }
 0xaec   :  { %4583 = vmatpush3.bf16.msra.mxu0 %v6039_v38 }
 0xaed   :  { %4584 = vmatprep.subr.bf16.mxu0 %v6357_v1 }
 0xaf0   :  { %4585 = vmatpush3.bf16.msra.mxu0 %v6043_v41 }
 0xaf1   :  { %4586 = vmatprep.subr.bf16.mxu0 %v6357_v1 }
 0xaf4   :  { %4587 = vmatpush3.bf16.msra.mxu0 %v6047_v56 }
 0xaf5   :  { %4588 = vmatprep.subr.bf16.mxu0 %v6357_v1 }
 0xaf8   :  { %4589 = vmatpush3.bf16.msra.mxu0 %v6051_v62 }
 0xaf9   :  { %3415 = vmatprep.subr.bf16.mxu0 %v5910_v26  ;;  %v4918_v26 = vld [vmem:[#allocation15 + $0x200] ss:$8 sps:$4 sm:$0xff]  }
 0xafb   :  { %4591 = vmatmul.mubr.bf16.vlgmr.msra.gmra.mrb[76].mxu0 %v3016_v7 }
 0xafc   :  { %3416 = vmatpush1.bf16.msra.mxu0 %v5912_v10  ;;  %3447 = vmatprep.mubr.bf16.mxu0 %v6358_v44  ;;  %v4920_v10 = vld [vmem:[#allocation15 + $0x204] ss:$8 sps:$4 sm:$0xff]  }
 0xafd   :  { %3417 = vmatprep.subr.bf16.mxu0 %v5916_v27  ;;  %v4923_v27 = vld [vmem:[#allocation15 + $0x214] ss:$8 sps:$4 sm:$0xff]   ;;  %3365 = vmatprep.subr.bf16.mxu1 %v4920_v10 }
 0xafe   :  { %3366 = vmatpush1.bf16.msra.mxu1 %v4918_v26 }
 0xaff   :  { %3367 = vmatprep.subr.bf16.mxu1 %v4923_v27 }
 0xb00   :  { %3418 = vmatpush1.bf16.msra.mxu0 %v5918_v28  ;;  %v4921_v28 = vld [vmem:[#allocation15 + $0x210] ss:$8 sps:$4 sm:$0xff]  }
 0xb01   :  { %3419 = vmatprep.subr.bf16.mxu0 %v5922_v31  ;;  %v4926_v31 = vld [vmem:[#allocation15 + $0x224] ss:$8 sps:$4 sm:$0xff]  }
 0xb02   :  { %3368 = vmatpush1.bf16.msra.mxu1 %v4921_v28 }
 0xb03   :  { %3369 = vmatprep.subr.bf16.mxu1 %v4926_v31 }
 0xb04   :  { %3420 = vmatpush1.bf16.msra.mxu0 %v5924_v32  ;;  %v4924_v32 = vld [vmem:[#allocation15 + $0x220] ss:$8 sps:$4 sm:$0xff]  }
 0xb05   :  { %3421 = vmatprep.subr.bf16.mxu0 %v5928_v35  ;;  %v4929_v35 = vld [vmem:[#allocation15 + $0x234] ss:$8 sps:$4 sm:$0xff]  }
 0xb06   :  { %3370 = vmatpush1.bf16.msra.mxu1 %v4924_v32 }
 0xb07   :  { %3371 = vmatprep.subr.bf16.mxu1 %v4929_v35 }
 0xb08   :  { %3422 = vmatpush1.bf16.msra.mxu0 %v5930_v36  ;;  %v4927_v36 = vld [vmem:[#allocation15 + $0x230] ss:$8 sps:$4 sm:$0xff]  }
 0xb09   :  { %3423 = vmatprep.subr.bf16.mxu0 %v5934_v39  ;;  %v4932_v39 = vld [vmem:[#allocation15 + $0x244] ss:$8 sps:$4 sm:$0xff]  }
 0xb0a   :  { %3372 = vmatpush1.bf16.msra.mxu1 %v4927_v36  ;;  %v5141_v36 = vld [vmem:[#allocation14 + $0x7c] ss:$12 sps:$4 sm:$0xff]  }
 0xb0b   :  { %3373 = vmatprep.subr.bf16.mxu1 %v4932_v39  ;;  %v5142_v39 = vld [vmem:[#allocation14 + $0x78] ss:$12 sps:$4 sm:$0xff]  }
 0xb0c   :  { %3424 = vmatpush1.bf16.msra.mxu0 %v5936_v40  ;;  %v4930_v40 = vld [vmem:[#allocation15 + $0x240] ss:$8 sps:$4 sm:$0xff]  }
 0xb0d   :  { %3425 = vmatprep.subr.bf16.mxu0 %v5940_v57  ;;  %v4935_v57 = vld [vmem:[#allocation15 + $0x254] ss:$8 sps:$4 sm:$0xff]  }
 0xb0e   :  { %3374 = vmatpush1.bf16.msra.mxu1 %v4930_v40  ;;  %v5143_v40 = vld [vmem:[#allocation14 + $0x94] ss:$12 sps:$4 sm:$0xff]  }
 0xb0f   :  { %3375 = vmatprep.subr.bf16.mxu1 %v4935_v57  ;;  %v5144_v57 = vld [vmem:[#allocation14 + $0x90] ss:$12 sps:$4 sm:$0xff]  }
 0xb10   :  { %3426 = vmatpush1.bf16.msra.mxu0 %v5942_v61  ;;  %v4933_v61 = vld [vmem:[#allocation15 + $0x250] ss:$8 sps:$4 sm:$0xff]  }
 0xb11   :  { %3427 = vmatprep.subr.bf16.mxu0 %v5945_v4  ;;  %v4938_v4 = vld [vmem:[#allocation15 + $0x264] ss:$8 sps:$4 sm:$0xff]  }
 0xb12   :  { %3376 = vmatpush1.bf16.msra.mxu1 %v4933_v61  ;;  %v5145_v61 = vld [vmem:[#allocation14 + $0xac] ss:$12 sps:$4 sm:$0xff]  }
 0xb13   :  { %3377 = vmatprep.subr.bf16.mxu1 %v4938_v4  ;;  %v5146_v4 = vld [vmem:[#allocation14 + $0xa8] ss:$12 sps:$4 sm:$0xff]  }
 0xb14   :  { %3428 = vmatpush1.bf16.msra.mxu0 %v5948_v60  ;;  %v4936_v60 = vld [vmem:[#allocation15 + $0x260] ss:$8 sps:$4 sm:$0xff]  }
 0xb15   :  { %3429 = vmatprep.subr.bf16.mxu0 %v5951_v17  ;;  %v4941_v17 = vld [vmem:[#allocation15 + $0x274] ss:$8 sps:$4 sm:$0xff]  }
 0xb16   :  { %3378 = vmatpush1.bf16.msra.mxu1 %v4936_v60  ;;  %v4942_v60 = vld [vmem:[#allocation15 + $0x280] ss:$8 sps:$4 sm:$0xff]  }
 0xb17   :  { %3379 = vmatprep.subr.bf16.mxu1 %v4941_v17  ;;  %v4944_v17 = vld [vmem:[#allocation15 + $0x284] ss:$8 sps:$4 sm:$0xff]  }
 0xb18   :  { %3430 = vmatpush1.bf16.msra.mxu0 %v5954_v5  ;;  %v4939_v5 = vld [vmem:[#allocation15 + $0x270] ss:$8 sps:$4 sm:$0xff]  }
 0xb19   :  { %3616 = vmatprep.subr.bf16.mxu0 %v4944_v17  ;;  %v5155_v17 = vld [vmem:[#allocation14 + $0xb0] ss:$12 sps:$4 sm:$0xff]  }
 0xb1a   :  { %3380 = vmatpush1.bf16.msra.mxu1 %v4939_v5  ;;  %v4947_v5 = vld [vmem:[#allocation15 + $0x294] ss:$8 sps:$4 sm:$0xff]  }
 0xb1b   :  { %4594 = vmatprep.subr.bf16.mxu1 %v6357_v1 }
 0xbae   :  { %v3148_v46 = vpop.f32.mrb[72].mxu0  ;;  %v3198_v3 = vpop.f32.mrb[68].mxu1 }
 0xbaf   :  { %v6244_v15 = vadd.f32 %v3148_v46, %v6190_v51  ;;  %v3245_v20 = vadd.f32 %v3198_v3, %v2013_v12  ;;  %v3150_v37 = vpop.f32.mrb[73].mxu0  ;;  %v3200_v43 = vpop.f32.mrb[69].mxu1  ;;  %v4945_v12 = vld [vmem:[#allocation15 + $0x290] ss:$8 sps:$4 sm:$0xff]   ;;  %v4948_v46 = vld [vmem:[#allocation15 + $0x2a0] ss:$8 sps:$4 sm:$0xff]  }
 0xbb0   :  { %v6247_v11 = vadd.f32 %v3150_v37, %v6193_v21  ;;  %v3252_v63 = vadd.f32 %v3200_v43, %v2015_v2  ;;  %v3152_v33 = vpop.f32.mrb[74].mxu0  ;;  %v3202_v34 = vpop.f32.mrb[70].mxu1  ;;  %v4950_v2 = vld [vmem:[#allocation15 + $0x2a4] ss:$8 sps:$4 sm:$0xff]   ;;  %v4953_v3 = vld [vmem:[#allocation15 + $0x2b4] ss:$8 sps:$4 sm:$0xff]  }
 0xbb1   :  { %v4184_v58 = vmul.f32 -1.442695, %v3245_v20  ;;  %v3153_v14 = vpop.f32.mrb[75].mxu0  ;;  %v3203_v54 = vpop.f32.mrb[71].mxu1  ;;  %v4951_v20 = vld [vmem:[#allocation15 + $0x2b0] ss:$8 sps:$4 sm:$0xff]  }
 0xbb2   :  { %v4185_v13 = vmul.f32 -1.442695, %v3252_v63  ;;  %v4956_v37 = vld [vmem:[#allocation15 + $0x2c4] ss:$8 sps:$4 sm:$0xff]   ;;  %v4954_v43 = vld [vmem:[#allocation15 + $0x2c0] ss:$8 sps:$4 sm:$0xff]  }
 0xbb3   :  { %5100 = vpow2.f32 %v4184_v58  ;;  %v4959_v63 = vld [vmem:[#allocation15 + $0x2d4] ss:$8 sps:$4 sm:$0xff]   ;;  %v4957_v33 = vld [vmem:[#allocation15 + $0x2d0] ss:$8 sps:$4 sm:$0xff]   ;;  %v4962_v34 = vld [vmem:[#allocation15 + $0x2e4] ss:$8 sps:$4 sm:$0xff]  }
 0xbb4   :  { %5102 = vpow2.f32 %v4185_v13  ;;  %v4960_v58 = vld [vmem:[#allocation15 + $0x2e0] ss:$8 sps:$4 sm:$0xff]   ;;  %v4965_v14 = vld [vmem:[#allocation15 + $0x2f4] ss:$8 sps:$4 sm:$0xff]   ;;  %v4963_v54 = vld [vmem:[#allocation15 + $0x2f0] ss:$8 sps:$4 sm:$0xff]   ;;  %v2017_v13 = vadd.f32 %v6000_v19, %v5970_v23 }
 0xbbd   :  { %v5101_v18 = vpop.eup %5100 }
 0xbbe   :  { %v3249_v55 = vadd.f32 1.0, %v5101_v18  ;;  %v5103_v51 = vpop.eup %5102  ;;  %v2019_v18 = vadd.f32 %v6002_v42, %v5975_v50 }
 0xbbf   :  { %v3256_v45 = vadd.f32 1.0, %v5103_v51 }
 0xbc0   :  { %5104 = vrcp.f32 %v3249_v55 }
 0xbc1   :  { %5106 = vrcp.f32 %v3256_v45 }
 0xbca   :  { %v5105_v21 = vpop.eup %5104 }
 0xbcb   :  { %v5107_v10 = vpop.eup %5106 }
 0xbcc   :  { %v3263_v27 = vsub.f32 1.0, %v5107_v10  ;;  %v3265_v32 = vmul.f32 %v5107_v10, %v6199_v49  ;;  %v5140_v49 = vld [vmem:[#allocation14 + $0x60] ss:$12 sps:$4 sm:$0xff]  }
 0xbce   :  { %v3239_v59 = vpop.f32.mrb[76].mxu0 }
 0xbcf   :  { %v3259_v25 = vadd.f32 %v6013_v52, %v3239_v59  ;;  %v4592_v24 = vpop.f32.mrb[77].mxu0 }
 0xbd0   :  { %v3242_v48 = vpop.f32.mrb[78].mxu0 }
 0xbd1   :  { %v3260_v22 = vmul.f32 %v5105_v21, %v3259_v25  ;;  %v4593_v7 = vpop.f32.mrb[79].mxu0 }
 0xbd3   :  { %v3261_v26 = vadd.f32 %v3260_v22, %v2080_v8 }
 0xbd5   :  { %5108 = vtanh.f32 %v3261_v26 }
 0xbdf   :  { %v5109_v28 = vpop.eup %5108 }
 0xbe0   :  { %v3264_v31 = vmul.f32 %v5109_v28, %v3263_v27 }
 0xbe2   :  { %v6253_v35 = vadd.f32 %v3265_v32, %v3264_v31 }
 0xbe4   :  { %v3267_v52 = vpack.c.bf16 %v6253_v35, %v6253_v35 }
 0xbe6   :  { %3398 = vmatmul.mubr.bf16.vlgmr.msra.gmra.mrb[72].mxu1 %v3267_v52  ;;  %3448 = vmatmul.mubr.bf16.vlgmr.msra.gmra.mrb[80].mxu0 %v3267_v52 }
 0xbe7   :  { %4595 = vmatpush3.bf16.msra.mxu1 %v6019_v47  ;;  %4610 = vmatprep.mubr.msk.bf16.mxu1 %vm5311_vm3, %v6357_v1  ;;  %v5131_v47 = vld [vmem:[#allocation14 + $0x4] ss:$12 sps:$4 sm:$0xff]  }
 0xbe8   :  { %4596 = vmatprep.subr.bf16.mxu1 %v6357_v1  ;;  %3648 = vmatprep.mubr.bf16.mxu0 %v6358_v44 }
 0xbe9   :  { %3617 = vmatpush1.bf16.msra.mxu0 %v4942_v60  ;;  %v5153_v60 = vld [vmem:[#allocation14 + $0x80] ss:$12 sps:$4 sm:$0xff]  }
 0xbea   :  { %3618 = vmatprep.subr.bf16.mxu0 %v4947_v5  ;;  %v4966_v5 = vld [vmem:[#allocation15 + $0x300] ss:$8 sps:$4 sm:$0xff]  }
 0xbeb   :  { %4597 = vmatpush3.bf16.msra.mxu1 %v6024_v29  ;;  %v5132_v29 = vld [vmem:[#allocation14] ss:$12 sps:$4 sm:$0xff]  }
 0xbec   :  { %4598 = vmatprep.subr.bf16.mxu1 %v6357_v1 }
 0xbed   :  { %3619 = vmatpush1.bf16.msra.mxu0 %v4945_v12  ;;  %v4968_v12 = vld [vmem:[#allocation15 + $0x304] ss:$8 sps:$4 sm:$0xff]  }
 0xbee   :  { %3620 = vmatprep.subr.bf16.mxu0 %v4950_v2  ;;  %v4971_v2 = vld [vmem:[#allocation15 + $0x314] ss:$8 sps:$4 sm:$0xff]  }
 0xbef   :  { %4599 = vmatpush3.bf16.msra.mxu1 %v6031_v30  ;;  %v5133_v30 = vld [vmem:[#allocation14 + $0x1c] ss:$12 sps:$4 sm:$0xff]  }
 0xbf0   :  { %4600 = vmatprep.subr.bf16.mxu1 %v6357_v1 }
 0xbf1   :  { %3621 = vmatpush1.bf16.msra.mxu0 %v4948_v46  ;;  %v4969_v46 = vld [vmem:[#allocation15 + $0x310] ss:$8 sps:$4 sm:$0xff]  }
 0xbf2   :  { %3622 = vmatprep.subr.bf16.mxu0 %v4953_v3  ;;  %v4974_v3 = vld [vmem:[#allocation15 + $0x324] ss:$8 sps:$4 sm:$0xff]  }
 0xbf3   :  { %4601 = vmatpush3.bf16.msra.mxu1 %v6035_v6  ;;  %v5134_v6 = vld [vmem:[#allocation14 + $0x18] ss:$12 sps:$4 sm:$0xff]  }
 0xbf4   :  { %4602 = vmatprep.subr.bf16.mxu1 %v6357_v1 }
 0xbf5   :  { %3623 = vmatpush1.bf16.msra.mxu0 %v4951_v20  ;;  %v4972_v20 = vld [vmem:[#allocation15 + $0x320] ss:$8 sps:$4 sm:$0xff]  }
 0xbf6   :  { %3624 = vmatprep.subr.bf16.mxu0 %v4956_v37  ;;  %v4977_v37 = vld [vmem:[#allocation15 + $0x334] ss:$8 sps:$4 sm:$0xff]  }
 0xbf7   :  { %4603 = vmatpush3.bf16.msra.mxu1 %v6039_v38  ;;  %v5135_v38 = vld [vmem:[#allocation14 + $0x34] ss:$12 sps:$4 sm:$0xff]  }
 0xbf8   :  { %4604 = vmatprep.subr.bf16.mxu1 %v6357_v1 }
 0xbf9   :  { %3625 = vmatpush1.bf16.msra.mxu0 %v4954_v43  ;;  %v4975_v43 = vld [vmem:[#allocation15 + $0x330] ss:$8 sps:$4 sm:$0xff]  }
 0xbfa   :  { %3626 = vmatprep.subr.bf16.mxu0 %v4959_v63  ;;  %v4978_v63 = vld [vmem:[#allocation15 + $0x340] ss:$8 sps:$4 sm:$0xff]  }
 0xbfb   :  { %4605 = vmatpush3.bf16.msra.mxu1 %v6043_v41  ;;  %v5136_v41 = vld [vmem:[#allocation14 + $0x30] ss:$12 sps:$4 sm:$0xff]  }
 0xbfc   :  { %4606 = vmatprep.subr.bf16.mxu1 %v6357_v1 }
 0xbfd   :  { %3627 = vmatpush1.bf16.msra.mxu0 %v4957_v33  ;;  %v4983_v33 = vld [vmem:[#allocation15 + $0x354] ss:$8 sps:$4 sm:$0xff]  }
 0xbfe   :  { %3628 = vmatprep.subr.bf16.mxu0 %v4962_v34  ;;  %v4981_v34 = vld [vmem:[#allocation15 + $0x350] ss:$8 sps:$4 sm:$0xff]  }
 0xbff   :  { %4607 = vmatpush3.bf16.msra.mxu1 %v6047_v56  ;;  %v5137_v56 = vld [vmem:[#allocation14 + $0x4c] ss:$12 sps:$4 sm:$0xff]  }
 0xc00   :  { %4608 = vmatprep.subr.bf16.mxu1 %v6357_v1 }
 0xc01   :  { %3629 = vmatpush1.bf16.msra.mxu0 %v4960_v58  ;;  %v4986_v58 = vld [vmem:[#allocation15 + $0x364] ss:$8 sps:$4 sm:$0xff]  }
 0xc02   :  { %3630 = vmatprep.subr.bf16.mxu0 %v4965_v14  ;;  %v4984_v14 = vld [vmem:[#allocation15 + $0x360] ss:$8 sps:$4 sm:$0xff]  }
 0xc03   :  { %4609 = vmatpush3.bf16.msra.mxu1 %v6051_v62  ;;  %v5139_v62 = vld [vmem:[#allocation14 + $0x64] ss:$12 sps:$4 sm:$0xff]  }
 0xc04   :  { %3666 = vmatprep.subr.bf16.mxu1 %v5131_v47 }
 0xc05   :  { %3631 = vmatpush1.bf16.msra.mxu0 %v4963_v54  ;;  %v4989_v54 = vld [vmem:[#allocation15 + $0x374] ss:$8 sps:$4 sm:$0xff]  }
 0xc06   :  { %4611 = vmatmul.mubr.bf16.vlgmr.msra.gmra.mrb[76].mxu1 %v3267_v52  ;;  %4614 = vmatprep.subr.bf16.mxu0 %v6357_v1 }
 0xc07   :  { %3667 = vmatpush1.bf16.msra.mxu1 %v5132_v29  ;;  %3698 = vmatprep.mubr.bf16.mxu1 %v6358_v44 }
 0xc08   :  { %3668 = vmatprep.subr.bf16.mxu1 %v5133_v30  ;;  %v2083_v30 = vadd.f32 %v6077_v9, %v6008_v0  ;;  %v5149_v9 = vld [vmem:[#allocation14 + $0x20] ss:$12 sps:$4 sm:$0xff]  }
 0xc0b   :  { %3669 = vmatpush1.bf16.msra.mxu1 %v5134_v6 }
 0xc0c   :  { %3670 = vmatprep.subr.bf16.mxu1 %v5135_v38 }
 0xc0f   :  { %3671 = vmatpush1.bf16.msra.mxu1 %v5136_v41 }
 0xc10   :  { %3672 = vmatprep.subr.bf16.mxu1 %v5137_v56 }
 0xc13   :  { %3673 = vmatpush1.bf16.msra.mxu1 %v5138_v53 }
 0xc14   :  { %3674 = vmatprep.subr.bf16.mxu1 %v5139_v62 }
 0xc17   :  { %3675 = vmatpush1.bf16.msra.mxu1 %v5140_v49 }
 0xc18   :  { %3676 = vmatprep.subr.bf16.mxu1 %v5141_v36 }
 0xc1b   :  { %3677 = vmatpush1.bf16.msra.mxu1 %v5142_v39 }
 0xc1c   :  { %3678 = vmatprep.subr.bf16.mxu1 %v5143_v40 }
 0xc1f   :  { %3679 = vmatpush1.bf16.msra.mxu1 %v5144_v57  ;;  %v5148_v57 = vld [vmem:[#allocation14 + $0x8] ss:$12 sps:$4 sm:$0xff]  }
 0xc20   :  { %3680 = vmatprep.subr.bf16.mxu1 %v5145_v61  ;;  %v5151_v61 = vld [vmem:[#allocation14 + $0x50] ss:$12 sps:$4 sm:$0xff]  }
 0xc23   :  { %3681 = vmatpush1.bf16.msra.mxu1 %v5146_v4  ;;  %v5152_v4 = vld [vmem:[#allocation14 + $0x68] ss:$12 sps:$4 sm:$0xff]  }
 0xc24   :  { %3867 = vmatprep.subr.bf16.mxu1 %v4968_v12 }
 0xcb9   :  { %v3399_v55 = vpop.f32.mrb[72].mxu1  ;;  %v3449_v51 = vpop.f32.mrb[80].mxu0 }
 0xcba   :  { %v6282_v45 = vadd.f32 %v3399_v55, %v6244_v15  ;;  %v3496_v59 = vadd.f32 %v3449_v51, %v2017_v13  ;;  %v3401_v25 = vpop.f32.mrb[73].mxu1  ;;  %v3451_v24 = vpop.f32.mrb[81].mxu0  ;;  %v4987_v13 = vld [vmem:[#allocation15 + $0x370] ss:$8 sps:$4 sm:$0xff]  }
 0xcbb   :  { %v6285_v21 = vadd.f32 %v3401_v25, %v6247_v11  ;;  %v3503_v48 = vadd.f32 %v3451_v24, %v2019_v18  ;;  %v3403_v8 = vpop.f32.mrb[74].mxu1  ;;  %v3453_v22 = vpop.f32.mrb[82].mxu0  ;;  %v6290_v11 = vld [vmem:[%s6338_s7] ss:$0 sm:$0xff] }
 0xcbc   :  { %v4202_v7 = vmul.f32 -1.442695, %v3496_v59  ;;  %v3404_v26 = vpop.f32.mrb[75].mxu1  ;;  %v3454_v19 = vpop.f32.mrb[83].mxu0 }
 0xcbd   :  { %v4203_v10 = vmul.f32 -1.442695, %v3503_v48 }
 0xcbe   :  { %5110 = vpow2.f32 %v4202_v7 }
 0xcbf   :  { %5112 = vpow2.f32 %v4203_v10 }
 0xcc8   :  { %v5111_v42 = vpop.eup %5110 }
 0xcc9   :  { %v3500_v27 = vadd.f32 1.0, %v5111_v42  ;;  %v5113_v15 = vpop.eup %5112 }
 0xcca   :  { %v3507_v28 = vadd.f32 1.0, %v5113_v15 }
 0xccb   :  { %5114 = vrcp.f32 %v3500_v27 }
 0xccc   :  { %5116 = vrcp.f32 %v3507_v28 }
 0xcd5   :  { %v5115_v47 = vpop.eup %5114 }
 0xcd6   :  { %v5117_v56 = vpop.eup %5116 }
 0xcd7   :  { %v3514_v53 = vsub.f32 1.0, %v5117_v56  ;;  %v3516_v36 = vmul.f32 %v5117_v56, %v6253_v35  ;;  %v5150_v35 = vld [vmem:[#allocation14 + $0x38] ss:$12 sps:$4 sm:$0xff]  }
 0xcd9   :  { %v3490_v31 = vpop.f32.mrb[76].mxu1 }
 0xcda   :  { %v3510_v32 = vadd.f32 %v6290_v11, %v3490_v31  ;;  %v4612_v52 = vpop.f32.mrb[77].mxu1 }
 0xcdb   :  { %v3493_v29 = vpop.f32.mrb[78].mxu1 }
 0xcdc   :  { %v3511_v6 = vmul.f32 %v5115_v47, %v3510_v32  ;;  %v4613_v38 = vpop.f32.mrb[79].mxu1  ;;  %v2088_v47 = vadd.f32 %v6073_v16, %v6008_v0 }
 0xcde   :  { %v3512_v41 = vadd.f32 %v3511_v6, %v2083_v30 }
 0xce0   :  { %5118 = vtanh.f32 %v3512_v41 }
 0xcea   :  { %v5119_v62 = vpop.eup %5118 }
 0xceb   :  { %v3515_v49 = vmul.f32 %v5119_v62, %v3514_v53 }
 0xced   :  { %v6296_v39 = vadd.f32 %v3516_v36, %v3515_v49  ;;  %v6359_v36 = vld [vmem:[#allocation21_spill] sm:$0xff] }
 0xcef   :  { %v3518_v40 = vpack.c.bf16 %v6296_v39, %v6296_v39 }
 0xcf1   :  { %3649 = vmatmul.mubr.bf16.vlgmr.msra.gmra.mrb[84].mxu0 %v3518_v40  ;;  %3699 = vmatmul.mubr.bf16.vlgmr.msra.gmra.mrb[44].mxu1 %v3518_v40 }
 0xcf2   :  { %4615 = vmatpush3.bf16.msra.mxu0 %v5148_v57  ;;  %4630 = vmatprep.mubr.msk.bf16.mxu0 %vm5311_vm3, %v6357_v1 }
 0xcf3   :  { %4616 = vmatprep.subr.bf16.mxu0 %v6357_v1  ;;  %3899 = vmatprep.mubr.bf16.mxu1 %v6358_v44  ;;  %v5154_v44 = vld [vmem:[#allocation14 + $0x98] ss:$12 sps:$4 sm:$0xff]  }
 0xcf4   :  { %3868 = vmatpush1.bf16.msra.mxu1 %v4966_v5 }
 0xcf5   :  { %3869 = vmatprep.subr.bf16.mxu1 %v4971_v2 }
 0xcf6   :  { %4617 = vmatpush3.bf16.msra.mxu0 %v5149_v9 }
 0xcf7   :  { %4618 = vmatprep.subr.bf16.mxu0 %v6357_v1 }
 0xcf8   :  { %3870 = vmatpush1.bf16.msra.mxu1 %v4969_v46 }
 0xcf9   :  { %3871 = vmatprep.subr.bf16.mxu1 %v4974_v3 }
 0xcfa   :  { %4619 = vmatpush3.bf16.msra.mxu0 %v5150_v35 }
 0xcfb   :  { %4620 = vmatprep.subr.bf16.mxu0 %v6357_v1 }
 0xcfc   :  { %3872 = vmatpush1.bf16.msra.mxu1 %v4972_v20 }
 0xcfd   :  { %3873 = vmatprep.subr.bf16.mxu1 %v4977_v37 }
 0xcfe   :  { %4621 = vmatpush3.bf16.msra.mxu0 %v5151_v61  ;;  %v3936_v61 = vld [vmem:[%s6342_s11] sm:$0x3] }
 0xcff   :  { %4622 = vmatprep.subr.bf16.mxu0 %v6357_v1  ;;  %v3941_v5 = vrot.slane %v3936_v61, %v6359_v36 }
 0xd00   :  { %3874 = vmatpush1.bf16.msra.mxu1 %v4975_v43 }
 0xd02   :  { %4623 = vmatpush3.bf16.msra.mxu0 %v5152_v4 }
 0xd03   :  { %4624 = vmatprep.subr.bf16.mxu0 %v6357_v1 }
 0xd06   :  { %4625 = vmatpush3.bf16.msra.mxu0 %v5153_v60 }
 0xd07   :  { %4626 = vmatprep.subr.bf16.mxu0 %v6357_v1 }
 0xd0a   :  { %4627 = vmatpush3.bf16.msra.mxu0 %v5154_v44 }
 0xd0b   :  { %4628 = vmatprep.subr.bf16.mxu0 %v6357_v1  ;;  %v4980_v1 = vld [vmem:[#allocation15 + $0x344] ss:$8 sps:$4 sm:$0xff]  }
 0xd0c   :  { %3875 = vmatprep.subr.bf16.mxu1 %v4980_v1 }
 0xd0d   :  { %3876 = vmatpush1.bf16.msra.mxu1 %v4978_v63  ;;  %v4238_v63 = vld [vmem:[#allocation6] ss:$0 sm:$0xff] }
 0xd0e   :  { %4629 = vmatpush3.bf16.msra.mxu0 %v5155_v17  ;;  %3877 = vmatprep.subr.bf16.mxu1 %v4983_v33 }
 0xd11   :  { %4631 = vmatmul.mubr.bf16.vlgmr.msra.gmra.mrb[88].mxu0 %v3518_v40  ;;  %3878 = vmatpush1.bf16.msra.mxu1 %v4981_v34  ;;  %v6360_v40 = vld [vmem:[#allocation22_spill] sm:$0xff] }
 0xd12   :  { %3879 = vmatprep.subr.bf16.mxu1 %v4986_v58  ;;  %v3945_v2 = vrot.slane %v3936_v61, %v6360_v40 }
 0xd15   :  { %3880 = vmatpush1.bf16.msra.mxu1 %v4984_v14 }
 0xd16   :  { %3881 = vmatprep.subr.bf16.mxu1 %v4989_v54 }
 0xd19   :  { %3882 = vmatpush1.bf16.msra.mxu1 %v4987_v13 }
 0xdc4   :  { %v3650_v18 = vpop.f32.mrb[84].mxu0  ;;  %v3700_v55 = vpop.f32.mrb[44].mxu1 }
 0xdc5   :  { %v3659_v51 = vadd.f32 %v3650_v18, %v6282_v45  ;;  %v4640_v59 = vadd.f32 %v3700_v55, %v5970_v23  ;;  %v3652_v25 = vpop.f32.mrb[85].mxu0  ;;  %v3702_v24 = vpop.f32.mrb[45].mxu1 }
 0xdc6   :  { %v3660_v48 = vadd.f32 %v3652_v25, %v6285_v21  ;;  %v3654_v8 = vpop.f32.mrb[86].mxu0  ;;  %v3704_v22 = vpop.f32.mrb[46].mxu1  ;;  %v4641_v10 = vadd.f32 %v3702_v24, %v5975_v50 }
 0xdc7   :  { %v4220_v7 = vmul.f32 -1.442695, %v4640_v59  ;;  %v3655_v26 = vpop.f32.mrb[87].mxu0  ;;  %v3705_v19 = vpop.f32.mrb[47].mxu1 }
 0xdc8   :  { %v4221_v42 = vmul.f32 -1.442695, %v4641_v10 }
 0xdc9   :  { %5120 = vpow2.f32 %v4220_v7 }
 0xdca   :  { %5122 = vpow2.f32 %v4221_v42 }
 0xdd3   :  { %v5121_v27 = vpop.eup %5120 }
 0xdd4   :  { %v3751_v15 = vadd.f32 1.0, %v5121_v27  ;;  %v5123_v45 = vpop.eup %5122 }
 0xdd5   :  { %v3758_v28 = vadd.f32 1.0, %v5123_v45 }
 0xdd6   :  { %5124 = vrcp.f32 %v3751_v15 }
 0xdd7   :  { %5126 = vrcp.f32 %v3758_v28 }
 0xde0   :  { %v5125_v21 = vpop.eup %5124 }
 0xde1   :  { %v5127_v6 = vpop.eup %5126 }
 0xde2   :  { %v3765_v38 = vsub.f32 1.0, %v5127_v6  ;;  %v3767_v53 = vmul.f32 %v5127_v6, %v6296_v39 }
 0xde4   :  { %v3741_v23 = vpop.f32.mrb[88].mxu0 }
 0xde5   :  { %v3761_v31 = vadd.f32 %v6290_v11, %v3741_v23  ;;  %v4632_v32 = vpop.f32.mrb[89].mxu0  ;;  %v3916_v11 = vld [vmem:[%s6341_s10] sm:$0x3] }
 0xde6   :  { %v3744_v52 = vpop.f32.mrb[90].mxu0  ;;  %v3921_v0 = vrot.slane %v3916_v11, %v6359_v36  ;;  %v3925_v57 = vrot.slane %v3916_v11, %v6360_v40 }
 0xde7   :  { %v3762_v29 = vmul.f32 %v5125_v21, %v3761_v31  ;;  %v4633_v30 = vpop.f32.mrb[91].mxu0 }
 0xde9   :  { %v3763_v50 = vadd.f32 %v3762_v29, %v2088_v47 }
 0xdeb   :  { %5128 = vtanh.f32 %v3763_v50 }
 0xdf5   :  { %v5129_v41 = vpop.eup %5128 }
 0xdf6   :  { %v3766_v56 = vmul.f32 %v5129_v41, %v3765_v38 }
 0xdf8   :  { %v3768_v62 = vadd.f32 %v3767_v53, %v3766_v56 }
 0xdfa   :  { %v3769_v49 = vpack.c.bf16 %v3768_v62, %v3768_v62 }
 0xdfc   :  { %3900 = vmatmul.mubr.bf16.vlgmr.msra.gmra.mrb[80].mxu1 %v3769_v49 }
 0xecf   :  { %v3901_v16 = vpop.f32.mrb[80].mxu1 }
 0xed0   :  { %v3910_v9 = vadd.f32 %v3901_v16, %v3659_v51  ;;  %v3903_v35 = vpop.f32.mrb[81].mxu1 }
 0xed1   :  { %v3911_v4 = vadd.f32 %v3903_v35, %v3660_v48  ;;  %v3905_v39 = vpop.f32.mrb[82].mxu1 }
 0xed2   :  { %v3928_v60 = vadd.f32 %v3921_v0, %v3910_v9  ;;  %v3906_v44 = vpop.f32.mrb[83].mxu1 }
 0xed3   :  { %v3929_v17 = vadd.f32 %v3925_v57, %v3911_v4 }
 0xed4   :  { %v3932_v12 = vmul.f32 0.01, %v3928_v60  ;;  %vm3930_vm4 = vcmp.gt.f32.partialorder %v3928_v60, 0.0 }
 0xed5   :  { %v3933_v46 = vmul.f32 0.01, %v3929_v17  ;;  %vm3931_vm5 = vcmp.gt.f32.partialorder %v3929_v17, 0.0 }
 0xed6   :  { %v3934_v3 = vsel %vm3930_vm4, %v3928_v60, %v3932_v12 }
 0xed7   :  { %v3935_v20 = vsel %vm3931_vm5, %v3929_v17, %v3933_v46  ;;  %v3948_v37 = vmul.f32 %v3941_v5, %v3934_v3 }
 0xed8   :  { %v3949_v43 = vmul.f32 %v3945_v2, %v3935_v20 }
 0xeda   :  { %v3950_v1 = vadd.f32 %v3949_v43, %v3948_v37 }
 0xedc   :  { %3951 = vadd.xlane.f32.xlu0 %v3950_v1 }
 0xf69   :  { %v3952_v33 = vpop.xlane.xlu0 %3951 }
 0xf6a   :  { %v3960_v34 = vadd.f32 %v4238_v63, %v3952_v33 }
 0xf6c   :  { %3962 = vst.msk [vmem:[%s6344_s13] sm:$0xff] %vm3961_vm6, %v3960_v34 }
 0xf6d   :  { %3967 = vsyncpa [#allocation8], 1 }
 0xf6e   :  { %3968 = vsyncpa [#allocation10], 1 }
 0xf6f   :  { %3969 = vsyncpa [#allocation13], 1 }
 0xf70   :  { %3970 = vsyncpa [#allocation16], 1 }

</bundles_post_ra>
